<compile_context>
chip_gen: v6e
topology: v6e:2x2x1
jax: 0.10.0
libtpu: 0.0.40
codegen_flags: <defaults>
</compile_context>

<pallas_src>
import math
import functools

import jax
import jax.numpy as jnp
from jax.experimental import pallas as pl
from jax.experimental.pallas import tpu as pltpu

LN_EPS = 1e-5  # PyTorch nn.LayerNorm default


# ----------------------------------------------------------------------------
# Fused kernel: whole TranAD forward for a block of B_blk samples
# ----------------------------------------------------------------------------

def tranad_kernel(src_ref, s1_ref, tgt_ref,
                  attn_in_w_ref, attn_in_b_ref, attn_out_w_ref, attn_out_b_ref,
                  ln_g_ref, ln_b_ref,
                  ffn_w1_ref, ffn_b1_ref, ffn_w2_ref, ffn_b2_ref,
                  out_w_ref, out_b_ref,
                  out_ref, *, nhead):
    Bb, W, F = src_ref.shape
    D = 2 * F
    hd = D // nhead
    BW = Bb * W
    sqrt_f = math.sqrt(F)

    # activations live as 2-D [BW, D]: M = B_blk*W fills MXU rows / vreg sublanes
    src2d = src_ref[...].reshape(BW, F)
    s1 = s1_ref[...].reshape(BW, D)       # cat(src, 0)*sqrt(F)+pe (wrapper-side)
    tgt_e = tgt_ref[...].reshape(BW, D)   # cat(tgt,tgt)*sqrt(F)+pe (wrapper-side)

    def vrow(ref, idx):                   # one stacked row as a [1, dim] value
        return ref[idx].reshape(1, -1)

    def layer_norm(y, idx):
        g = vrow(ln_g_ref, idx)           # [1, D]
        b = vrow(ln_b_ref, idx)           # [1, D]
        mu = jnp.mean(y, axis=-1, keepdims=True)
        var = jnp.mean(jnp.square(y - mu), axis=-1, keepdims=True)
        return (y - mu) * jax.lax.rsqrt(var + LN_EPS) * g + b

    def attention(xq, xkv, idx, self_attn):
        # nn.MultiheadAttention (batch_first, no mask, eval).  1/sqrt(hd) is
        # already folded into the Q columns of w_in / b_in at pack time.
        w_in = attn_in_w_ref[idx]         # [D, 3D]  (= in_proj_weight.T)
        b_in = vrow(attn_in_b_ref, idx)   # [1, 3D]
        w_out = attn_out_w_ref[idx]       # [D, D]   (= out_proj.weight.T)
        b_out = vrow(attn_out_b_ref, idx)  # [1, D]

        if self_attn:
            qkv = jnp.dot(xq, w_in, preferred_element_type=jnp.float32) + b_in
            q, k, v = qkv[:, :D], qkv[:, D:2 * D], qkv[:, 2 * D:]
        else:
            q = jnp.dot(xq, w_in[:, :D],
                        preferred_element_type=jnp.float32) + b_in[:, :D]
            kv = jnp.dot(xkv, w_in[:, D:],
                         preferred_element_type=jnp.float32) + b_in[:, D:]
            k, v = kv[:, :D], kv[:, D:]

        q3 = q.reshape(Bb, W, D)
        k3 = k.reshape(Bb, W, D)
        v3 = v.reshape(Bb, W, D)

        heads = []
        for h in range(nhead):            # static; nhead is tiny
            sl = slice(h * hd, (h + 1) * hd)
            s = jnp.einsum('bqd,bkd->bqk', q3[..., sl], k3[..., sl],
                           preferred_element_type=jnp.float32)     # MXU
            s = s - jnp.max(s, axis=-1, keepdims=True)
            p = jnp.exp(s)
            p = p / jnp.sum(p, axis=-1, keepdims=True)              # exact softmax
            heads.append(jnp.einsum('bqk,bkd->bqd', p, v3[..., sl],
                                    preferred_element_type=jnp.float32))
        o = jnp.concatenate(heads, axis=-1).reshape(BW, D)
        return jnp.dot(o, w_out, preferred_element_type=jnp.float32) + b_out

    def ffn(x, idx):
        h = jnp.dot(x, ffn_w1_ref[idx],
                    preferred_element_type=jnp.float32) + vrow(ffn_b1_ref, idx)
        h = jnp.maximum(h, 0.0)            # ReLU (nn.Transformer*Layer default)
        return jnp.dot(h, ffn_w2_ref[idx],
                       preferred_element_type=jnp.float32) + vrow(ffn_b2_ref, idx)

    def encoder_layer(x):                  # shared encoder (attn 0, ln 0/1, ffn 0)
        x = layer_norm(x + attention(x, x, 0, True), 0)
        x = layer_norm(x + ffn(x, 0), 1)
        return x

    def decoder_layer(x, mem, sa_idx, ca_idx, ln_base, ff_idx):
        x = layer_norm(x + attention(x, x, sa_idx, True), ln_base)
        x = layer_norm(x + attention(x, mem, ca_idx, False), ln_base + 1)
        x = layer_norm(x + ffn(x, ff_idx), ln_base + 2)
        return x

    def output_layer(x):
        y = jnp.dot(x, out_w_ref[...],
                    preferred_element_type=jnp.float32) + out_b_ref[...]
        return jax.nn.sigmoid(y)

    # ---- pass 1 (c = 0) ----
    mem1 = encoder_layer(s1)
    x1 = output_layer(decoder_layer(tgt_e, mem1, 1, 2, 2, 1))        # [BW, F]

    # ---- pass 2: c = (x1 - src)^2, injected into lanes F..2F-1 via a tiny
    #      selection matmul (MXU) instead of a lane-axis concat ----
    c = jnp.square(x1 - src2d)
    row_i = jax.lax.broadcasted_iota(jnp.int32, (F, D), 0)
    col_i = jax.lax.broadcasted_iota(jnp.int32, (F, D), 1)
    pad_right = (col_i == row_i + F).astype(jnp.float32)             # [F, D]
    s2 = s1 + sqrt_f * jnp.dot(c, pad_right,
                               preferred_element_type=jnp.float32)
    mem2 = encoder_layer(s2)
    x2 = output_layer(decoder_layer(tgt_e, mem2, 3, 4, 5, 2))        # [BW, F]

    # single lane-dense store: x1 ‖ x2 on the last axis
    out_ref[...] = jnp.concatenate([x1, x2], axis=-1).reshape(Bb, W, 2 * F)


# ----------------------------------------------------------------------------
# Wrapper: one pallas_call; single grid step by default, 2 on a 2-TC chip
# ----------------------------------------------------------------------------

def _default_num_blocks(batch):
    # v7x-class chips have 2 TensorCores; give each TC one big batch chunk.
    # v5e/v6e (1 TC): collapse to a single grid step to amortize step overhead.
    try:
        kind = jax.devices()[0].device_kind.lower()
    except Exception:
        kind = ""
    n_tc = 2 if "v7" in kind else 1
    return n_tc if (n_tc > 1 and batch % n_tc == 0) else 1


def tranad_forward(src, tgt, packed, feats, num_blocks=None):
    B, W, F = src.shape
    assert F == feats
    D = 2 * feats
    sqrt_f = math.sqrt(feats)

    if num_blocks is None:
        num_blocks = _default_num_blocks(B)
    assert B % num_blocks == 0
    Bb = B // num_blocks

    # Precompute embeddings wrapper-side (plain XLA ops, outside the kernel).
    pe = packed['pe'][:W]                                         # [W, D]
    s1 = jnp.concatenate([src, jnp.zeros_like(src)], axis=-1) * sqrt_f + pe
    tgt_emb = jnp.concatenate([tgt, tgt], axis=-1) * sqrt_f + pe

    param_list = [packed['attn_in_w'], packed['attn_in_b'],
                  packed['attn_out_w'], packed['attn_out_b'],
                  packed['ln_g'], packed['ln_b'],
                  packed['ffn_w1'], packed['ffn_b1'],
                  packed['ffn_w2'], packed['ffn_b2'],
                  packed['out_w'], packed['out_b']]

    def batch_spec(last):
        return pl.BlockSpec((Bb, W, last), lambda b: (b, 0, 0))

    def full_spec(a):
        return pl.BlockSpec(a.shape, lambda b, _nd=a.ndim: (0,) * _nd)

    in_specs = ([batch_spec(F), batch_spec(D), batch_spec(D)]
                + [full_spec(a) for a in param_list])
    out_specs = pl.BlockSpec((Bb, W, 2 * F), lambda b: (b, 0, 0))
    out_shape = jax.ShapeDtypeStruct((B, W, 2 * F), jnp.float32)

    kernel = functools.partial(tranad_kernel, nhead=feats)

    out = pl.pallas_call(
        kernel,
        out_shape=out_shape,
        grid=(num_blocks,),
        in_specs=in_specs,
        out_specs=out_specs,
        compiler_params=pltpu.CompilerParams(
            dimension_semantics=("parallel",)),
    )(src, tgt_emb, s1, *param_list) if False else pl.pallas_call(
        kernel,
        out_shape=out_shape,
        grid=(num_blocks,),
        in_specs=in_specs,
        out_specs=out_specs,
        compiler_params=pltpu.CompilerParams(
            dimension_semantics=("parallel",)),
    )(src, s1, tgt_emb, *param_list)

    return out[..., :F], out[..., F:]


# ----------------------------------------------------------------------------
# Deterministic parameters (PyTorch conventions) + packing into stacked arrays
# ----------------------------------------------------------------------------

def make_positional_encoding(max_len, d_model):
    position = jnp.arange(max_len, dtype=jnp.float32)[:, None]
    div_term = jnp.exp(jnp.arange(0, d_model, 2, dtype=jnp.float32)
                       * (-math.log(10000.0) / d_model))
    pe = jnp.zeros((max_len, d_model), jnp.float32)
    pe = pe.at[:, 0::2].set(jnp.sin(position * div_term))
    pe = pe.at[:, 1::2].set(jnp.cos(position * div_term))
    return pe                              # [max_len, d_model]


def init_params(key, feats, window_size, dim_feedforward=16):
    # NOTE: random init (not PyTorch's default initializers); for numerical
    # parity with the reference model, load real weights into this dict.
    d_model = 2 * feats
    keys = iter(jax.random.split(key, 64))

    def w(shape, scale=0.1):
        return (scale * jax.random.normal(next(keys), shape)).astype(jnp.float32)

    def attn_p():      # nn.MultiheadAttention: in_proj_weight/bias, out_proj
        return dict(in_w=w((3 * d_model, d_model)), in_b=w((3 * d_model,)),
                    out_w=w((d_model, d_model)), out_b=w((d_model,)))

    def ln_p():
        return dict(g=jnp.ones((d_model,), jnp.float32),
                    b=jnp.zeros((d_model,), jnp.float32))

    def ff_p():
        return dict(w1=w((dim_feedforward, d_model)), b1=w((dim_feedforward,)),
                    w2=w((d_model, dim_feedforward)), b2=w((d_model,)))

    return dict(
        enc=dict(sa=attn_p(), n1=ln_p(), ff=ff_p(), n2=ln_p()),
        dec1=dict(sa=attn_p(), n1=ln_p(), ca=attn_p(), n2=ln_p(), ff=ff_p(), n3=ln_p()),
        dec2=dict(sa=attn_p(), n1=ln_p(), ca=attn_p(), n2=ln_p(), ff=ff_p(), n3=ln_p()),
        out=dict(w=w((feats, d_model)), b=w((feats,))),
        pe=make_positional_encoding(window_size, d_model),
    )


def pack_params(p, feats):
    """Pack per-layer PyTorch-convention params into a few stacked arrays.

    Weights stored transposed ([in, out]) so the kernel computes x @ W.
    1/sqrt(head_dim) is folded into the Q rows of in_proj weight & bias.
    Biases/LN params are 2-D [N, dim] (no sublane-1 padding).
    Attention order: [enc.sa, dec1.sa, dec1.ca, dec2.sa, dec2.ca];
    LayerNorm order: [enc.n1, enc.n2, dec1.n1..n3, dec2.n1..n3];
    FFN order: [enc, dec1, dec2].
    """
    D = 2 * feats
    hd = D // feats
    q_scale = 1.0 / math.sqrt(hd)
    attn = [p['enc']['sa'], p['dec1']['sa'], p['dec1']['ca'],
            p['dec2']['sa'], p['dec2']['ca']]
    lns = [p['enc']['n1'], p['enc']['n2'],
           p['dec1']['n1'], p['dec1']['n2'], p['dec1']['n3'],
           p['dec2']['n1'], p['dec2']['n2'], p['dec2']['n3']]
    ffs = [p['enc']['ff'], p['dec1']['ff'], p['dec2']['ff']]

    def in_w(a):
        return a['in_w'].at[:D].multiply(q_scale).T               # [D, 3D]

    def in_b(a):
        return a['in_b'].at[:D].multiply(q_scale)                 # [3D]

    return dict(
        pe=p['pe'],                                               # [W, D]
        attn_in_w=jnp.stack([in_w(a) for a in attn]),             # [5, D, 3D]
        attn_in_b=jnp.stack([in_b(a) for a in attn]),             # [5, 3D]
        attn_out_w=jnp.stack([a['out_w'].T for a in attn]),       # [5, D, D]
        attn_out_b=jnp.stack([a['out_b'] for a in attn]),         # [5, D]
        ln_g=jnp.stack([l['g'] for l in lns]),                    # [8, D]
        ln_b=jnp.stack([l['b'] for l in lns]),                    # [8, D]
        ffn_w1=jnp.stack([f['w1'].T for f in ffs]),               # [3, D, Fff]
        ffn_b1=jnp.stack([f['b1'] for f in ffs]),                 # [3, Fff]
        ffn_w2=jnp.stack([f['w2'].T for f in ffs]),               # [3, Fff, D]
        ffn_b2=jnp.stack([f['b2'] for f in ffs]),                 # [3, D]
        out_w=p['out']['w'].T,                                    # [D, F]
        out_b=p['out']['b'].reshape(1, feats),                    # [1, F]
    )


# ----------------------------------------------------------------------------
# Pure-JAX reference (eval-mode PyTorch semantics) for a sanity check
# ----------------------------------------------------------------------------

def tranad_reference(src, tgt, p, feats):
    D = 2 * feats
    hd = D // feats
    W = src.shape[1]
    pe = p['pe'][:W]
    sqrt_f = math.sqrt(feats)

    def ln(x, q):
        mu = jnp.mean(x, -1, keepdims=True)
        var = jnp.mean(jnp.square(x - mu), -1, keepdims=True)
        return (x - mu) * jax.lax.rsqrt(var + LN_EPS) * q['g'] + q['b']

    def attn(xq, xkv, a):
        q = xq @ a['in_w'][:D].T + a['in_b'][:D]
        k = xkv @ a['in_w'][D:2 * D].T + a['in_b'][D:2 * D]
        v = xkv @ a['in_w'][2 * D:].T + a['in_b'][2 * D:]
        B = q.shape[0]
        qh = q.reshape(B, -1, feats, hd).transpose(0, 2, 1, 3)
        kh = k.reshape(B, -1, feats, hd).transpose(0, 2, 1, 3)
        vh = v.reshape(B, -1, feats, hd).transpose(0, 2, 1, 3)
        s = jnp.einsum('bhqd,bhkd->bhqk', qh, kh) / math.sqrt(hd)
        w = jax.nn.softmax(s, axis=-1)
        o = jnp.einsum('bhqk,bhkd->bhqd', w, vh)
        o = o.transpose(0, 2, 1, 3).reshape(B, -1, D)
        return o @ a['out_w'].T + a['out_b']

    def ffn(x, f):
        return jnp.maximum(x @ f['w1'].T + f['b1'], 0.0) @ f['w2'].T + f['b2']

    def enc_layer(x, L):
        x = ln(x + attn(x, x, L['sa']), L['n1'])
        return ln(x + ffn(x, L['ff']), L['n2'])

    def dec_layer(x, m, L):
        x = ln(x + attn(x, x, L['sa']), L['n1'])
        x = ln(x + attn(x, m, L['ca']), L['n2'])
        return ln(x + ffn(x, L['ff']), L['n3'])

    def out_layer(x):
        return jax.nn.sigmoid(x @ p['out']['w'].T + p['out']['b'])

    tgt_e = jnp.concatenate([tgt, tgt], -1) * sqrt_f + pe
    s1 = jnp.concatenate([src, jnp.zeros_like(src)], -1) * sqrt_f + pe
    x1 = out_layer(dec_layer(tgt_e, enc_layer(s1, p['enc']), p['dec1']))
    c = jnp.square(x1 - src)
    s2 = jnp.concatenate([src, c], -1) * sqrt_f + pe
    x2 = out_layer(dec_layer(tgt_e, enc_layer(s2, p['enc']), p['dec2']))
    return x1, x2


# ----------------------------------------------------------------------------
# Main
# ----------------------------------------------------------------------------

if __name__ == "__main__":
    feats = 4          # n_feats (= nhead)
    window = 8         # n_window (sequence length)
    batch = 2

    key = jax.random.PRNGKey(0)
    k_src, k_tgt, k_par = jax.random.split(key, 3)
    src = jax.random.normal(k_src, (batch, window, feats), jnp.float32)
    tgt = jax.random.normal(k_tgt, (batch, window, feats), jnp.float32)

    params = init_params(k_par, feats, window)
    packed = pack_params(params, feats)

    fwd = jax.jit(functools.partial(tranad_forward, feats=feats))
    x1, x2 = fwd(src, tgt, packed)
    jax.block_until_ready((x1, x2))

    assert x1.shape == (batch, window, feats)
    assert x2.shape == (batch, window, feats)
    assert bool(jnp.isfinite(x1).all()) and bool(jnp.isfinite(x2).all())

    # Loose sanity check against a pure-JAX eval-mode reference (tolerance is
    # generous to allow for TPU matmul precision differences).
    with jax.default_matmul_precision("highest"):
        r1, r2 = tranad_reference(src, tgt, params, feats)
    assert float(jnp.max(jnp.abs(x1 - r1))) < 5e-2
    assert float(jnp.max(jnp.abs(x2 - r2))) < 5e-2
    # TODO(synk): training-mode dropout (p=0.1) is not implemented; eval-mode
    # forward semantics only.
    print("KERNEL_OK")
</pallas_src>

<mosaic_0001>
module attributes {stable_mosaic.version = 11 : i64} {
  func.func @tranad_kernel(%arg0: i32, %arg1: memref<2x8x4xf32, #tpu.memory_space<vmem>>, %arg2: memref<2x8x8xf32, #tpu.memory_space<vmem>>, %arg3: memref<2x8x8xf32, #tpu.memory_space<vmem>>, %arg4: memref<5x8x24xf32, #tpu.memory_space<vmem>>, %arg5: memref<5x24xf32, #tpu.memory_space<vmem>>, %arg6: memref<5x8x8xf32, #tpu.memory_space<vmem>>, %arg7: memref<5x8xf32, #tpu.memory_space<vmem>>, %arg8: memref<8x8xf32, #tpu.memory_space<vmem>>, %arg9: memref<8x8xf32, #tpu.memory_space<vmem>>, %arg10: memref<3x8x16xf32, #tpu.memory_space<vmem>>, %arg11: memref<3x16xf32, #tpu.memory_space<vmem>>, %arg12: memref<3x16x8xf32, #tpu.memory_space<vmem>>, %arg13: memref<3x8xf32, #tpu.memory_space<vmem>>, %arg14: memref<8x4xf32, #tpu.memory_space<vmem>>, %arg15: memref<1x4xf32, #tpu.memory_space<vmem>>, %arg16: memref<2x8x8xf32, #tpu.memory_space<vmem>>) attributes {dimension_semantics = [#tpu.dimension_semantics<parallel>], iteration_bounds = array<i64: 1>, scalar_prefetch = 0 : i64, scratch_operands = 0 : i64, tpu.core_type = #tpu.core_type<tc>, window_params = [{transform_indices = @transform_0, window_bounds = array<i64: 2, 8, 4>}, {transform_indices = @transform_1, window_bounds = array<i64: 2, 8, 8>}, {transform_indices = @transform_2, window_bounds = array<i64: 2, 8, 8>}, {pipeline_mode = #tpu.pipeline_mode<synchronous>, transform_indices = @transform_3, window_bounds = array<i64: 5, 8, 24>}, {pipeline_mode = #tpu.pipeline_mode<synchronous>, transform_indices = @transform_4, window_bounds = array<i64: 5, 24>}, {pipeline_mode = #tpu.pipeline_mode<synchronous>, transform_indices = @transform_5, window_bounds = array<i64: 5, 8, 8>}, {pipeline_mode = #tpu.pipeline_mode<synchronous>, transform_indices = @transform_6, window_bounds = array<i64: 5, 8>}, {pipeline_mode = #tpu.pipeline_mode<synchronous>, transform_indices = @transform_7, window_bounds = array<i64: 8, 8>}, {pipeline_mode = #tpu.pipeline_mode<synchronous>, transform_indices = @transform_8, window_bounds = array<i64: 8, 8>}, {pipeline_mode = #tpu.pipeline_mode<synchronous>, transform_indices = @transform_9, window_bounds = array<i64: 3, 8, 16>}, {pipeline_mode = #tpu.pipeline_mode<synchronous>, transform_indices = @transform_10, window_bounds = array<i64: 3, 16>}, {pipeline_mode = #tpu.pipeline_mode<synchronous>, transform_indices = @transform_11, window_bounds = array<i64: 3, 16, 8>}, {pipeline_mode = #tpu.pipeline_mode<synchronous>, transform_indices = @transform_12, window_bounds = array<i64: 3, 8>}, {pipeline_mode = #tpu.pipeline_mode<synchronous>, transform_indices = @transform_13, window_bounds = array<i64: 8, 4>}, {pipeline_mode = #tpu.pipeline_mode<synchronous>, transform_indices = @transform_14, window_bounds = array<i64: 1, 4>}, {transform_indices = @transform_15, window_bounds = array<i64: 2, 8, 8>}]} {
    %c0 = arith.constant 0 : index
    %c0_0 = arith.constant 0 : index
    %c0_1 = arith.constant 0 : index
    %0 = vector.load %arg1[%c0, %c0_0, %c0_1] : memref<2x8x4xf32, #tpu.memory_space<vmem>>, vector<2x8x4xf32>
    %1 = vector.shape_cast %0 : vector<2x8x4xf32> to vector<16x4xf32>
    %c0_2 = arith.constant 0 : index
    %c0_3 = arith.constant 0 : index
    %c0_4 = arith.constant 0 : index
    %2 = vector.load %arg2[%c0_2, %c0_3, %c0_4] : memref<2x8x8xf32, #tpu.memory_space<vmem>>, vector<2x8x8xf32>
    %3 = vector.shape_cast %2 : vector<2x8x8xf32> to vector<16x8xf32>
    %c0_5 = arith.constant 0 : index
    %c0_6 = arith.constant 0 : index
    %c0_7 = arith.constant 0 : index
    %4 = vector.load %arg3[%c0_5, %c0_6, %c0_7] : memref<2x8x8xf32, #tpu.memory_space<vmem>>, vector<2x8x8xf32>
    %5 = vector.shape_cast %4 : vector<2x8x8xf32> to vector<16x8xf32>
    %c0_8 = arith.constant 0 : index
    %c0_9 = arith.constant 0 : index
    %c0_10 = arith.constant 0 : index
    %6 = vector.load %arg4[%c0_8, %c0_9, %c0_10] : memref<5x8x24xf32, #tpu.memory_space<vmem>>, vector<1x8x24xf32>
    %7 = vector.shape_cast %6 : vector<1x8x24xf32> to vector<8x24xf32>
    %c0_11 = arith.constant 0 : index
    %c0_12 = arith.constant 0 : index
    %8 = vector.load %arg5[%c0_11, %c0_12] : memref<5x24xf32, #tpu.memory_space<vmem>>, vector<1x24xf32>
    %9 = vector.shape_cast %8 : vector<1x24xf32> to vector<24xf32>
    %10 = vector.shape_cast %9 : vector<24xf32> to vector<1x24xf32>
    %c0_13 = arith.constant 0 : index
    %c0_14 = arith.constant 0 : index
    %c0_15 = arith.constant 0 : index
    %11 = vector.load %arg6[%c0_13, %c0_14, %c0_15] : memref<5x8x8xf32, #tpu.memory_space<vmem>>, vector<1x8x8xf32>
    %12 = vector.shape_cast %11 : vector<1x8x8xf32> to vector<8x8xf32>
    %c0_16 = arith.constant 0 : index
    %c0_17 = arith.constant 0 : index
    %13 = vector.load %arg7[%c0_16, %c0_17] : memref<5x8xf32, #tpu.memory_space<vmem>>, vector<1x8xf32>
    %14 = vector.shape_cast %13 : vector<1x8xf32> to vector<8xf32>
    %15 = vector.shape_cast %14 : vector<8xf32> to vector<1x8xf32>
    %cst = arith.constant dense<0.000000e+00> : vector<16x24xf32>
    %16 = tpu.matmul %3, %7, %cst {dimension_numbers = #tpu.dot_dimension_numbers<[1], [0], [0], [1], [0, 0, 1, 1], [], []>} : vector<16x8xf32>, vector<8x24xf32>, vector<16x24xf32> -> vector<16x24xf32>
    %17 = vector.broadcast %10 : vector<1x24xf32> to vector<16x24xf32>
    %18 = arith.addf %16, %17 : vector<16x24xf32>
    %19 = vector.extract_strided_slice %18 {offsets = [0, 0], sizes = [16, 8], strides = [1, 1]} : vector<16x24xf32> to vector<16x8xf32>
    %20 = vector.extract_strided_slice %18 {offsets = [0, 8], sizes = [16, 8], strides = [1, 1]} : vector<16x24xf32> to vector<16x8xf32>
    %21 = vector.extract_strided_slice %18 {offsets = [0, 16], sizes = [16, 8], strides = [1, 1]} : vector<16x24xf32> to vector<16x8xf32>
    %22 = vector.shape_cast %19 : vector<16x8xf32> to vector<2x8x8xf32>
    %23 = vector.shape_cast %20 : vector<16x8xf32> to vector<2x8x8xf32>
    %24 = vector.shape_cast %21 : vector<16x8xf32> to vector<2x8x8xf32>
    %25 = vector.extract_strided_slice %22 {offsets = [0, 0, 0], sizes = [2, 8, 2], strides = [1, 1, 1]} : vector<2x8x8xf32> to vector<2x8x2xf32>
    %26 = vector.extract_strided_slice %23 {offsets = [0, 0, 0], sizes = [2, 8, 2], strides = [1, 1, 1]} : vector<2x8x8xf32> to vector<2x8x2xf32>
    "tpu.trace_start"() <{level = 10 : i32, message = "bqd,bkd->bqk"}> : () -> ()
    %cst_18 = arith.constant dense<0.000000e+00> : vector<2x8x8xf32>
    %27 = tpu.matmul %25, %26, %cst_18 {dimension_numbers = #tpu.dot_dimension_numbers<[2], [2], [1], [1], [0, 0, 0, 1, 1, 1], [0], [0]>} : vector<2x8x2xf32>, vector<2x8x2xf32>, vector<2x8x8xf32> -> vector<2x8x8xf32>
    "tpu.trace_stop"() : () -> ()
    %cst_19 = arith.constant dense<0xFF800000> : vector<2x8xf32>
    %28 = vector.multi_reduction <maximumf>, %27, %cst_19 [2] : vector<2x8x8xf32> to vector<2x8xf32>
    %29 = vector.shape_cast %28 : vector<2x8xf32> to vector<2x8x1xf32>
    %30 = vector.broadcast %29 : vector<2x8x1xf32> to vector<2x8x8xf32>
    %31 = arith.subf %27, %30 : vector<2x8x8xf32>
    %32 = math.exp %31 : vector<2x8x8xf32>
    %cst_20 = arith.constant dense<0.000000e+00> : vector<2x8xf32>
    %33 = vector.multi_reduction <add>, %32, %cst_20 [2] : vector<2x8x8xf32> to vector<2x8xf32>
    %34 = vector.shape_cast %33 : vector<2x8xf32> to vector<2x8x1xf32>
    %35 = vector.broadcast %34 : vector<2x8x1xf32> to vector<2x8x8xf32>
    %36 = arith.divf %32, %35 : vector<2x8x8xf32>
    %37 = vector.extract_strided_slice %24 {offsets = [0, 0, 0], sizes = [2, 8, 2], strides = [1, 1, 1]} : vector<2x8x8xf32> to vector<2x8x2xf32>
    "tpu.trace_start"() <{level = 10 : i32, message = "bqk,bkd->bqd"}> : () -> ()
    %cst_21 = arith.constant dense<0.000000e+00> : vector<2x8x2xf32>
    %38 = tpu.matmul %36, %37, %cst_21 {dimension_numbers = #tpu.dot_dimension_numbers<[2], [1], [1], [2], [0, 0, 0, 1, 1, 2], [0], [0]>} : vector<2x8x8xf32>, vector<2x8x2xf32>, vector<2x8x2xf32> -> vector<2x8x2xf32>
    "tpu.trace_stop"() : () -> ()
    %39 = vector.extract_strided_slice %22 {offsets = [0, 0, 2], sizes = [2, 8, 2], strides = [1, 1, 1]} : vector<2x8x8xf32> to vector<2x8x2xf32>
    %40 = vector.extract_strided_slice %23 {offsets = [0, 0, 2], sizes = [2, 8, 2], strides = [1, 1, 1]} : vector<2x8x8xf32> to vector<2x8x2xf32>
    "tpu.trace_start"() <{level = 10 : i32, message = "bqd,bkd->bqk"}> : () -> ()
    %cst_22 = arith.constant dense<0.000000e+00> : vector<2x8x8xf32>
    %41 = tpu.matmul %39, %40, %cst_22 {dimension_numbers = #tpu.dot_dimension_numbers<[2], [2], [1], [1], [0, 0, 0, 1, 1, 1], [0], [0]>} : vector<2x8x2xf32>, vector<2x8x2xf32>, vector<2x8x8xf32> -> vector<2x8x8xf32>
    "tpu.trace_stop"() : () -> ()
    %cst_23 = arith.constant dense<0xFF800000> : vector<2x8xf32>
    %42 = vector.multi_reduction <maximumf>, %41, %cst_23 [2] : vector<2x8x8xf32> to vector<2x8xf32>
    %43 = vector.shape_cast %42 : vector<2x8xf32> to vector<2x8x1xf32>
    %44 = vector.broadcast %43 : vector<2x8x1xf32> to vector<2x8x8xf32>
    %45 = arith.subf %41, %44 : vector<2x8x8xf32>
    %46 = math.exp %45 : vector<2x8x8xf32>
    %cst_24 = arith.constant dense<0.000000e+00> : vector<2x8xf32>
    %47 = vector.multi_reduction <add>, %46, %cst_24 [2] : vector<2x8x8xf32> to vector<2x8xf32>
    %48 = vector.shape_cast %47 : vector<2x8xf32> to vector<2x8x1xf32>
    %49 = vector.broadcast %48 : vector<2x8x1xf32> to vector<2x8x8xf32>
    %50 = arith.divf %46, %49 : vector<2x8x8xf32>
    %51 = vector.extract_strided_slice %24 {offsets = [0, 0, 2], sizes = [2, 8, 2], strides = [1, 1, 1]} : vector<2x8x8xf32> to vector<2x8x2xf32>
    "tpu.trace_start"() <{level = 10 : i32, message = "bqk,bkd->bqd"}> : () -> ()
    %cst_25 = arith.constant dense<0.000000e+00> : vector<2x8x2xf32>
    %52 = tpu.matmul %50, %51, %cst_25 {dimension_numbers = #tpu.dot_dimension_numbers<[2], [1], [1], [2], [0, 0, 0, 1, 1, 2], [0], [0]>} : vector<2x8x8xf32>, vector<2x8x2xf32>, vector<2x8x2xf32> -> vector<2x8x2xf32>
    "tpu.trace_stop"() : () -> ()
    %53 = vector.extract_strided_slice %22 {offsets = [0, 0, 4], sizes = [2, 8, 2], strides = [1, 1, 1]} : vector<2x8x8xf32> to vector<2x8x2xf32>
    %54 = vector.extract_strided_slice %23 {offsets = [0, 0, 4], sizes = [2, 8, 2], strides = [1, 1, 1]} : vector<2x8x8xf32> to vector<2x8x2xf32>
    "tpu.trace_start"() <{level = 10 : i32, message = "bqd,bkd->bqk"}> : () -> ()
    %cst_26 = arith.constant dense<0.000000e+00> : vector<2x8x8xf32>
    %55 = tpu.matmul %53, %54, %cst_26 {dimension_numbers = #tpu.dot_dimension_numbers<[2], [2], [1], [1], [0, 0, 0, 1, 1, 1], [0], [0]>} : vector<2x8x2xf32>, vector<2x8x2xf32>, vector<2x8x8xf32> -> vector<2x8x8xf32>
    "tpu.trace_stop"() : () -> ()
    %cst_27 = arith.constant dense<0xFF800000> : vector<2x8xf32>
    %56 = vector.multi_reduction <maximumf>, %55, %cst_27 [2] : vector<2x8x8xf32> to vector<2x8xf32>
    %57 = vector.shape_cast %56 : vector<2x8xf32> to vector<2x8x1xf32>
    %58 = vector.broadcast %57 : vector<2x8x1xf32> to vector<2x8x8xf32>
    %59 = arith.subf %55, %58 : vector<2x8x8xf32>
    %60 = math.exp %59 : vector<2x8x8xf32>
    %cst_28 = arith.constant dense<0.000000e+00> : vector<2x8xf32>
    %61 = vector.multi_reduction <add>, %60, %cst_28 [2] : vector<2x8x8xf32> to vector<2x8xf32>
    %62 = vector.shape_cast %61 : vector<2x8xf32> to vector<2x8x1xf32>
    %63 = vector.broadcast %62 : vector<2x8x1xf32> to vector<2x8x8xf32>
    %64 = arith.divf %60, %63 : vector<2x8x8xf32>
    %65 = vector.extract_strided_slice %24 {offsets = [0, 0, 4], sizes = [2, 8, 2], strides = [1, 1, 1]} : vector<2x8x8xf32> to vector<2x8x2xf32>
    "tpu.trace_start"() <{level = 10 : i32, message = "bqk,bkd->bqd"}> : () -> ()
    %cst_29 = arith.constant dense<0.000000e+00> : vector<2x8x2xf32>
    %66 = tpu.matmul %64, %65, %cst_29 {dimension_numbers = #tpu.dot_dimension_numbers<[2], [1], [1], [2], [0, 0, 0, 1, 1, 2], [0], [0]>} : vector<2x8x8xf32>, vector<2x8x2xf32>, vector<2x8x2xf32> -> vector<2x8x2xf32>
    "tpu.trace_stop"() : () -> ()
    %67 = vector.extract_strided_slice %22 {offsets = [0, 0, 6], sizes = [2, 8, 2], strides = [1, 1, 1]} : vector<2x8x8xf32> to vector<2x8x2xf32>
    %68 = vector.extract_strided_slice %23 {offsets = [0, 0, 6], sizes = [2, 8, 2], strides = [1, 1, 1]} : vector<2x8x8xf32> to vector<2x8x2xf32>
    "tpu.trace_start"() <{level = 10 : i32, message = "bqd,bkd->bqk"}> : () -> ()
    %cst_30 = arith.constant dense<0.000000e+00> : vector<2x8x8xf32>
    %69 = tpu.matmul %67, %68, %cst_30 {dimension_numbers = #tpu.dot_dimension_numbers<[2], [2], [1], [1], [0, 0, 0, 1, 1, 1], [0], [0]>} : vector<2x8x2xf32>, vector<2x8x2xf32>, vector<2x8x8xf32> -> vector<2x8x8xf32>
    "tpu.trace_stop"() : () -> ()
    %cst_31 = arith.constant dense<0xFF800000> : vector<2x8xf32>
    %70 = vector.multi_reduction <maximumf>, %69, %cst_31 [2] : vector<2x8x8xf32> to vector<2x8xf32>
    %71 = vector.shape_cast %70 : vector<2x8xf32> to vector<2x8x1xf32>
    %72 = vector.broadcast %71 : vector<2x8x1xf32> to vector<2x8x8xf32>
    %73 = arith.subf %69, %72 : vector<2x8x8xf32>
    %74 = math.exp %73 : vector<2x8x8xf32>
    %cst_32 = arith.constant dense<0.000000e+00> : vector<2x8xf32>
    %75 = vector.multi_reduction <add>, %74, %cst_32 [2] : vector<2x8x8xf32> to vector<2x8xf32>
    %76 = vector.shape_cast %75 : vector<2x8xf32> to vector<2x8x1xf32>
    %77 = vector.broadcast %76 : vector<2x8x1xf32> to vector<2x8x8xf32>
    %78 = arith.divf %74, %77 : vector<2x8x8xf32>
    %79 = vector.extract_strided_slice %24 {offsets = [0, 0, 6], sizes = [2, 8, 2], strides = [1, 1, 1]} : vector<2x8x8xf32> to vector<2x8x2xf32>
    "tpu.trace_start"() <{level = 10 : i32, message = "bqk,bkd->bqd"}> : () -> ()
    %cst_33 = arith.constant dense<0.000000e+00> : vector<2x8x2xf32>
    %80 = tpu.matmul %78, %79, %cst_33 {dimension_numbers = #tpu.dot_dimension_numbers<[2], [1], [1], [2], [0, 0, 0, 1, 1, 2], [0], [0]>} : vector<2x8x8xf32>, vector<2x8x2xf32>, vector<2x8x2xf32> -> vector<2x8x2xf32>
    "tpu.trace_stop"() : () -> ()
    %81 = tpu.concatenate %38, %52, %66, %80 in 2 : vector<2x8x2xf32>, vector<2x8x2xf32>, vector<2x8x2xf32>, vector<2x8x2xf32> -> vector<2x8x8xf32>
    %82 = vector.shape_cast %81 : vector<2x8x8xf32> to vector<16x8xf32>
    %cst_34 = arith.constant dense<0.000000e+00> : vector<16x8xf32>
    %83 = tpu.matmul %82, %12, %cst_34 {dimension_numbers = #tpu.dot_dimension_numbers<[1], [0], [0], [1], [0, 0, 1, 1], [], []>} : vector<16x8xf32>, vector<8x8xf32>, vector<16x8xf32> -> vector<16x8xf32>
    %84 = vector.broadcast %15 : vector<1x8xf32> to vector<16x8xf32>
    %85 = arith.addf %83, %84 : vector<16x8xf32>
    %86 = arith.addf %3, %85 : vector<16x8xf32>
    %c0_35 = arith.constant 0 : index
    %c0_36 = arith.constant 0 : index
    %87 = vector.load %arg8[%c0_35, %c0_36] : memref<8x8xf32, #tpu.memory_space<vmem>>, vector<1x8xf32>
    %88 = vector.shape_cast %87 : vector<1x8xf32> to vector<8xf32>
    %89 = vector.shape_cast %88 : vector<8xf32> to vector<1x8xf32>
    %c0_37 = arith.constant 0 : index
    %c0_38 = arith.constant 0 : index
    %90 = vector.load %arg9[%c0_37, %c0_38] : memref<8x8xf32, #tpu.memory_space<vmem>>, vector<1x8xf32>
    %91 = vector.shape_cast %90 : vector<1x8xf32> to vector<8xf32>
    %92 = vector.shape_cast %91 : vector<8xf32> to vector<1x8xf32>
    %cst_39 = arith.constant dense<0.000000e+00> : vector<16xf32>
    %93 = vector.multi_reduction <add>, %86, %cst_39 [1] : vector<16x8xf32> to vector<16xf32>
    %94 = vector.shape_cast %93 : vector<16xf32> to vector<16x1xf32>
    %cst_40 = arith.constant 8.000000e+00 : f32
    %95 = vector.broadcast %cst_40 : f32 to vector<16x1xf32>
    %96 = arith.divf %94, %95 : vector<16x1xf32>
    %97 = vector.broadcast %96 : vector<16x1xf32> to vector<16x8xf32>
    %98 = arith.subf %86, %97 : vector<16x8xf32>
    %99 = arith.mulf %98, %98 : vector<16x8xf32>
    %cst_41 = arith.constant dense<0.000000e+00> : vector<16xf32>
    %100 = vector.multi_reduction <add>, %99, %cst_41 [1] : vector<16x8xf32> to vector<16xf32>
    %101 = vector.shape_cast %100 : vector<16xf32> to vector<16x1xf32>
    %cst_42 = arith.constant 8.000000e+00 : f32
    %102 = vector.broadcast %cst_42 : f32 to vector<16x1xf32>
    %103 = arith.divf %101, %102 : vector<16x1xf32>
    %104 = vector.broadcast %96 : vector<16x1xf32> to vector<16x8xf32>
    %105 = arith.subf %86, %104 : vector<16x8xf32>
    %cst_43 = arith.constant 9.99999974E-6 : f32
    %106 = vector.broadcast %cst_43 : f32 to vector<16x1xf32>
    %107 = arith.addf %103, %106 : vector<16x1xf32>
    %108 = math.rsqrt %107 : vector<16x1xf32>
    %109 = vector.broadcast %108 : vector<16x1xf32> to vector<16x8xf32>
    %110 = arith.mulf %105, %109 : vector<16x8xf32>
    %111 = vector.broadcast %89 : vector<1x8xf32> to vector<16x8xf32>
    %112 = arith.mulf %110, %111 : vector<16x8xf32>
    %113 = vector.broadcast %92 : vector<1x8xf32> to vector<16x8xf32>
    %114 = arith.addf %112, %113 : vector<16x8xf32>
    %c0_44 = arith.constant 0 : index
    %c0_45 = arith.constant 0 : index
    %c0_46 = arith.constant 0 : index
    %115 = vector.load %arg10[%c0_44, %c0_45, %c0_46] : memref<3x8x16xf32, #tpu.memory_space<vmem>>, vector<1x8x16xf32>
    %116 = vector.shape_cast %115 : vector<1x8x16xf32> to vector<8x16xf32>
    %cst_47 = arith.constant dense<0.000000e+00> : vector<16x16xf32>
    %117 = tpu.matmul %114, %116, %cst_47 {dimension_numbers = #tpu.dot_dimension_numbers<[1], [0], [0], [1], [0, 0, 1, 1], [], []>} : vector<16x8xf32>, vector<8x16xf32>, vector<16x16xf32> -> vector<16x16xf32>
    %c0_48 = arith.constant 0 : index
    %c0_49 = arith.constant 0 : index
    %118 = vector.load %arg11[%c0_48, %c0_49] : memref<3x16xf32, #tpu.memory_space<vmem>>, vector<1x16xf32>
    %119 = vector.shape_cast %118 : vector<1x16xf32> to vector<16xf32>
    %120 = vector.shape_cast %119 : vector<16xf32> to vector<1x16xf32>
    %121 = vector.broadcast %120 : vector<1x16xf32> to vector<16x16xf32>
    %122 = arith.addf %117, %121 : vector<16x16xf32>
    %cst_50 = arith.constant 0.000000e+00 : f32
    %123 = vector.broadcast %cst_50 : f32 to vector<16x16xf32>
    %124 = arith.maximumf %122, %123 : vector<16x16xf32>
    %c0_51 = arith.constant 0 : index
    %c0_52 = arith.constant 0 : index
    %c0_53 = arith.constant 0 : index
    %125 = vector.load %arg12[%c0_51, %c0_52, %c0_53] : memref<3x16x8xf32, #tpu.memory_space<vmem>>, vector<1x16x8xf32>
    %126 = vector.shape_cast %125 : vector<1x16x8xf32> to vector<16x8xf32>
    %cst_54 = arith.constant dense<0.000000e+00> : vector<16x8xf32>
    %127 = tpu.matmul %124, %126, %cst_54 {dimension_numbers = #tpu.dot_dimension_numbers<[1], [0], [0], [1], [0, 0, 1, 1], [], []>} : vector<16x16xf32>, vector<16x8xf32>, vector<16x8xf32> -> vector<16x8xf32>
    %c0_55 = arith.constant 0 : index
    %c0_56 = arith.constant 0 : index
    %128 = vector.load %arg13[%c0_55, %c0_56] : memref<3x8xf32, #tpu.memory_space<vmem>>, vector<1x8xf32>
    %129 = vector.shape_cast %128 : vector<1x8xf32> to vector<8xf32>
    %130 = vector.shape_cast %129 : vector<8xf32> to vector<1x8xf32>
    %131 = vector.broadcast %130 : vector<1x8xf32> to vector<16x8xf32>
    %132 = arith.addf %127, %131 : vector<16x8xf32>
    %133 = arith.addf %114, %132 : vector<16x8xf32>
    %c1 = arith.constant 1 : index
    %c0_57 = arith.constant 0 : index
    %134 = vector.load %arg8[%c1, %c0_57] : memref<8x8xf32, #tpu.memory_space<vmem>>, vector<1x8xf32>
    %135 = vector.shape_cast %134 : vector<1x8xf32> to vector<8xf32>
    %136 = vector.shape_cast %135 : vector<8xf32> to vector<1x8xf32>
    %c1_58 = arith.constant 1 : index
    %c0_59 = arith.constant 0 : index
    %137 = vector.load %arg9[%c1_58, %c0_59] : memref<8x8xf32, #tpu.memory_space<vmem>>, vector<1x8xf32>
    %138 = vector.shape_cast %137 : vector<1x8xf32> to vector<8xf32>
    %139 = vector.shape_cast %138 : vector<8xf32> to vector<1x8xf32>
    %cst_60 = arith.constant dense<0.000000e+00> : vector<16xf32>
    %140 = vector.multi_reduction <add>, %133, %cst_60 [1] : vector<16x8xf32> to vector<16xf32>
    %141 = vector.shape_cast %140 : vector<16xf32> to vector<16x1xf32>
    %cst_61 = arith.constant 8.000000e+00 : f32
    %142 = vector.broadcast %cst_61 : f32 to vector<16x1xf32>
    %143 = arith.divf %141, %142 : vector<16x1xf32>
    %144 = vector.broadcast %143 : vector<16x1xf32> to vector<16x8xf32>
    %145 = arith.subf %133, %144 : vector<16x8xf32>
    %146 = arith.mulf %145, %145 : vector<16x8xf32>
    %cst_62 = arith.constant dense<0.000000e+00> : vector<16xf32>
    %147 = vector.multi_reduction <add>, %146, %cst_62 [1] : vector<16x8xf32> to vector<16xf32>
    %148 = vector.shape_cast %147 : vector<16xf32> to vector<16x1xf32>
    %cst_63 = arith.constant 8.000000e+00 : f32
    %149 = vector.broadcast %cst_63 : f32 to vector<16x1xf32>
    %150 = arith.divf %148, %149 : vector<16x1xf32>
    %151 = vector.broadcast %143 : vector<16x1xf32> to vector<16x8xf32>
    %152 = arith.subf %133, %151 : vector<16x8xf32>
    %cst_64 = arith.constant 9.99999974E-6 : f32
    %153 = vector.broadcast %cst_64 : f32 to vector<16x1xf32>
    %154 = arith.addf %150, %153 : vector<16x1xf32>
    %155 = math.rsqrt %154 : vector<16x1xf32>
    %156 = vector.broadcast %155 : vector<16x1xf32> to vector<16x8xf32>
    %157 = arith.mulf %152, %156 : vector<16x8xf32>
    %158 = vector.broadcast %136 : vector<1x8xf32> to vector<16x8xf32>
    %159 = arith.mulf %157, %158 : vector<16x8xf32>
    %160 = vector.broadcast %139 : vector<1x8xf32> to vector<16x8xf32>
    %161 = arith.addf %159, %160 : vector<16x8xf32>
    %c1_65 = arith.constant 1 : index
    %c0_66 = arith.constant 0 : index
    %c0_67 = arith.constant 0 : index
    %162 = vector.load %arg4[%c1_65, %c0_66, %c0_67] : memref<5x8x24xf32, #tpu.memory_space<vmem>>, vector<1x8x24xf32>
    %163 = vector.shape_cast %162 : vector<1x8x24xf32> to vector<8x24xf32>
    %c1_68 = arith.constant 1 : index
    %c0_69 = arith.constant 0 : index
    %164 = vector.load %arg5[%c1_68, %c0_69] : memref<5x24xf32, #tpu.memory_space<vmem>>, vector<1x24xf32>
    %165 = vector.shape_cast %164 : vector<1x24xf32> to vector<24xf32>
    %166 = vector.shape_cast %165 : vector<24xf32> to vector<1x24xf32>
    %c1_70 = arith.constant 1 : index
    %c0_71 = arith.constant 0 : index
    %c0_72 = arith.constant 0 : index
    %167 = vector.load %arg6[%c1_70, %c0_71, %c0_72] : memref<5x8x8xf32, #tpu.memory_space<vmem>>, vector<1x8x8xf32>
    %168 = vector.shape_cast %167 : vector<1x8x8xf32> to vector<8x8xf32>
    %c1_73 = arith.constant 1 : index
    %c0_74 = arith.constant 0 : index
    %169 = vector.load %arg7[%c1_73, %c0_74] : memref<5x8xf32, #tpu.memory_space<vmem>>, vector<1x8xf32>
    %170 = vector.shape_cast %169 : vector<1x8xf32> to vector<8xf32>
    %171 = vector.shape_cast %170 : vector<8xf32> to vector<1x8xf32>
    %cst_75 = arith.constant dense<0.000000e+00> : vector<16x24xf32>
    %172 = tpu.matmul %5, %163, %cst_75 {dimension_numbers = #tpu.dot_dimension_numbers<[1], [0], [0], [1], [0, 0, 1, 1], [], []>} : vector<16x8xf32>, vector<8x24xf32>, vector<16x24xf32> -> vector<16x24xf32>
    %173 = vector.broadcast %166 : vector<1x24xf32> to vector<16x24xf32>
    %174 = arith.addf %172, %173 : vector<16x24xf32>
    %175 = vector.extract_strided_slice %174 {offsets = [0, 0], sizes = [16, 8], strides = [1, 1]} : vector<16x24xf32> to vector<16x8xf32>
    %176 = vector.extract_strided_slice %174 {offsets = [0, 8], sizes = [16, 8], strides = [1, 1]} : vector<16x24xf32> to vector<16x8xf32>
    %177 = vector.extract_strided_slice %174 {offsets = [0, 16], sizes = [16, 8], strides = [1, 1]} : vector<16x24xf32> to vector<16x8xf32>
    %178 = vector.shape_cast %175 : vector<16x8xf32> to vector<2x8x8xf32>
    %179 = vector.shape_cast %176 : vector<16x8xf32> to vector<2x8x8xf32>
    %180 = vector.shape_cast %177 : vector<16x8xf32> to vector<2x8x8xf32>
    %181 = vector.extract_strided_slice %178 {offsets = [0, 0, 0], sizes = [2, 8, 2], strides = [1, 1, 1]} : vector<2x8x8xf32> to vector<2x8x2xf32>
    %182 = vector.extract_strided_slice %179 {offsets = [0, 0, 0], sizes = [2, 8, 2], strides = [1, 1, 1]} : vector<2x8x8xf32> to vector<2x8x2xf32>
    "tpu.trace_start"() <{level = 10 : i32, message = "bqd,bkd->bqk"}> : () -> ()
    %cst_76 = arith.constant dense<0.000000e+00> : vector<2x8x8xf32>
    %183 = tpu.matmul %181, %182, %cst_76 {dimension_numbers = #tpu.dot_dimension_numbers<[2], [2], [1], [1], [0, 0, 0, 1, 1, 1], [0], [0]>} : vector<2x8x2xf32>, vector<2x8x2xf32>, vector<2x8x8xf32> -> vector<2x8x8xf32>
    "tpu.trace_stop"() : () -> ()
    %cst_77 = arith.constant dense<0xFF800000> : vector<2x8xf32>
    %184 = vector.multi_reduction <maximumf>, %183, %cst_77 [2] : vector<2x8x8xf32> to vector<2x8xf32>
    %185 = vector.shape_cast %184 : vector<2x8xf32> to vector<2x8x1xf32>
    %186 = vector.broadcast %185 : vector<2x8x1xf32> to vector<2x8x8xf32>
    %187 = arith.subf %183, %186 : vector<2x8x8xf32>
    %188 = math.exp %187 : vector<2x8x8xf32>
    %cst_78 = arith.constant dense<0.000000e+00> : vector<2x8xf32>
    %189 = vector.multi_reduction <add>, %188, %cst_78 [2] : vector<2x8x8xf32> to vector<2x8xf32>
    %190 = vector.shape_cast %189 : vector<2x8xf32> to vector<2x8x1xf32>
    %191 = vector.broadcast %190 : vector<2x8x1xf32> to vector<2x8x8xf32>
    %192 = arith.divf %188, %191 : vector<2x8x8xf32>
    %193 = vector.extract_strided_slice %180 {offsets = [0, 0, 0], sizes = [2, 8, 2], strides = [1, 1, 1]} : vector<2x8x8xf32> to vector<2x8x2xf32>
    "tpu.trace_start"() <{level = 10 : i32, message = "bqk,bkd->bqd"}> : () -> ()
    %cst_79 = arith.constant dense<0.000000e+00> : vector<2x8x2xf32>
    %194 = tpu.matmul %192, %193, %cst_79 {dimension_numbers = #tpu.dot_dimension_numbers<[2], [1], [1], [2], [0, 0, 0, 1, 1, 2], [0], [0]>} : vector<2x8x8xf32>, vector<2x8x2xf32>, vector<2x8x2xf32> -> vector<2x8x2xf32>
    "tpu.trace_stop"() : () -> ()
    %195 = vector.extract_strided_slice %178 {offsets = [0, 0, 2], sizes = [2, 8, 2], strides = [1, 1, 1]} : vector<2x8x8xf32> to vector<2x8x2xf32>
    %196 = vector.extract_strided_slice %179 {offsets = [0, 0, 2], sizes = [2, 8, 2], strides = [1, 1, 1]} : vector<2x8x8xf32> to vector<2x8x2xf32>
    "tpu.trace_start"() <{level = 10 : i32, message = "bqd,bkd->bqk"}> : () -> ()
    %cst_80 = arith.constant dense<0.000000e+00> : vector<2x8x8xf32>
    %197 = tpu.matmul %195, %196, %cst_80 {dimension_numbers = #tpu.dot_dimension_numbers<[2], [2], [1], [1], [0, 0, 0, 1, 1, 1], [0], [0]>} : vector<2x8x2xf32>, vector<2x8x2xf32>, vector<2x8x8xf32> -> vector<2x8x8xf32>
    "tpu.trace_stop"() : () -> ()
    %cst_81 = arith.constant dense<0xFF800000> : vector<2x8xf32>
    %198 = vector.multi_reduction <maximumf>, %197, %cst_81 [2] : vector<2x8x8xf32> to vector<2x8xf32>
    %199 = vector.shape_cast %198 : vector<2x8xf32> to vector<2x8x1xf32>
    %200 = vector.broadcast %199 : vector<2x8x1xf32> to vector<2x8x8xf32>
    %201 = arith.subf %197, %200 : vector<2x8x8xf32>
    %202 = math.exp %201 : vector<2x8x8xf32>
    %cst_82 = arith.constant dense<0.000000e+00> : vector<2x8xf32>
    %203 = vector.multi_reduction <add>, %202, %cst_82 [2] : vector<2x8x8xf32> to vector<2x8xf32>
    %204 = vector.shape_cast %203 : vector<2x8xf32> to vector<2x8x1xf32>
    %205 = vector.broadcast %204 : vector<2x8x1xf32> to vector<2x8x8xf32>
    %206 = arith.divf %202, %205 : vector<2x8x8xf32>
    %207 = vector.extract_strided_slice %180 {offsets = [0, 0, 2], sizes = [2, 8, 2], strides = [1, 1, 1]} : vector<2x8x8xf32> to vector<2x8x2xf32>
    "tpu.trace_start"() <{level = 10 : i32, message = "bqk,bkd->bqd"}> : () -> ()
    %cst_83 = arith.constant dense<0.000000e+00> : vector<2x8x2xf32>
    %208 = tpu.matmul %206, %207, %cst_83 {dimension_numbers = #tpu.dot_dimension_numbers<[2], [1], [1], [2], [0, 0, 0, 1, 1, 2], [0], [0]>} : vector<2x8x8xf32>, vector<2x8x2xf32>, vector<2x8x2xf32> -> vector<2x8x2xf32>
    "tpu.trace_stop"() : () -> ()
    %209 = vector.extract_strided_slice %178 {offsets = [0, 0, 4], sizes = [2, 8, 2], strides = [1, 1, 1]} : vector<2x8x8xf32> to vector<2x8x2xf32>
    %210 = vector.extract_strided_slice %179 {offsets = [0, 0, 4], sizes = [2, 8, 2], strides = [1, 1, 1]} : vector<2x8x8xf32> to vector<2x8x2xf32>
    "tpu.trace_start"() <{level = 10 : i32, message = "bqd,bkd->bqk"}> : () -> ()
    %cst_84 = arith.constant dense<0.000000e+00> : vector<2x8x8xf32>
    %211 = tpu.matmul %209, %210, %cst_84 {dimension_numbers = #tpu.dot_dimension_numbers<[2], [2], [1], [1], [0, 0, 0, 1, 1, 1], [0], [0]>} : vector<2x8x2xf32>, vector<2x8x2xf32>, vector<2x8x8xf32> -> vector<2x8x8xf32>
    "tpu.trace_stop"() : () -> ()
    %cst_85 = arith.constant dense<0xFF800000> : vector<2x8xf32>
    %212 = vector.multi_reduction <maximumf>, %211, %cst_85 [2] : vector<2x8x8xf32> to vector<2x8xf32>
    %213 = vector.shape_cast %212 : vector<2x8xf32> to vector<2x8x1xf32>
    %214 = vector.broadcast %213 : vector<2x8x1xf32> to vector<2x8x8xf32>
    %215 = arith.subf %211, %214 : vector<2x8x8xf32>
    %216 = math.exp %215 : vector<2x8x8xf32>
    %cst_86 = arith.constant dense<0.000000e+00> : vector<2x8xf32>
    %217 = vector.multi_reduction <add>, %216, %cst_86 [2] : vector<2x8x8xf32> to vector<2x8xf32>
    %218 = vector.shape_cast %217 : vector<2x8xf32> to vector<2x8x1xf32>
    %219 = vector.broadcast %218 : vector<2x8x1xf32> to vector<2x8x8xf32>
    %220 = arith.divf %216, %219 : vector<2x8x8xf32>
    %221 = vector.extract_strided_slice %180 {offsets = [0, 0, 4], sizes = [2, 8, 2], strides = [1, 1, 1]} : vector<2x8x8xf32> to vector<2x8x2xf32>
    "tpu.trace_start"() <{level = 10 : i32, message = "bqk,bkd->bqd"}> : () -> ()
    %cst_87 = arith.constant dense<0.000000e+00> : vector<2x8x2xf32>
    %222 = tpu.matmul %220, %221, %cst_87 {dimension_numbers = #tpu.dot_dimension_numbers<[2], [1], [1], [2], [0, 0, 0, 1, 1, 2], [0], [0]>} : vector<2x8x8xf32>, vector<2x8x2xf32>, vector<2x8x2xf32> -> vector<2x8x2xf32>
    "tpu.trace_stop"() : () -> ()
    %223 = vector.extract_strided_slice %178 {offsets = [0, 0, 6], sizes = [2, 8, 2], strides = [1, 1, 1]} : vector<2x8x8xf32> to vector<2x8x2xf32>
    %224 = vector.extract_strided_slice %179 {offsets = [0, 0, 6], sizes = [2, 8, 2], strides = [1, 1, 1]} : vector<2x8x8xf32> to vector<2x8x2xf32>
    "tpu.trace_start"() <{level = 10 : i32, message = "bqd,bkd->bqk"}> : () -> ()
    %cst_88 = arith.constant dense<0.000000e+00> : vector<2x8x8xf32>
    %225 = tpu.matmul %223, %224, %cst_88 {dimension_numbers = #tpu.dot_dimension_numbers<[2], [2], [1], [1], [0, 0, 0, 1, 1, 1], [0], [0]>} : vector<2x8x2xf32>, vector<2x8x2xf32>, vector<2x8x8xf32> -> vector<2x8x8xf32>
    "tpu.trace_stop"() : () -> ()
    %cst_89 = arith.constant dense<0xFF800000> : vector<2x8xf32>
    %226 = vector.multi_reduction <maximumf>, %225, %cst_89 [2] : vector<2x8x8xf32> to vector<2x8xf32>
    %227 = vector.shape_cast %226 : vector<2x8xf32> to vector<2x8x1xf32>
    %228 = vector.broadcast %227 : vector<2x8x1xf32> to vector<2x8x8xf32>
    %229 = arith.subf %225, %228 : vector<2x8x8xf32>
    %230 = math.exp %229 : vector<2x8x8xf32>
    %cst_90 = arith.constant dense<0.000000e+00> : vector<2x8xf32>
    %231 = vector.multi_reduction <add>, %230, %cst_90 [2] : vector<2x8x8xf32> to vector<2x8xf32>
    %232 = vector.shape_cast %231 : vector<2x8xf32> to vector<2x8x1xf32>
    %233 = vector.broadcast %232 : vector<2x8x1xf32> to vector<2x8x8xf32>
    %234 = arith.divf %230, %233 : vector<2x8x8xf32>
    %235 = vector.extract_strided_slice %180 {offsets = [0, 0, 6], sizes = [2, 8, 2], strides = [1, 1, 1]} : vector<2x8x8xf32> to vector<2x8x2xf32>
    "tpu.trace_start"() <{level = 10 : i32, message = "bqk,bkd->bqd"}> : () -> ()
    %cst_91 = arith.constant dense<0.000000e+00> : vector<2x8x2xf32>
    %236 = tpu.matmul %234, %235, %cst_91 {dimension_numbers = #tpu.dot_dimension_numbers<[2], [1], [1], [2], [0, 0, 0, 1, 1, 2], [0], [0]>} : vector<2x8x8xf32>, vector<2x8x2xf32>, vector<2x8x2xf32> -> vector<2x8x2xf32>
    "tpu.trace_stop"() : () -> ()
    %237 = tpu.concatenate %194, %208, %222, %236 in 2 : vector<2x8x2xf32>, vector<2x8x2xf32>, vector<2x8x2xf32>, vector<2x8x2xf32> -> vector<2x8x8xf32>
    %238 = vector.shape_cast %237 : vector<2x8x8xf32> to vector<16x8xf32>
    %cst_92 = arith.constant dense<0.000000e+00> : vector<16x8xf32>
    %239 = tpu.matmul %238, %168, %cst_92 {dimension_numbers = #tpu.dot_dimension_numbers<[1], [0], [0], [1], [0, 0, 1, 1], [], []>} : vector<16x8xf32>, vector<8x8xf32>, vector<16x8xf32> -> vector<16x8xf32>
    %240 = vector.broadcast %171 : vector<1x8xf32> to vector<16x8xf32>
    %241 = arith.addf %239, %240 : vector<16x8xf32>
    %242 = arith.addf %5, %241 : vector<16x8xf32>
    %c2 = arith.constant 2 : index
    %c0_93 = arith.constant 0 : index
    %243 = vector.load %arg8[%c2, %c0_93] : memref<8x8xf32, #tpu.memory_space<vmem>>, vector<1x8xf32>
    %244 = vector.shape_cast %243 : vector<1x8xf32> to vector<8xf32>
    %245 = vector.shape_cast %244 : vector<8xf32> to vector<1x8xf32>
    %c2_94 = arith.constant 2 : index
    %c0_95 = arith.constant 0 : index
    %246 = vector.load %arg9[%c2_94, %c0_95] : memref<8x8xf32, #tpu.memory_space<vmem>>, vector<1x8xf32>
    %247 = vector.shape_cast %246 : vector<1x8xf32> to vector<8xf32>
    %248 = vector.shape_cast %247 : vector<8xf32> to vector<1x8xf32>
    %cst_96 = arith.constant dense<0.000000e+00> : vector<16xf32>
    %249 = vector.multi_reduction <add>, %242, %cst_96 [1] : vector<16x8xf32> to vector<16xf32>
    %250 = vector.shape_cast %249 : vector<16xf32> to vector<16x1xf32>
    %cst_97 = arith.constant 8.000000e+00 : f32
    %251 = vector.broadcast %cst_97 : f32 to vector<16x1xf32>
    %252 = arith.divf %250, %251 : vector<16x1xf32>
    %253 = vector.broadcast %252 : vector<16x1xf32> to vector<16x8xf32>
    %254 = arith.subf %242, %253 : vector<16x8xf32>
    %255 = arith.mulf %254, %254 : vector<16x8xf32>
    %cst_98 = arith.constant dense<0.000000e+00> : vector<16xf32>
    %256 = vector.multi_reduction <add>, %255, %cst_98 [1] : vector<16x8xf32> to vector<16xf32>
    %257 = vector.shape_cast %256 : vector<16xf32> to vector<16x1xf32>
    %cst_99 = arith.constant 8.000000e+00 : f32
    %258 = vector.broadcast %cst_99 : f32 to vector<16x1xf32>
    %259 = arith.divf %257, %258 : vector<16x1xf32>
    %260 = vector.broadcast %252 : vector<16x1xf32> to vector<16x8xf32>
    %261 = arith.subf %242, %260 : vector<16x8xf32>
    %cst_100 = arith.constant 9.99999974E-6 : f32
    %262 = vector.broadcast %cst_100 : f32 to vector<16x1xf32>
    %263 = arith.addf %259, %262 : vector<16x1xf32>
    %264 = math.rsqrt %263 : vector<16x1xf32>
    %265 = vector.broadcast %264 : vector<16x1xf32> to vector<16x8xf32>
    %266 = arith.mulf %261, %265 : vector<16x8xf32>
    %267 = vector.broadcast %245 : vector<1x8xf32> to vector<16x8xf32>
    %268 = arith.mulf %266, %267 : vector<16x8xf32>
    %269 = vector.broadcast %248 : vector<1x8xf32> to vector<16x8xf32>
    %270 = arith.addf %268, %269 : vector<16x8xf32>
    %c2_101 = arith.constant 2 : index
    %c0_102 = arith.constant 0 : index
    %c0_103 = arith.constant 0 : index
    %271 = vector.load %arg4[%c2_101, %c0_102, %c0_103] : memref<5x8x24xf32, #tpu.memory_space<vmem>>, vector<1x8x24xf32>
    %272 = vector.shape_cast %271 : vector<1x8x24xf32> to vector<8x24xf32>
    %c2_104 = arith.constant 2 : index
    %c0_105 = arith.constant 0 : index
    %273 = vector.load %arg5[%c2_104, %c0_105] : memref<5x24xf32, #tpu.memory_space<vmem>>, vector<1x24xf32>
    %274 = vector.shape_cast %273 : vector<1x24xf32> to vector<24xf32>
    %275 = vector.shape_cast %274 : vector<24xf32> to vector<1x24xf32>
    %c2_106 = arith.constant 2 : index
    %c0_107 = arith.constant 0 : index
    %c0_108 = arith.constant 0 : index
    %276 = vector.load %arg6[%c2_106, %c0_107, %c0_108] : memref<5x8x8xf32, #tpu.memory_space<vmem>>, vector<1x8x8xf32>
    %277 = vector.shape_cast %276 : vector<1x8x8xf32> to vector<8x8xf32>
    %c2_109 = arith.constant 2 : index
    %c0_110 = arith.constant 0 : index
    %278 = vector.load %arg7[%c2_109, %c0_110] : memref<5x8xf32, #tpu.memory_space<vmem>>, vector<1x8xf32>
    %279 = vector.shape_cast %278 : vector<1x8xf32> to vector<8xf32>
    %280 = vector.shape_cast %279 : vector<8xf32> to vector<1x8xf32>
    %281 = vector.extract_strided_slice %272 {offsets = [0, 0], sizes = [8, 8], strides = [1, 1]} : vector<8x24xf32> to vector<8x8xf32>
    %cst_111 = arith.constant dense<0.000000e+00> : vector<16x8xf32>
    %282 = tpu.matmul %270, %281, %cst_111 {dimension_numbers = #tpu.dot_dimension_numbers<[1], [0], [0], [1], [0, 0, 1, 1], [], []>} : vector<16x8xf32>, vector<8x8xf32>, vector<16x8xf32> -> vector<16x8xf32>
    %283 = vector.extract_strided_slice %275 {offsets = [0, 0], sizes = [1, 8], strides = [1, 1]} : vector<1x24xf32> to vector<1x8xf32>
    %284 = vector.broadcast %283 : vector<1x8xf32> to vector<16x8xf32>
    %285 = arith.addf %282, %284 : vector<16x8xf32>
    %286 = vector.extract_strided_slice %272 {offsets = [0, 8], sizes = [8, 16], strides = [1, 1]} : vector<8x24xf32> to vector<8x16xf32>
    %cst_112 = arith.constant dense<0.000000e+00> : vector<16x16xf32>
    %287 = tpu.matmul %161, %286, %cst_112 {dimension_numbers = #tpu.dot_dimension_numbers<[1], [0], [0], [1], [0, 0, 1, 1], [], []>} : vector<16x8xf32>, vector<8x16xf32>, vector<16x16xf32> -> vector<16x16xf32>
    %288 = vector.extract_strided_slice %275 {offsets = [0, 8], sizes = [1, 16], strides = [1, 1]} : vector<1x24xf32> to vector<1x16xf32>
    %289 = vector.broadcast %288 : vector<1x16xf32> to vector<16x16xf32>
    %290 = arith.addf %287, %289 : vector<16x16xf32>
    %291 = vector.extract_strided_slice %290 {offsets = [0, 0], sizes = [16, 8], strides = [1, 1]} : vector<16x16xf32> to vector<16x8xf32>
    %292 = vector.extract_strided_slice %290 {offsets = [0, 8], sizes = [16, 8], strides = [1, 1]} : vector<16x16xf32> to vector<16x8xf32>
    %293 = vector.shape_cast %285 : vector<16x8xf32> to vector<2x8x8xf32>
    %294 = vector.shape_cast %291 : vector<16x8xf32> to vector<2x8x8xf32>
    %295 = vector.shape_cast %292 : vector<16x8xf32> to vector<2x8x8xf32>
    %296 = vector.extract_strided_slice %293 {offsets = [0, 0, 0], sizes = [2, 8, 2], strides = [1, 1, 1]} : vector<2x8x8xf32> to vector<2x8x2xf32>
    %297 = vector.extract_strided_slice %294 {offsets = [0, 0, 0], sizes = [2, 8, 2], strides = [1, 1, 1]} : vector<2x8x8xf32> to vector<2x8x2xf32>
    "tpu.trace_start"() <{level = 10 : i32, message = "bqd,bkd->bqk"}> : () -> ()
    %cst_113 = arith.constant dense<0.000000e+00> : vector<2x8x8xf32>
    %298 = tpu.matmul %296, %297, %cst_113 {dimension_numbers = #tpu.dot_dimension_numbers<[2], [2], [1], [1], [0, 0, 0, 1, 1, 1], [0], [0]>} : vector<2x8x2xf32>, vector<2x8x2xf32>, vector<2x8x8xf32> -> vector<2x8x8xf32>
    "tpu.trace_stop"() : () -> ()
    %cst_114 = arith.constant dense<0xFF800000> : vector<2x8xf32>
    %299 = vector.multi_reduction <maximumf>, %298, %cst_114 [2] : vector<2x8x8xf32> to vector<2x8xf32>
    %300 = vector.shape_cast %299 : vector<2x8xf32> to vector<2x8x1xf32>
    %301 = vector.broadcast %300 : vector<2x8x1xf32> to vector<2x8x8xf32>
    %302 = arith.subf %298, %301 : vector<2x8x8xf32>
    %303 = math.exp %302 : vector<2x8x8xf32>
    %cst_115 = arith.constant dense<0.000000e+00> : vector<2x8xf32>
    %304 = vector.multi_reduction <add>, %303, %cst_115 [2] : vector<2x8x8xf32> to vector<2x8xf32>
    %305 = vector.shape_cast %304 : vector<2x8xf32> to vector<2x8x1xf32>
    %306 = vector.broadcast %305 : vector<2x8x1xf32> to vector<2x8x8xf32>
    %307 = arith.divf %303, %306 : vector<2x8x8xf32>
    %308 = vector.extract_strided_slice %295 {offsets = [0, 0, 0], sizes = [2, 8, 2], strides = [1, 1, 1]} : vector<2x8x8xf32> to vector<2x8x2xf32>
    "tpu.trace_start"() <{level = 10 : i32, message = "bqk,bkd->bqd"}> : () -> ()
    %cst_116 = arith.constant dense<0.000000e+00> : vector<2x8x2xf32>
    %309 = tpu.matmul %307, %308, %cst_116 {dimension_numbers = #tpu.dot_dimension_numbers<[2], [1], [1], [2], [0, 0, 0, 1, 1, 2], [0], [0]>} : vector<2x8x8xf32>, vector<2x8x2xf32>, vector<2x8x2xf32> -> vector<2x8x2xf32>
    "tpu.trace_stop"() : () -> ()
    %310 = vector.extract_strided_slice %293 {offsets = [0, 0, 2], sizes = [2, 8, 2], strides = [1, 1, 1]} : vector<2x8x8xf32> to vector<2x8x2xf32>
    %311 = vector.extract_strided_slice %294 {offsets = [0, 0, 2], sizes = [2, 8, 2], strides = [1, 1, 1]} : vector<2x8x8xf32> to vector<2x8x2xf32>
    "tpu.trace_start"() <{level = 10 : i32, message = "bqd,bkd->bqk"}> : () -> ()
    %cst_117 = arith.constant dense<0.000000e+00> : vector<2x8x8xf32>
    %312 = tpu.matmul %310, %311, %cst_117 {dimension_numbers = #tpu.dot_dimension_numbers<[2], [2], [1], [1], [0, 0, 0, 1, 1, 1], [0], [0]>} : vector<2x8x2xf32>, vector<2x8x2xf32>, vector<2x8x8xf32> -> vector<2x8x8xf32>
    "tpu.trace_stop"() : () -> ()
    %cst_118 = arith.constant dense<0xFF800000> : vector<2x8xf32>
    %313 = vector.multi_reduction <maximumf>, %312, %cst_118 [2] : vector<2x8x8xf32> to vector<2x8xf32>
    %314 = vector.shape_cast %313 : vector<2x8xf32> to vector<2x8x1xf32>
    %315 = vector.broadcast %314 : vector<2x8x1xf32> to vector<2x8x8xf32>
    %316 = arith.subf %312, %315 : vector<2x8x8xf32>
    %317 = math.exp %316 : vector<2x8x8xf32>
    %cst_119 = arith.constant dense<0.000000e+00> : vector<2x8xf32>
    %318 = vector.multi_reduction <add>, %317, %cst_119 [2] : vector<2x8x8xf32> to vector<2x8xf32>
    %319 = vector.shape_cast %318 : vector<2x8xf32> to vector<2x8x1xf32>
    %320 = vector.broadcast %319 : vector<2x8x1xf32> to vector<2x8x8xf32>
    %321 = arith.divf %317, %320 : vector<2x8x8xf32>
    %322 = vector.extract_strided_slice %295 {offsets = [0, 0, 2], sizes = [2, 8, 2], strides = [1, 1, 1]} : vector<2x8x8xf32> to vector<2x8x2xf32>
    "tpu.trace_start"() <{level = 10 : i32, message = "bqk,bkd->bqd"}> : () -> ()
    %cst_120 = arith.constant dense<0.000000e+00> : vector<2x8x2xf32>
    %323 = tpu.matmul %321, %322, %cst_120 {dimension_numbers = #tpu.dot_dimension_numbers<[2], [1], [1], [2], [0, 0, 0, 1, 1, 2], [0], [0]>} : vector<2x8x8xf32>, vector<2x8x2xf32>, vector<2x8x2xf32> -> vector<2x8x2xf32>
    "tpu.trace_stop"() : () -> ()
    %324 = vector.extract_strided_slice %293 {offsets = [0, 0, 4], sizes = [2, 8, 2], strides = [1, 1, 1]} : vector<2x8x8xf32> to vector<2x8x2xf32>
    %325 = vector.extract_strided_slice %294 {offsets = [0, 0, 4], sizes = [2, 8, 2], strides = [1, 1, 1]} : vector<2x8x8xf32> to vector<2x8x2xf32>
    "tpu.trace_start"() <{level = 10 : i32, message = "bqd,bkd->bqk"}> : () -> ()
    %cst_121 = arith.constant dense<0.000000e+00> : vector<2x8x8xf32>
    %326 = tpu.matmul %324, %325, %cst_121 {dimension_numbers = #tpu.dot_dimension_numbers<[2], [2], [1], [1], [0, 0, 0, 1, 1, 1], [0], [0]>} : vector<2x8x2xf32>, vector<2x8x2xf32>, vector<2x8x8xf32> -> vector<2x8x8xf32>
    "tpu.trace_stop"() : () -> ()
    %cst_122 = arith.constant dense<0xFF800000> : vector<2x8xf32>
    %327 = vector.multi_reduction <maximumf>, %326, %cst_122 [2] : vector<2x8x8xf32> to vector<2x8xf32>
    %328 = vector.shape_cast %327 : vector<2x8xf32> to vector<2x8x1xf32>
    %329 = vector.broadcast %328 : vector<2x8x1xf32> to vector<2x8x8xf32>
    %330 = arith.subf %326, %329 : vector<2x8x8xf32>
    %331 = math.exp %330 : vector<2x8x8xf32>
    %cst_123 = arith.constant dense<0.000000e+00> : vector<2x8xf32>
    %332 = vector.multi_reduction <add>, %331, %cst_123 [2] : vector<2x8x8xf32> to vector<2x8xf32>
    %333 = vector.shape_cast %332 : vector<2x8xf32> to vector<2x8x1xf32>
    %334 = vector.broadcast %333 : vector<2x8x1xf32> to vector<2x8x8xf32>
    %335 = arith.divf %331, %334 : vector<2x8x8xf32>
    %336 = vector.extract_strided_slice %295 {offsets = [0, 0, 4], sizes = [2, 8, 2], strides = [1, 1, 1]} : vector<2x8x8xf32> to vector<2x8x2xf32>
    "tpu.trace_start"() <{level = 10 : i32, message = "bqk,bkd->bqd"}> : () -> ()
    %cst_124 = arith.constant dense<0.000000e+00> : vector<2x8x2xf32>
    %337 = tpu.matmul %335, %336, %cst_124 {dimension_numbers = #tpu.dot_dimension_numbers<[2], [1], [1], [2], [0, 0, 0, 1, 1, 2], [0], [0]>} : vector<2x8x8xf32>, vector<2x8x2xf32>, vector<2x8x2xf32> -> vector<2x8x2xf32>
    "tpu.trace_stop"() : () -> ()
    %338 = vector.extract_strided_slice %293 {offsets = [0, 0, 6], sizes = [2, 8, 2], strides = [1, 1, 1]} : vector<2x8x8xf32> to vector<2x8x2xf32>
    %339 = vector.extract_strided_slice %294 {offsets = [0, 0, 6], sizes = [2, 8, 2], strides = [1, 1, 1]} : vector<2x8x8xf32> to vector<2x8x2xf32>
    "tpu.trace_start"() <{level = 10 : i32, message = "bqd,bkd->bqk"}> : () -> ()
    %cst_125 = arith.constant dense<0.000000e+00> : vector<2x8x8xf32>
    %340 = tpu.matmul %338, %339, %cst_125 {dimension_numbers = #tpu.dot_dimension_numbers<[2], [2], [1], [1], [0, 0, 0, 1, 1, 1], [0], [0]>} : vector<2x8x2xf32>, vector<2x8x2xf32>, vector<2x8x8xf32> -> vector<2x8x8xf32>
    "tpu.trace_stop"() : () -> ()
    %cst_126 = arith.constant dense<0xFF800000> : vector<2x8xf32>
    %341 = vector.multi_reduction <maximumf>, %340, %cst_126 [2] : vector<2x8x8xf32> to vector<2x8xf32>
    %342 = vector.shape_cast %341 : vector<2x8xf32> to vector<2x8x1xf32>
    %343 = vector.broadcast %342 : vector<2x8x1xf32> to vector<2x8x8xf32>
    %344 = arith.subf %340, %343 : vector<2x8x8xf32>
    %345 = math.exp %344 : vector<2x8x8xf32>
    %cst_127 = arith.constant dense<0.000000e+00> : vector<2x8xf32>
    %346 = vector.multi_reduction <add>, %345, %cst_127 [2] : vector<2x8x8xf32> to vector<2x8xf32>
    %347 = vector.shape_cast %346 : vector<2x8xf32> to vector<2x8x1xf32>
    %348 = vector.broadcast %347 : vector<2x8x1xf32> to vector<2x8x8xf32>
    %349 = arith.divf %345, %348 : vector<2x8x8xf32>
    %350 = vector.extract_strided_slice %295 {offsets = [0, 0, 6], sizes = [2, 8, 2], strides = [1, 1, 1]} : vector<2x8x8xf32> to vector<2x8x2xf32>
    "tpu.trace_start"() <{level = 10 : i32, message = "bqk,bkd->bqd"}> : () -> ()
    %cst_128 = arith.constant dense<0.000000e+00> : vector<2x8x2xf32>
    %351 = tpu.matmul %349, %350, %cst_128 {dimension_numbers = #tpu.dot_dimension_numbers<[2], [1], [1], [2], [0, 0, 0, 1, 1, 2], [0], [0]>} : vector<2x8x8xf32>, vector<2x8x2xf32>, vector<2x8x2xf32> -> vector<2x8x2xf32>
    "tpu.trace_stop"() : () -> ()
    %352 = tpu.concatenate %309, %323, %337, %351 in 2 : vector<2x8x2xf32>, vector<2x8x2xf32>, vector<2x8x2xf32>, vector<2x8x2xf32> -> vector<2x8x8xf32>
    %353 = vector.shape_cast %352 : vector<2x8x8xf32> to vector<16x8xf32>
    %cst_129 = arith.constant dense<0.000000e+00> : vector<16x8xf32>
    %354 = tpu.matmul %353, %277, %cst_129 {dimension_numbers = #tpu.dot_dimension_numbers<[1], [0], [0], [1], [0, 0, 1, 1], [], []>} : vector<16x8xf32>, vector<8x8xf32>, vector<16x8xf32> -> vector<16x8xf32>
    %355 = vector.broadcast %280 : vector<1x8xf32> to vector<16x8xf32>
    %356 = arith.addf %354, %355 : vector<16x8xf32>
    %357 = arith.addf %270, %356 : vector<16x8xf32>
    %c3 = arith.constant 3 : index
    %c0_130 = arith.constant 0 : index
    %358 = vector.load %arg8[%c3, %c0_130] : memref<8x8xf32, #tpu.memory_space<vmem>>, vector<1x8xf32>
    %359 = vector.shape_cast %358 : vector<1x8xf32> to vector<8xf32>
    %360 = vector.shape_cast %359 : vector<8xf32> to vector<1x8xf32>
    %c3_131 = arith.constant 3 : index
    %c0_132 = arith.constant 0 : index
    %361 = vector.load %arg9[%c3_131, %c0_132] : memref<8x8xf32, #tpu.memory_space<vmem>>, vector<1x8xf32>
    %362 = vector.shape_cast %361 : vector<1x8xf32> to vector<8xf32>
    %363 = vector.shape_cast %362 : vector<8xf32> to vector<1x8xf32>
    %cst_133 = arith.constant dense<0.000000e+00> : vector<16xf32>
    %364 = vector.multi_reduction <add>, %357, %cst_133 [1] : vector<16x8xf32> to vector<16xf32>
    %365 = vector.shape_cast %364 : vector<16xf32> to vector<16x1xf32>
    %cst_134 = arith.constant 8.000000e+00 : f32
    %366 = vector.broadcast %cst_134 : f32 to vector<16x1xf32>
    %367 = arith.divf %365, %366 : vector<16x1xf32>
    %368 = vector.broadcast %367 : vector<16x1xf32> to vector<16x8xf32>
    %369 = arith.subf %357, %368 : vector<16x8xf32>
    %370 = arith.mulf %369, %369 : vector<16x8xf32>
    %cst_135 = arith.constant dense<0.000000e+00> : vector<16xf32>
    %371 = vector.multi_reduction <add>, %370, %cst_135 [1] : vector<16x8xf32> to vector<16xf32>
    %372 = vector.shape_cast %371 : vector<16xf32> to vector<16x1xf32>
    %cst_136 = arith.constant 8.000000e+00 : f32
    %373 = vector.broadcast %cst_136 : f32 to vector<16x1xf32>
    %374 = arith.divf %372, %373 : vector<16x1xf32>
    %375 = vector.broadcast %367 : vector<16x1xf32> to vector<16x8xf32>
    %376 = arith.subf %357, %375 : vector<16x8xf32>
    %cst_137 = arith.constant 9.99999974E-6 : f32
    %377 = vector.broadcast %cst_137 : f32 to vector<16x1xf32>
    %378 = arith.addf %374, %377 : vector<16x1xf32>
    %379 = math.rsqrt %378 : vector<16x1xf32>
    %380 = vector.broadcast %379 : vector<16x1xf32> to vector<16x8xf32>
    %381 = arith.mulf %376, %380 : vector<16x8xf32>
    %382 = vector.broadcast %360 : vector<1x8xf32> to vector<16x8xf32>
    %383 = arith.mulf %381, %382 : vector<16x8xf32>
    %384 = vector.broadcast %363 : vector<1x8xf32> to vector<16x8xf32>
    %385 = arith.addf %383, %384 : vector<16x8xf32>
    %c1_138 = arith.constant 1 : index
    %c0_139 = arith.constant 0 : index
    %c0_140 = arith.constant 0 : index
    %386 = vector.load %arg10[%c1_138, %c0_139, %c0_140] : memref<3x8x16xf32, #tpu.memory_space<vmem>>, vector<1x8x16xf32>
    %387 = vector.shape_cast %386 : vector<1x8x16xf32> to vector<8x16xf32>
    %cst_141 = arith.constant dense<0.000000e+00> : vector<16x16xf32>
    %388 = tpu.matmul %385, %387, %cst_141 {dimension_numbers = #tpu.dot_dimension_numbers<[1], [0], [0], [1], [0, 0, 1, 1], [], []>} : vector<16x8xf32>, vector<8x16xf32>, vector<16x16xf32> -> vector<16x16xf32>
    %c1_142 = arith.constant 1 : index
    %c0_143 = arith.constant 0 : index
    %389 = vector.load %arg11[%c1_142, %c0_143] : memref<3x16xf32, #tpu.memory_space<vmem>>, vector<1x16xf32>
    %390 = vector.shape_cast %389 : vector<1x16xf32> to vector<16xf32>
    %391 = vector.shape_cast %390 : vector<16xf32> to vector<1x16xf32>
    %392 = vector.broadcast %391 : vector<1x16xf32> to vector<16x16xf32>
    %393 = arith.addf %388, %392 : vector<16x16xf32>
    %cst_144 = arith.constant 0.000000e+00 : f32
    %394 = vector.broadcast %cst_144 : f32 to vector<16x16xf32>
    %395 = arith.maximumf %393, %394 : vector<16x16xf32>
    %c1_145 = arith.constant 1 : index
    %c0_146 = arith.constant 0 : index
    %c0_147 = arith.constant 0 : index
    %396 = vector.load %arg12[%c1_145, %c0_146, %c0_147] : memref<3x16x8xf32, #tpu.memory_space<vmem>>, vector<1x16x8xf32>
    %397 = vector.shape_cast %396 : vector<1x16x8xf32> to vector<16x8xf32>
    %cst_148 = arith.constant dense<0.000000e+00> : vector<16x8xf32>
    %398 = tpu.matmul %395, %397, %cst_148 {dimension_numbers = #tpu.dot_dimension_numbers<[1], [0], [0], [1], [0, 0, 1, 1], [], []>} : vector<16x16xf32>, vector<16x8xf32>, vector<16x8xf32> -> vector<16x8xf32>
    %c1_149 = arith.constant 1 : index
    %c0_150 = arith.constant 0 : index
    %399 = vector.load %arg13[%c1_149, %c0_150] : memref<3x8xf32, #tpu.memory_space<vmem>>, vector<1x8xf32>
    %400 = vector.shape_cast %399 : vector<1x8xf32> to vector<8xf32>
    %401 = vector.shape_cast %400 : vector<8xf32> to vector<1x8xf32>
    %402 = vector.broadcast %401 : vector<1x8xf32> to vector<16x8xf32>
    %403 = arith.addf %398, %402 : vector<16x8xf32>
    %404 = arith.addf %385, %403 : vector<16x8xf32>
    %c4 = arith.constant 4 : index
    %c0_151 = arith.constant 0 : index
    %405 = vector.load %arg8[%c4, %c0_151] : memref<8x8xf32, #tpu.memory_space<vmem>>, vector<1x8xf32>
    %406 = vector.shape_cast %405 : vector<1x8xf32> to vector<8xf32>
    %407 = vector.shape_cast %406 : vector<8xf32> to vector<1x8xf32>
    %c4_152 = arith.constant 4 : index
    %c0_153 = arith.constant 0 : index
    %408 = vector.load %arg9[%c4_152, %c0_153] : memref<8x8xf32, #tpu.memory_space<vmem>>, vector<1x8xf32>
    %409 = vector.shape_cast %408 : vector<1x8xf32> to vector<8xf32>
    %410 = vector.shape_cast %409 : vector<8xf32> to vector<1x8xf32>
    %cst_154 = arith.constant dense<0.000000e+00> : vector<16xf32>
    %411 = vector.multi_reduction <add>, %404, %cst_154 [1] : vector<16x8xf32> to vector<16xf32>
    %412 = vector.shape_cast %411 : vector<16xf32> to vector<16x1xf32>
    %cst_155 = arith.constant 8.000000e+00 : f32
    %413 = vector.broadcast %cst_155 : f32 to vector<16x1xf32>
    %414 = arith.divf %412, %413 : vector<16x1xf32>
    %415 = vector.broadcast %414 : vector<16x1xf32> to vector<16x8xf32>
    %416 = arith.subf %404, %415 : vector<16x8xf32>
    %417 = arith.mulf %416, %416 : vector<16x8xf32>
    %cst_156 = arith.constant dense<0.000000e+00> : vector<16xf32>
    %418 = vector.multi_reduction <add>, %417, %cst_156 [1] : vector<16x8xf32> to vector<16xf32>
    %419 = vector.shape_cast %418 : vector<16xf32> to vector<16x1xf32>
    %cst_157 = arith.constant 8.000000e+00 : f32
    %420 = vector.broadcast %cst_157 : f32 to vector<16x1xf32>
    %421 = arith.divf %419, %420 : vector<16x1xf32>
    %422 = vector.broadcast %414 : vector<16x1xf32> to vector<16x8xf32>
    %423 = arith.subf %404, %422 : vector<16x8xf32>
    %cst_158 = arith.constant 9.99999974E-6 : f32
    %424 = vector.broadcast %cst_158 : f32 to vector<16x1xf32>
    %425 = arith.addf %421, %424 : vector<16x1xf32>
    %426 = math.rsqrt %425 : vector<16x1xf32>
    %427 = vector.broadcast %426 : vector<16x1xf32> to vector<16x8xf32>
    %428 = arith.mulf %423, %427 : vector<16x8xf32>
    %429 = vector.broadcast %407 : vector<1x8xf32> to vector<16x8xf32>
    %430 = arith.mulf %428, %429 : vector<16x8xf32>
    %431 = vector.broadcast %410 : vector<1x8xf32> to vector<16x8xf32>
    %432 = arith.addf %430, %431 : vector<16x8xf32>
    %c0_159 = arith.constant 0 : index
    %c0_160 = arith.constant 0 : index
    %433 = vector.load %arg14[%c0_159, %c0_160] : memref<8x4xf32, #tpu.memory_space<vmem>>, vector<8x4xf32>
    %cst_161 = arith.constant dense<0.000000e+00> : vector<16x4xf32>
    %434 = tpu.matmul %432, %433, %cst_161 {dimension_numbers = #tpu.dot_dimension_numbers<[1], [0], [0], [1], [0, 0, 1, 1], [], []>} : vector<16x8xf32>, vector<8x4xf32>, vector<16x4xf32> -> vector<16x4xf32>
    %c0_162 = arith.constant 0 : index
    %c0_163 = arith.constant 0 : index
    %435 = vector.load %arg15[%c0_162, %c0_163] : memref<1x4xf32, #tpu.memory_space<vmem>>, vector<1x4xf32>
    %436 = vector.broadcast %435 : vector<1x4xf32> to vector<16x4xf32>
    %437 = arith.addf %434, %436 : vector<16x4xf32>
    %438 = arith.negf %437 : vector<16x4xf32>
    %439 = math.exp %438 : vector<16x4xf32>
    %cst_164 = arith.constant 1.000000e+00 : f32
    %440 = vector.broadcast %cst_164 : f32 to vector<16x4xf32>
    %441 = arith.addf %440, %439 : vector<16x4xf32>
    %442 = arith.divf %440, %441 : vector<16x4xf32>
    %443 = arith.subf %442, %1 : vector<16x4xf32>
    %444 = arith.mulf %443, %443 : vector<16x4xf32>
    %445 = tpu.iota {dimensions = array<i32: 0>} : vector<4x8xi32>
    %446 = tpu.iota {dimensions = array<i32: 1>} : vector<4x8xi32>
    %c4_i32 = arith.constant 4 : i32
    %447 = vector.broadcast %c4_i32 : i32 to vector<4x8xi32>
    %448 = arith.addi %445, %447 : vector<4x8xi32>
    %449 = arith.cmpi eq, %446, %448 : vector<4x8xi32>
    %450 = arith.extui %449 : vector<4x8xi1> to vector<4x8xi32>
    %451 = arith.sitofp %450 : vector<4x8xi32> to vector<4x8xf32>
    %cst_165 = arith.constant dense<0.000000e+00> : vector<16x8xf32>
    %452 = tpu.matmul %444, %451, %cst_165 {dimension_numbers = #tpu.dot_dimension_numbers<[1], [0], [0], [1], [0, 0, 1, 1], [], []>} : vector<16x4xf32>, vector<4x8xf32>, vector<16x8xf32> -> vector<16x8xf32>
    %cst_166 = arith.constant 2.000000e+00 : f32
    %453 = vector.broadcast %cst_166 : f32 to vector<16x8xf32>
    %454 = arith.mulf %453, %452 : vector<16x8xf32>
    %455 = arith.addf %3, %454 : vector<16x8xf32>
    %c0_167 = arith.constant 0 : index
    %c0_168 = arith.constant 0 : index
    %c0_169 = arith.constant 0 : index
    %456 = vector.load %arg4[%c0_167, %c0_168, %c0_169] : memref<5x8x24xf32, #tpu.memory_space<vmem>>, vector<1x8x24xf32>
    %457 = vector.shape_cast %456 : vector<1x8x24xf32> to vector<8x24xf32>
    %c0_170 = arith.constant 0 : index
    %c0_171 = arith.constant 0 : index
    %458 = vector.load %arg5[%c0_170, %c0_171] : memref<5x24xf32, #tpu.memory_space<vmem>>, vector<1x24xf32>
    %459 = vector.shape_cast %458 : vector<1x24xf32> to vector<24xf32>
    %460 = vector.shape_cast %459 : vector<24xf32> to vector<1x24xf32>
    %c0_172 = arith.constant 0 : index
    %c0_173 = arith.constant 0 : index
    %c0_174 = arith.constant 0 : index
    %461 = vector.load %arg6[%c0_172, %c0_173, %c0_174] : memref<5x8x8xf32, #tpu.memory_space<vmem>>, vector<1x8x8xf32>
    %462 = vector.shape_cast %461 : vector<1x8x8xf32> to vector<8x8xf32>
    %c0_175 = arith.constant 0 : index
    %c0_176 = arith.constant 0 : index
    %463 = vector.load %arg7[%c0_175, %c0_176] : memref<5x8xf32, #tpu.memory_space<vmem>>, vector<1x8xf32>
    %464 = vector.shape_cast %463 : vector<1x8xf32> to vector<8xf32>
    %465 = vector.shape_cast %464 : vector<8xf32> to vector<1x8xf32>
    %cst_177 = arith.constant dense<0.000000e+00> : vector<16x24xf32>
    %466 = tpu.matmul %455, %457, %cst_177 {dimension_numbers = #tpu.dot_dimension_numbers<[1], [0], [0], [1], [0, 0, 1, 1], [], []>} : vector<16x8xf32>, vector<8x24xf32>, vector<16x24xf32> -> vector<16x24xf32>
    %467 = vector.broadcast %460 : vector<1x24xf32> to vector<16x24xf32>
    %468 = arith.addf %466, %467 : vector<16x24xf32>
    %469 = vector.extract_strided_slice %468 {offsets = [0, 0], sizes = [16, 8], strides = [1, 1]} : vector<16x24xf32> to vector<16x8xf32>
    %470 = vector.extract_strided_slice %468 {offsets = [0, 8], sizes = [16, 8], strides = [1, 1]} : vector<16x24xf32> to vector<16x8xf32>
    %471 = vector.extract_strided_slice %468 {offsets = [0, 16], sizes = [16, 8], strides = [1, 1]} : vector<16x24xf32> to vector<16x8xf32>
    %472 = vector.shape_cast %469 : vector<16x8xf32> to vector<2x8x8xf32>
    %473 = vector.shape_cast %470 : vector<16x8xf32> to vector<2x8x8xf32>
    %474 = vector.shape_cast %471 : vector<16x8xf32> to vector<2x8x8xf32>
    %475 = vector.extract_strided_slice %472 {offsets = [0, 0, 0], sizes = [2, 8, 2], strides = [1, 1, 1]} : vector<2x8x8xf32> to vector<2x8x2xf32>
    %476 = vector.extract_strided_slice %473 {offsets = [0, 0, 0], sizes = [2, 8, 2], strides = [1, 1, 1]} : vector<2x8x8xf32> to vector<2x8x2xf32>
    "tpu.trace_start"() <{level = 10 : i32, message = "bqd,bkd->bqk"}> : () -> ()
    %cst_178 = arith.constant dense<0.000000e+00> : vector<2x8x8xf32>
    %477 = tpu.matmul %475, %476, %cst_178 {dimension_numbers = #tpu.dot_dimension_numbers<[2], [2], [1], [1], [0, 0, 0, 1, 1, 1], [0], [0]>} : vector<2x8x2xf32>, vector<2x8x2xf32>, vector<2x8x8xf32> -> vector<2x8x8xf32>
    "tpu.trace_stop"() : () -> ()
    %cst_179 = arith.constant dense<0xFF800000> : vector<2x8xf32>
    %478 = vector.multi_reduction <maximumf>, %477, %cst_179 [2] : vector<2x8x8xf32> to vector<2x8xf32>
    %479 = vector.shape_cast %478 : vector<2x8xf32> to vector<2x8x1xf32>
    %480 = vector.broadcast %479 : vector<2x8x1xf32> to vector<2x8x8xf32>
    %481 = arith.subf %477, %480 : vector<2x8x8xf32>
    %482 = math.exp %481 : vector<2x8x8xf32>
    %cst_180 = arith.constant dense<0.000000e+00> : vector<2x8xf32>
    %483 = vector.multi_reduction <add>, %482, %cst_180 [2] : vector<2x8x8xf32> to vector<2x8xf32>
    %484 = vector.shape_cast %483 : vector<2x8xf32> to vector<2x8x1xf32>
    %485 = vector.broadcast %484 : vector<2x8x1xf32> to vector<2x8x8xf32>
    %486 = arith.divf %482, %485 : vector<2x8x8xf32>
    %487 = vector.extract_strided_slice %474 {offsets = [0, 0, 0], sizes = [2, 8, 2], strides = [1, 1, 1]} : vector<2x8x8xf32> to vector<2x8x2xf32>
    "tpu.trace_start"() <{level = 10 : i32, message = "bqk,bkd->bqd"}> : () -> ()
    %cst_181 = arith.constant dense<0.000000e+00> : vector<2x8x2xf32>
    %488 = tpu.matmul %486, %487, %cst_181 {dimension_numbers = #tpu.dot_dimension_numbers<[2], [1], [1], [2], [0, 0, 0, 1, 1, 2], [0], [0]>} : vector<2x8x8xf32>, vector<2x8x2xf32>, vector<2x8x2xf32> -> vector<2x8x2xf32>
    "tpu.trace_stop"() : () -> ()
    %489 = vector.extract_strided_slice %472 {offsets = [0, 0, 2], sizes = [2, 8, 2], strides = [1, 1, 1]} : vector<2x8x8xf32> to vector<2x8x2xf32>
    %490 = vector.extract_strided_slice %473 {offsets = [0, 0, 2], sizes = [2, 8, 2], strides = [1, 1, 1]} : vector<2x8x8xf32> to vector<2x8x2xf32>
    "tpu.trace_start"() <{level = 10 : i32, message = "bqd,bkd->bqk"}> : () -> ()
    %cst_182 = arith.constant dense<0.000000e+00> : vector<2x8x8xf32>
    %491 = tpu.matmul %489, %490, %cst_182 {dimension_numbers = #tpu.dot_dimension_numbers<[2], [2], [1], [1], [0, 0, 0, 1, 1, 1], [0], [0]>} : vector<2x8x2xf32>, vector<2x8x2xf32>, vector<2x8x8xf32> -> vector<2x8x8xf32>
    "tpu.trace_stop"() : () -> ()
    %cst_183 = arith.constant dense<0xFF800000> : vector<2x8xf32>
    %492 = vector.multi_reduction <maximumf>, %491, %cst_183 [2] : vector<2x8x8xf32> to vector<2x8xf32>
    %493 = vector.shape_cast %492 : vector<2x8xf32> to vector<2x8x1xf32>
    %494 = vector.broadcast %493 : vector<2x8x1xf32> to vector<2x8x8xf32>
    %495 = arith.subf %491, %494 : vector<2x8x8xf32>
    %496 = math.exp %495 : vector<2x8x8xf32>
    %cst_184 = arith.constant dense<0.000000e+00> : vector<2x8xf32>
    %497 = vector.multi_reduction <add>, %496, %cst_184 [2] : vector<2x8x8xf32> to vector<2x8xf32>
    %498 = vector.shape_cast %497 : vector<2x8xf32> to vector<2x8x1xf32>
    %499 = vector.broadcast %498 : vector<2x8x1xf32> to vector<2x8x8xf32>
    %500 = arith.divf %496, %499 : vector<2x8x8xf32>
    %501 = vector.extract_strided_slice %474 {offsets = [0, 0, 2], sizes = [2, 8, 2], strides = [1, 1, 1]} : vector<2x8x8xf32> to vector<2x8x2xf32>
    "tpu.trace_start"() <{level = 10 : i32, message = "bqk,bkd->bqd"}> : () -> ()
    %cst_185 = arith.constant dense<0.000000e+00> : vector<2x8x2xf32>
    %502 = tpu.matmul %500, %501, %cst_185 {dimension_numbers = #tpu.dot_dimension_numbers<[2], [1], [1], [2], [0, 0, 0, 1, 1, 2], [0], [0]>} : vector<2x8x8xf32>, vector<2x8x2xf32>, vector<2x8x2xf32> -> vector<2x8x2xf32>
    "tpu.trace_stop"() : () -> ()
    %503 = vector.extract_strided_slice %472 {offsets = [0, 0, 4], sizes = [2, 8, 2], strides = [1, 1, 1]} : vector<2x8x8xf32> to vector<2x8x2xf32>
    %504 = vector.extract_strided_slice %473 {offsets = [0, 0, 4], sizes = [2, 8, 2], strides = [1, 1, 1]} : vector<2x8x8xf32> to vector<2x8x2xf32>
    "tpu.trace_start"() <{level = 10 : i32, message = "bqd,bkd->bqk"}> : () -> ()
    %cst_186 = arith.constant dense<0.000000e+00> : vector<2x8x8xf32>
    %505 = tpu.matmul %503, %504, %cst_186 {dimension_numbers = #tpu.dot_dimension_numbers<[2], [2], [1], [1], [0, 0, 0, 1, 1, 1], [0], [0]>} : vector<2x8x2xf32>, vector<2x8x2xf32>, vector<2x8x8xf32> -> vector<2x8x8xf32>
    "tpu.trace_stop"() : () -> ()
    %cst_187 = arith.constant dense<0xFF800000> : vector<2x8xf32>
    %506 = vector.multi_reduction <maximumf>, %505, %cst_187 [2] : vector<2x8x8xf32> to vector<2x8xf32>
    %507 = vector.shape_cast %506 : vector<2x8xf32> to vector<2x8x1xf32>
    %508 = vector.broadcast %507 : vector<2x8x1xf32> to vector<2x8x8xf32>
    %509 = arith.subf %505, %508 : vector<2x8x8xf32>
    %510 = math.exp %509 : vector<2x8x8xf32>
    %cst_188 = arith.constant dense<0.000000e+00> : vector<2x8xf32>
    %511 = vector.multi_reduction <add>, %510, %cst_188 [2] : vector<2x8x8xf32> to vector<2x8xf32>
    %512 = vector.shape_cast %511 : vector<2x8xf32> to vector<2x8x1xf32>
    %513 = vector.broadcast %512 : vector<2x8x1xf32> to vector<2x8x8xf32>
    %514 = arith.divf %510, %513 : vector<2x8x8xf32>
    %515 = vector.extract_strided_slice %474 {offsets = [0, 0, 4], sizes = [2, 8, 2], strides = [1, 1, 1]} : vector<2x8x8xf32> to vector<2x8x2xf32>
    "tpu.trace_start"() <{level = 10 : i32, message = "bqk,bkd->bqd"}> : () -> ()
    %cst_189 = arith.constant dense<0.000000e+00> : vector<2x8x2xf32>
    %516 = tpu.matmul %514, %515, %cst_189 {dimension_numbers = #tpu.dot_dimension_numbers<[2], [1], [1], [2], [0, 0, 0, 1, 1, 2], [0], [0]>} : vector<2x8x8xf32>, vector<2x8x2xf32>, vector<2x8x2xf32> -> vector<2x8x2xf32>
    "tpu.trace_stop"() : () -> ()
    %517 = vector.extract_strided_slice %472 {offsets = [0, 0, 6], sizes = [2, 8, 2], strides = [1, 1, 1]} : vector<2x8x8xf32> to vector<2x8x2xf32>
    %518 = vector.extract_strided_slice %473 {offsets = [0, 0, 6], sizes = [2, 8, 2], strides = [1, 1, 1]} : vector<2x8x8xf32> to vector<2x8x2xf32>
    "tpu.trace_start"() <{level = 10 : i32, message = "bqd,bkd->bqk"}> : () -> ()
    %cst_190 = arith.constant dense<0.000000e+00> : vector<2x8x8xf32>
    %519 = tpu.matmul %517, %518, %cst_190 {dimension_numbers = #tpu.dot_dimension_numbers<[2], [2], [1], [1], [0, 0, 0, 1, 1, 1], [0], [0]>} : vector<2x8x2xf32>, vector<2x8x2xf32>, vector<2x8x8xf32> -> vector<2x8x8xf32>
    "tpu.trace_stop"() : () -> ()
    %cst_191 = arith.constant dense<0xFF800000> : vector<2x8xf32>
    %520 = vector.multi_reduction <maximumf>, %519, %cst_191 [2] : vector<2x8x8xf32> to vector<2x8xf32>
    %521 = vector.shape_cast %520 : vector<2x8xf32> to vector<2x8x1xf32>
    %522 = vector.broadcast %521 : vector<2x8x1xf32> to vector<2x8x8xf32>
    %523 = arith.subf %519, %522 : vector<2x8x8xf32>
    %524 = math.exp %523 : vector<2x8x8xf32>
    %cst_192 = arith.constant dense<0.000000e+00> : vector<2x8xf32>
    %525 = vector.multi_reduction <add>, %524, %cst_192 [2] : vector<2x8x8xf32> to vector<2x8xf32>
    %526 = vector.shape_cast %525 : vector<2x8xf32> to vector<2x8x1xf32>
    %527 = vector.broadcast %526 : vector<2x8x1xf32> to vector<2x8x8xf32>
    %528 = arith.divf %524, %527 : vector<2x8x8xf32>
    %529 = vector.extract_strided_slice %474 {offsets = [0, 0, 6], sizes = [2, 8, 2], strides = [1, 1, 1]} : vector<2x8x8xf32> to vector<2x8x2xf32>
    "tpu.trace_start"() <{level = 10 : i32, message = "bqk,bkd->bqd"}> : () -> ()
    %cst_193 = arith.constant dense<0.000000e+00> : vector<2x8x2xf32>
    %530 = tpu.matmul %528, %529, %cst_193 {dimension_numbers = #tpu.dot_dimension_numbers<[2], [1], [1], [2], [0, 0, 0, 1, 1, 2], [0], [0]>} : vector<2x8x8xf32>, vector<2x8x2xf32>, vector<2x8x2xf32> -> vector<2x8x2xf32>
    "tpu.trace_stop"() : () -> ()
    %531 = tpu.concatenate %488, %502, %516, %530 in 2 : vector<2x8x2xf32>, vector<2x8x2xf32>, vector<2x8x2xf32>, vector<2x8x2xf32> -> vector<2x8x8xf32>
    %532 = vector.shape_cast %531 : vector<2x8x8xf32> to vector<16x8xf32>
    %cst_194 = arith.constant dense<0.000000e+00> : vector<16x8xf32>
    %533 = tpu.matmul %532, %462, %cst_194 {dimension_numbers = #tpu.dot_dimension_numbers<[1], [0], [0], [1], [0, 0, 1, 1], [], []>} : vector<16x8xf32>, vector<8x8xf32>, vector<16x8xf32> -> vector<16x8xf32>
    %534 = vector.broadcast %465 : vector<1x8xf32> to vector<16x8xf32>
    %535 = arith.addf %533, %534 : vector<16x8xf32>
    %536 = arith.addf %455, %535 : vector<16x8xf32>
    %c0_195 = arith.constant 0 : index
    %c0_196 = arith.constant 0 : index
    %537 = vector.load %arg8[%c0_195, %c0_196] : memref<8x8xf32, #tpu.memory_space<vmem>>, vector<1x8xf32>
    %538 = vector.shape_cast %537 : vector<1x8xf32> to vector<8xf32>
    %539 = vector.shape_cast %538 : vector<8xf32> to vector<1x8xf32>
    %c0_197 = arith.constant 0 : index
    %c0_198 = arith.constant 0 : index
    %540 = vector.load %arg9[%c0_197, %c0_198] : memref<8x8xf32, #tpu.memory_space<vmem>>, vector<1x8xf32>
    %541 = vector.shape_cast %540 : vector<1x8xf32> to vector<8xf32>
    %542 = vector.shape_cast %541 : vector<8xf32> to vector<1x8xf32>
    %cst_199 = arith.constant dense<0.000000e+00> : vector<16xf32>
    %543 = vector.multi_reduction <add>, %536, %cst_199 [1] : vector<16x8xf32> to vector<16xf32>
    %544 = vector.shape_cast %543 : vector<16xf32> to vector<16x1xf32>
    %cst_200 = arith.constant 8.000000e+00 : f32
    %545 = vector.broadcast %cst_200 : f32 to vector<16x1xf32>
    %546 = arith.divf %544, %545 : vector<16x1xf32>
    %547 = vector.broadcast %546 : vector<16x1xf32> to vector<16x8xf32>
    %548 = arith.subf %536, %547 : vector<16x8xf32>
    %549 = arith.mulf %548, %548 : vector<16x8xf32>
    %cst_201 = arith.constant dense<0.000000e+00> : vector<16xf32>
    %550 = vector.multi_reduction <add>, %549, %cst_201 [1] : vector<16x8xf32> to vector<16xf32>
    %551 = vector.shape_cast %550 : vector<16xf32> to vector<16x1xf32>
    %cst_202 = arith.constant 8.000000e+00 : f32
    %552 = vector.broadcast %cst_202 : f32 to vector<16x1xf32>
    %553 = arith.divf %551, %552 : vector<16x1xf32>
    %554 = vector.broadcast %546 : vector<16x1xf32> to vector<16x8xf32>
    %555 = arith.subf %536, %554 : vector<16x8xf32>
    %cst_203 = arith.constant 9.99999974E-6 : f32
    %556 = vector.broadcast %cst_203 : f32 to vector<16x1xf32>
    %557 = arith.addf %553, %556 : vector<16x1xf32>
    %558 = math.rsqrt %557 : vector<16x1xf32>
    %559 = vector.broadcast %558 : vector<16x1xf32> to vector<16x8xf32>
    %560 = arith.mulf %555, %559 : vector<16x8xf32>
    %561 = vector.broadcast %539 : vector<1x8xf32> to vector<16x8xf32>
    %562 = arith.mulf %560, %561 : vector<16x8xf32>
    %563 = vector.broadcast %542 : vector<1x8xf32> to vector<16x8xf32>
    %564 = arith.addf %562, %563 : vector<16x8xf32>
    %c0_204 = arith.constant 0 : index
    %c0_205 = arith.constant 0 : index
    %c0_206 = arith.constant 0 : index
    %565 = vector.load %arg10[%c0_204, %c0_205, %c0_206] : memref<3x8x16xf32, #tpu.memory_space<vmem>>, vector<1x8x16xf32>
    %566 = vector.shape_cast %565 : vector<1x8x16xf32> to vector<8x16xf32>
    %cst_207 = arith.constant dense<0.000000e+00> : vector<16x16xf32>
    %567 = tpu.matmul %564, %566, %cst_207 {dimension_numbers = #tpu.dot_dimension_numbers<[1], [0], [0], [1], [0, 0, 1, 1], [], []>} : vector<16x8xf32>, vector<8x16xf32>, vector<16x16xf32> -> vector<16x16xf32>
    %c0_208 = arith.constant 0 : index
    %c0_209 = arith.constant 0 : index
    %568 = vector.load %arg11[%c0_208, %c0_209] : memref<3x16xf32, #tpu.memory_space<vmem>>, vector<1x16xf32>
    %569 = vector.shape_cast %568 : vector<1x16xf32> to vector<16xf32>
    %570 = vector.shape_cast %569 : vector<16xf32> to vector<1x16xf32>
    %571 = vector.broadcast %570 : vector<1x16xf32> to vector<16x16xf32>
    %572 = arith.addf %567, %571 : vector<16x16xf32>
    %cst_210 = arith.constant 0.000000e+00 : f32
    %573 = vector.broadcast %cst_210 : f32 to vector<16x16xf32>
    %574 = arith.maximumf %572, %573 : vector<16x16xf32>
    %c0_211 = arith.constant 0 : index
    %c0_212 = arith.constant 0 : index
    %c0_213 = arith.constant 0 : index
    %575 = vector.load %arg12[%c0_211, %c0_212, %c0_213] : memref<3x16x8xf32, #tpu.memory_space<vmem>>, vector<1x16x8xf32>
    %576 = vector.shape_cast %575 : vector<1x16x8xf32> to vector<16x8xf32>
    %cst_214 = arith.constant dense<0.000000e+00> : vector<16x8xf32>
    %577 = tpu.matmul %574, %576, %cst_214 {dimension_numbers = #tpu.dot_dimension_numbers<[1], [0], [0], [1], [0, 0, 1, 1], [], []>} : vector<16x16xf32>, vector<16x8xf32>, vector<16x8xf32> -> vector<16x8xf32>
    %c0_215 = arith.constant 0 : index
    %c0_216 = arith.constant 0 : index
    %578 = vector.load %arg13[%c0_215, %c0_216] : memref<3x8xf32, #tpu.memory_space<vmem>>, vector<1x8xf32>
    %579 = vector.shape_cast %578 : vector<1x8xf32> to vector<8xf32>
    %580 = vector.shape_cast %579 : vector<8xf32> to vector<1x8xf32>
    %581 = vector.broadcast %580 : vector<1x8xf32> to vector<16x8xf32>
    %582 = arith.addf %577, %581 : vector<16x8xf32>
    %583 = arith.addf %564, %582 : vector<16x8xf32>
    %c1_217 = arith.constant 1 : index
    %c0_218 = arith.constant 0 : index
    %584 = vector.load %arg8[%c1_217, %c0_218] : memref<8x8xf32, #tpu.memory_space<vmem>>, vector<1x8xf32>
    %585 = vector.shape_cast %584 : vector<1x8xf32> to vector<8xf32>
    %586 = vector.shape_cast %585 : vector<8xf32> to vector<1x8xf32>
    %c1_219 = arith.constant 1 : index
    %c0_220 = arith.constant 0 : index
    %587 = vector.load %arg9[%c1_219, %c0_220] : memref<8x8xf32, #tpu.memory_space<vmem>>, vector<1x8xf32>
    %588 = vector.shape_cast %587 : vector<1x8xf32> to vector<8xf32>
    %589 = vector.shape_cast %588 : vector<8xf32> to vector<1x8xf32>
    %cst_221 = arith.constant dense<0.000000e+00> : vector<16xf32>
    %590 = vector.multi_reduction <add>, %583, %cst_221 [1] : vector<16x8xf32> to vector<16xf32>
    %591 = vector.shape_cast %590 : vector<16xf32> to vector<16x1xf32>
    %cst_222 = arith.constant 8.000000e+00 : f32
    %592 = vector.broadcast %cst_222 : f32 to vector<16x1xf32>
    %593 = arith.divf %591, %592 : vector<16x1xf32>
    %594 = vector.broadcast %593 : vector<16x1xf32> to vector<16x8xf32>
    %595 = arith.subf %583, %594 : vector<16x8xf32>
    %596 = arith.mulf %595, %595 : vector<16x8xf32>
    %cst_223 = arith.constant dense<0.000000e+00> : vector<16xf32>
    %597 = vector.multi_reduction <add>, %596, %cst_223 [1] : vector<16x8xf32> to vector<16xf32>
    %598 = vector.shape_cast %597 : vector<16xf32> to vector<16x1xf32>
    %cst_224 = arith.constant 8.000000e+00 : f32
    %599 = vector.broadcast %cst_224 : f32 to vector<16x1xf32>
    %600 = arith.divf %598, %599 : vector<16x1xf32>
    %601 = vector.broadcast %593 : vector<16x1xf32> to vector<16x8xf32>
    %602 = arith.subf %583, %601 : vector<16x8xf32>
    %cst_225 = arith.constant 9.99999974E-6 : f32
    %603 = vector.broadcast %cst_225 : f32 to vector<16x1xf32>
    %604 = arith.addf %600, %603 : vector<16x1xf32>
    %605 = math.rsqrt %604 : vector<16x1xf32>
    %606 = vector.broadcast %605 : vector<16x1xf32> to vector<16x8xf32>
    %607 = arith.mulf %602, %606 : vector<16x8xf32>
    %608 = vector.broadcast %586 : vector<1x8xf32> to vector<16x8xf32>
    %609 = arith.mulf %607, %608 : vector<16x8xf32>
    %610 = vector.broadcast %589 : vector<1x8xf32> to vector<16x8xf32>
    %611 = arith.addf %609, %610 : vector<16x8xf32>
    %c3_226 = arith.constant 3 : index
    %c0_227 = arith.constant 0 : index
    %c0_228 = arith.constant 0 : index
    %612 = vector.load %arg4[%c3_226, %c0_227, %c0_228] : memref<5x8x24xf32, #tpu.memory_space<vmem>>, vector<1x8x24xf32>
    %613 = vector.shape_cast %612 : vector<1x8x24xf32> to vector<8x24xf32>
    %c3_229 = arith.constant 3 : index
    %c0_230 = arith.constant 0 : index
    %614 = vector.load %arg5[%c3_229, %c0_230] : memref<5x24xf32, #tpu.memory_space<vmem>>, vector<1x24xf32>
    %615 = vector.shape_cast %614 : vector<1x24xf32> to vector<24xf32>
    %616 = vector.shape_cast %615 : vector<24xf32> to vector<1x24xf32>
    %c3_231 = arith.constant 3 : index
    %c0_232 = arith.constant 0 : index
    %c0_233 = arith.constant 0 : index
    %617 = vector.load %arg6[%c3_231, %c0_232, %c0_233] : memref<5x8x8xf32, #tpu.memory_space<vmem>>, vector<1x8x8xf32>
    %618 = vector.shape_cast %617 : vector<1x8x8xf32> to vector<8x8xf32>
    %c3_234 = arith.constant 3 : index
    %c0_235 = arith.constant 0 : index
    %619 = vector.load %arg7[%c3_234, %c0_235] : memref<5x8xf32, #tpu.memory_space<vmem>>, vector<1x8xf32>
    %620 = vector.shape_cast %619 : vector<1x8xf32> to vector<8xf32>
    %621 = vector.shape_cast %620 : vector<8xf32> to vector<1x8xf32>
    %cst_236 = arith.constant dense<0.000000e+00> : vector<16x24xf32>
    %622 = tpu.matmul %5, %613, %cst_236 {dimension_numbers = #tpu.dot_dimension_numbers<[1], [0], [0], [1], [0, 0, 1, 1], [], []>} : vector<16x8xf32>, vector<8x24xf32>, vector<16x24xf32> -> vector<16x24xf32>
    %623 = vector.broadcast %616 : vector<1x24xf32> to vector<16x24xf32>
    %624 = arith.addf %622, %623 : vector<16x24xf32>
    %625 = vector.extract_strided_slice %624 {offsets = [0, 0], sizes = [16, 8], strides = [1, 1]} : vector<16x24xf32> to vector<16x8xf32>
    %626 = vector.extract_strided_slice %624 {offsets = [0, 8], sizes = [16, 8], strides = [1, 1]} : vector<16x24xf32> to vector<16x8xf32>
    %627 = vector.extract_strided_slice %624 {offsets = [0, 16], sizes = [16, 8], strides = [1, 1]} : vector<16x24xf32> to vector<16x8xf32>
    %628 = vector.shape_cast %625 : vector<16x8xf32> to vector<2x8x8xf32>
    %629 = vector.shape_cast %626 : vector<16x8xf32> to vector<2x8x8xf32>
    %630 = vector.shape_cast %627 : vector<16x8xf32> to vector<2x8x8xf32>
    %631 = vector.extract_strided_slice %628 {offsets = [0, 0, 0], sizes = [2, 8, 2], strides = [1, 1, 1]} : vector<2x8x8xf32> to vector<2x8x2xf32>
    %632 = vector.extract_strided_slice %629 {offsets = [0, 0, 0], sizes = [2, 8, 2], strides = [1, 1, 1]} : vector<2x8x8xf32> to vector<2x8x2xf32>
    "tpu.trace_start"() <{level = 10 : i32, message = "bqd,bkd->bqk"}> : () -> ()
    %cst_237 = arith.constant dense<0.000000e+00> : vector<2x8x8xf32>
    %633 = tpu.matmul %631, %632, %cst_237 {dimension_numbers = #tpu.dot_dimension_numbers<[2], [2], [1], [1], [0, 0, 0, 1, 1, 1], [0], [0]>} : vector<2x8x2xf32>, vector<2x8x2xf32>, vector<2x8x8xf32> -> vector<2x8x8xf32>
    "tpu.trace_stop"() : () -> ()
    %cst_238 = arith.constant dense<0xFF800000> : vector<2x8xf32>
    %634 = vector.multi_reduction <maximumf>, %633, %cst_238 [2] : vector<2x8x8xf32> to vector<2x8xf32>
    %635 = vector.shape_cast %634 : vector<2x8xf32> to vector<2x8x1xf32>
    %636 = vector.broadcast %635 : vector<2x8x1xf32> to vector<2x8x8xf32>
    %637 = arith.subf %633, %636 : vector<2x8x8xf32>
    %638 = math.exp %637 : vector<2x8x8xf32>
    %cst_239 = arith.constant dense<0.000000e+00> : vector<2x8xf32>
    %639 = vector.multi_reduction <add>, %638, %cst_239 [2] : vector<2x8x8xf32> to vector<2x8xf32>
    %640 = vector.shape_cast %639 : vector<2x8xf32> to vector<2x8x1xf32>
    %641 = vector.broadcast %640 : vector<2x8x1xf32> to vector<2x8x8xf32>
    %642 = arith.divf %638, %641 : vector<2x8x8xf32>
    %643 = vector.extract_strided_slice %630 {offsets = [0, 0, 0], sizes = [2, 8, 2], strides = [1, 1, 1]} : vector<2x8x8xf32> to vector<2x8x2xf32>
    "tpu.trace_start"() <{level = 10 : i32, message = "bqk,bkd->bqd"}> : () -> ()
    %cst_240 = arith.constant dense<0.000000e+00> : vector<2x8x2xf32>
    %644 = tpu.matmul %642, %643, %cst_240 {dimension_numbers = #tpu.dot_dimension_numbers<[2], [1], [1], [2], [0, 0, 0, 1, 1, 2], [0], [0]>} : vector<2x8x8xf32>, vector<2x8x2xf32>, vector<2x8x2xf32> -> vector<2x8x2xf32>
    "tpu.trace_stop"() : () -> ()
    %645 = vector.extract_strided_slice %628 {offsets = [0, 0, 2], sizes = [2, 8, 2], strides = [1, 1, 1]} : vector<2x8x8xf32> to vector<2x8x2xf32>
    %646 = vector.extract_strided_slice %629 {offsets = [0, 0, 2], sizes = [2, 8, 2], strides = [1, 1, 1]} : vector<2x8x8xf32> to vector<2x8x2xf32>
    "tpu.trace_start"() <{level = 10 : i32, message = "bqd,bkd->bqk"}> : () -> ()
    %cst_241 = arith.constant dense<0.000000e+00> : vector<2x8x8xf32>
    %647 = tpu.matmul %645, %646, %cst_241 {dimension_numbers = #tpu.dot_dimension_numbers<[2], [2], [1], [1], [0, 0, 0, 1, 1, 1], [0], [0]>} : vector<2x8x2xf32>, vector<2x8x2xf32>, vector<2x8x8xf32> -> vector<2x8x8xf32>
    "tpu.trace_stop"() : () -> ()
    %cst_242 = arith.constant dense<0xFF800000> : vector<2x8xf32>
    %648 = vector.multi_reduction <maximumf>, %647, %cst_242 [2] : vector<2x8x8xf32> to vector<2x8xf32>
    %649 = vector.shape_cast %648 : vector<2x8xf32> to vector<2x8x1xf32>
    %650 = vector.broadcast %649 : vector<2x8x1xf32> to vector<2x8x8xf32>
    %651 = arith.subf %647, %650 : vector<2x8x8xf32>
    %652 = math.exp %651 : vector<2x8x8xf32>
    %cst_243 = arith.constant dense<0.000000e+00> : vector<2x8xf32>
    %653 = vector.multi_reduction <add>, %652, %cst_243 [2] : vector<2x8x8xf32> to vector<2x8xf32>
    %654 = vector.shape_cast %653 : vector<2x8xf32> to vector<2x8x1xf32>
    %655 = vector.broadcast %654 : vector<2x8x1xf32> to vector<2x8x8xf32>
    %656 = arith.divf %652, %655 : vector<2x8x8xf32>
    %657 = vector.extract_strided_slice %630 {offsets = [0, 0, 2], sizes = [2, 8, 2], strides = [1, 1, 1]} : vector<2x8x8xf32> to vector<2x8x2xf32>
    "tpu.trace_start"() <{level = 10 : i32, message = "bqk,bkd->bqd"}> : () -> ()
    %cst_244 = arith.constant dense<0.000000e+00> : vector<2x8x2xf32>
    %658 = tpu.matmul %656, %657, %cst_244 {dimension_numbers = #tpu.dot_dimension_numbers<[2], [1], [1], [2], [0, 0, 0, 1, 1, 2], [0], [0]>} : vector<2x8x8xf32>, vector<2x8x2xf32>, vector<2x8x2xf32> -> vector<2x8x2xf32>
    "tpu.trace_stop"() : () -> ()
    %659 = vector.extract_strided_slice %628 {offsets = [0, 0, 4], sizes = [2, 8, 2], strides = [1, 1, 1]} : vector<2x8x8xf32> to vector<2x8x2xf32>
    %660 = vector.extract_strided_slice %629 {offsets = [0, 0, 4], sizes = [2, 8, 2], strides = [1, 1, 1]} : vector<2x8x8xf32> to vector<2x8x2xf32>
    "tpu.trace_start"() <{level = 10 : i32, message = "bqd,bkd->bqk"}> : () -> ()
    %cst_245 = arith.constant dense<0.000000e+00> : vector<2x8x8xf32>
    %661 = tpu.matmul %659, %660, %cst_245 {dimension_numbers = #tpu.dot_dimension_numbers<[2], [2], [1], [1], [0, 0, 0, 1, 1, 1], [0], [0]>} : vector<2x8x2xf32>, vector<2x8x2xf32>, vector<2x8x8xf32> -> vector<2x8x8xf32>
    "tpu.trace_stop"() : () -> ()
    %cst_246 = arith.constant dense<0xFF800000> : vector<2x8xf32>
    %662 = vector.multi_reduction <maximumf>, %661, %cst_246 [2] : vector<2x8x8xf32> to vector<2x8xf32>
    %663 = vector.shape_cast %662 : vector<2x8xf32> to vector<2x8x1xf32>
    %664 = vector.broadcast %663 : vector<2x8x1xf32> to vector<2x8x8xf32>
    %665 = arith.subf %661, %664 : vector<2x8x8xf32>
    %666 = math.exp %665 : vector<2x8x8xf32>
    %cst_247 = arith.constant dense<0.000000e+00> : vector<2x8xf32>
    %667 = vector.multi_reduction <add>, %666, %cst_247 [2] : vector<2x8x8xf32> to vector<2x8xf32>
    %668 = vector.shape_cast %667 : vector<2x8xf32> to vector<2x8x1xf32>
    %669 = vector.broadcast %668 : vector<2x8x1xf32> to vector<2x8x8xf32>
    %670 = arith.divf %666, %669 : vector<2x8x8xf32>
    %671 = vector.extract_strided_slice %630 {offsets = [0, 0, 4], sizes = [2, 8, 2], strides = [1, 1, 1]} : vector<2x8x8xf32> to vector<2x8x2xf32>
    "tpu.trace_start"() <{level = 10 : i32, message = "bqk,bkd->bqd"}> : () -> ()
    %cst_248 = arith.constant dense<0.000000e+00> : vector<2x8x2xf32>
    %672 = tpu.matmul %670, %671, %cst_248 {dimension_numbers = #tpu.dot_dimension_numbers<[2], [1], [1], [2], [0, 0, 0, 1, 1, 2], [0], [0]>} : vector<2x8x8xf32>, vector<2x8x2xf32>, vector<2x8x2xf32> -> vector<2x8x2xf32>
    "tpu.trace_stop"() : () -> ()
    %673 = vector.extract_strided_slice %628 {offsets = [0, 0, 6], sizes = [2, 8, 2], strides = [1, 1, 1]} : vector<2x8x8xf32> to vector<2x8x2xf32>
    %674 = vector.extract_strided_slice %629 {offsets = [0, 0, 6], sizes = [2, 8, 2], strides = [1, 1, 1]} : vector<2x8x8xf32> to vector<2x8x2xf32>
    "tpu.trace_start"() <{level = 10 : i32, message = "bqd,bkd->bqk"}> : () -> ()
    %cst_249 = arith.constant dense<0.000000e+00> : vector<2x8x8xf32>
    %675 = tpu.matmul %673, %674, %cst_249 {dimension_numbers = #tpu.dot_dimension_numbers<[2], [2], [1], [1], [0, 0, 0, 1, 1, 1], [0], [0]>} : vector<2x8x2xf32>, vector<2x8x2xf32>, vector<2x8x8xf32> -> vector<2x8x8xf32>
    "tpu.trace_stop"() : () -> ()
    %cst_250 = arith.constant dense<0xFF800000> : vector<2x8xf32>
    %676 = vector.multi_reduction <maximumf>, %675, %cst_250 [2] : vector<2x8x8xf32> to vector<2x8xf32>
    %677 = vector.shape_cast %676 : vector<2x8xf32> to vector<2x8x1xf32>
    %678 = vector.broadcast %677 : vector<2x8x1xf32> to vector<2x8x8xf32>
    %679 = arith.subf %675, %678 : vector<2x8x8xf32>
    %680 = math.exp %679 : vector<2x8x8xf32>
    %cst_251 = arith.constant dense<0.000000e+00> : vector<2x8xf32>
    %681 = vector.multi_reduction <add>, %680, %cst_251 [2] : vector<2x8x8xf32> to vector<2x8xf32>
    %682 = vector.shape_cast %681 : vector<2x8xf32> to vector<2x8x1xf32>
    %683 = vector.broadcast %682 : vector<2x8x1xf32> to vector<2x8x8xf32>
    %684 = arith.divf %680, %683 : vector<2x8x8xf32>
    %685 = vector.extract_strided_slice %630 {offsets = [0, 0, 6], sizes = [2, 8, 2], strides = [1, 1, 1]} : vector<2x8x8xf32> to vector<2x8x2xf32>
    "tpu.trace_start"() <{level = 10 : i32, message = "bqk,bkd->bqd"}> : () -> ()
    %cst_252 = arith.constant dense<0.000000e+00> : vector<2x8x2xf32>
    %686 = tpu.matmul %684, %685, %cst_252 {dimension_numbers = #tpu.dot_dimension_numbers<[2], [1], [1], [2], [0, 0, 0, 1, 1, 2], [0], [0]>} : vector<2x8x8xf32>, vector<2x8x2xf32>, vector<2x8x2xf32> -> vector<2x8x2xf32>
    "tpu.trace_stop"() : () -> ()
    %687 = tpu.concatenate %644, %658, %672, %686 in 2 : vector<2x8x2xf32>, vector<2x8x2xf32>, vector<2x8x2xf32>, vector<2x8x2xf32> -> vector<2x8x8xf32>
    %688 = vector.shape_cast %687 : vector<2x8x8xf32> to vector<16x8xf32>
    %cst_253 = arith.constant dense<0.000000e+00> : vector<16x8xf32>
    %689 = tpu.matmul %688, %618, %cst_253 {dimension_numbers = #tpu.dot_dimension_numbers<[1], [0], [0], [1], [0, 0, 1, 1], [], []>} : vector<16x8xf32>, vector<8x8xf32>, vector<16x8xf32> -> vector<16x8xf32>
    %690 = vector.broadcast %621 : vector<1x8xf32> to vector<16x8xf32>
    %691 = arith.addf %689, %690 : vector<16x8xf32>
    %692 = arith.addf %5, %691 : vector<16x8xf32>
    %c5 = arith.constant 5 : index
    %c0_254 = arith.constant 0 : index
    %693 = vector.load %arg8[%c5, %c0_254] : memref<8x8xf32, #tpu.memory_space<vmem>>, vector<1x8xf32>
    %694 = vector.shape_cast %693 : vector<1x8xf32> to vector<8xf32>
    %695 = vector.shape_cast %694 : vector<8xf32> to vector<1x8xf32>
    %c5_255 = arith.constant 5 : index
    %c0_256 = arith.constant 0 : index
    %696 = vector.load %arg9[%c5_255, %c0_256] : memref<8x8xf32, #tpu.memory_space<vmem>>, vector<1x8xf32>
    %697 = vector.shape_cast %696 : vector<1x8xf32> to vector<8xf32>
    %698 = vector.shape_cast %697 : vector<8xf32> to vector<1x8xf32>
    %cst_257 = arith.constant dense<0.000000e+00> : vector<16xf32>
    %699 = vector.multi_reduction <add>, %692, %cst_257 [1] : vector<16x8xf32> to vector<16xf32>
    %700 = vector.shape_cast %699 : vector<16xf32> to vector<16x1xf32>
    %cst_258 = arith.constant 8.000000e+00 : f32
    %701 = vector.broadcast %cst_258 : f32 to vector<16x1xf32>
    %702 = arith.divf %700, %701 : vector<16x1xf32>
    %703 = vector.broadcast %702 : vector<16x1xf32> to vector<16x8xf32>
    %704 = arith.subf %692, %703 : vector<16x8xf32>
    %705 = arith.mulf %704, %704 : vector<16x8xf32>
    %cst_259 = arith.constant dense<0.000000e+00> : vector<16xf32>
    %706 = vector.multi_reduction <add>, %705, %cst_259 [1] : vector<16x8xf32> to vector<16xf32>
    %707 = vector.shape_cast %706 : vector<16xf32> to vector<16x1xf32>
    %cst_260 = arith.constant 8.000000e+00 : f32
    %708 = vector.broadcast %cst_260 : f32 to vector<16x1xf32>
    %709 = arith.divf %707, %708 : vector<16x1xf32>
    %710 = vector.broadcast %702 : vector<16x1xf32> to vector<16x8xf32>
    %711 = arith.subf %692, %710 : vector<16x8xf32>
    %cst_261 = arith.constant 9.99999974E-6 : f32
    %712 = vector.broadcast %cst_261 : f32 to vector<16x1xf32>
    %713 = arith.addf %709, %712 : vector<16x1xf32>
    %714 = math.rsqrt %713 : vector<16x1xf32>
    %715 = vector.broadcast %714 : vector<16x1xf32> to vector<16x8xf32>
    %716 = arith.mulf %711, %715 : vector<16x8xf32>
    %717 = vector.broadcast %695 : vector<1x8xf32> to vector<16x8xf32>
    %718 = arith.mulf %716, %717 : vector<16x8xf32>
    %719 = vector.broadcast %698 : vector<1x8xf32> to vector<16x8xf32>
    %720 = arith.addf %718, %719 : vector<16x8xf32>
    %c4_262 = arith.constant 4 : index
    %c0_263 = arith.constant 0 : index
    %c0_264 = arith.constant 0 : index
    %721 = vector.load %arg4[%c4_262, %c0_263, %c0_264] : memref<5x8x24xf32, #tpu.memory_space<vmem>>, vector<1x8x24xf32>
    %722 = vector.shape_cast %721 : vector<1x8x24xf32> to vector<8x24xf32>
    %c4_265 = arith.constant 4 : index
    %c0_266 = arith.constant 0 : index
    %723 = vector.load %arg5[%c4_265, %c0_266] : memref<5x24xf32, #tpu.memory_space<vmem>>, vector<1x24xf32>
    %724 = vector.shape_cast %723 : vector<1x24xf32> to vector<24xf32>
    %725 = vector.shape_cast %724 : vector<24xf32> to vector<1x24xf32>
    %c4_267 = arith.constant 4 : index
    %c0_268 = arith.constant 0 : index
    %c0_269 = arith.constant 0 : index
    %726 = vector.load %arg6[%c4_267, %c0_268, %c0_269] : memref<5x8x8xf32, #tpu.memory_space<vmem>>, vector<1x8x8xf32>
    %727 = vector.shape_cast %726 : vector<1x8x8xf32> to vector<8x8xf32>
    %c4_270 = arith.constant 4 : index
    %c0_271 = arith.constant 0 : index
    %728 = vector.load %arg7[%c4_270, %c0_271] : memref<5x8xf32, #tpu.memory_space<vmem>>, vector<1x8xf32>
    %729 = vector.shape_cast %728 : vector<1x8xf32> to vector<8xf32>
    %730 = vector.shape_cast %729 : vector<8xf32> to vector<1x8xf32>
    %731 = vector.extract_strided_slice %722 {offsets = [0, 0], sizes = [8, 8], strides = [1, 1]} : vector<8x24xf32> to vector<8x8xf32>
    %cst_272 = arith.constant dense<0.000000e+00> : vector<16x8xf32>
    %732 = tpu.matmul %720, %731, %cst_272 {dimension_numbers = #tpu.dot_dimension_numbers<[1], [0], [0], [1], [0, 0, 1, 1], [], []>} : vector<16x8xf32>, vector<8x8xf32>, vector<16x8xf32> -> vector<16x8xf32>
    %733 = vector.extract_strided_slice %725 {offsets = [0, 0], sizes = [1, 8], strides = [1, 1]} : vector<1x24xf32> to vector<1x8xf32>
    %734 = vector.broadcast %733 : vector<1x8xf32> to vector<16x8xf32>
    %735 = arith.addf %732, %734 : vector<16x8xf32>
    %736 = vector.extract_strided_slice %722 {offsets = [0, 8], sizes = [8, 16], strides = [1, 1]} : vector<8x24xf32> to vector<8x16xf32>
    %cst_273 = arith.constant dense<0.000000e+00> : vector<16x16xf32>
    %737 = tpu.matmul %611, %736, %cst_273 {dimension_numbers = #tpu.dot_dimension_numbers<[1], [0], [0], [1], [0, 0, 1, 1], [], []>} : vector<16x8xf32>, vector<8x16xf32>, vector<16x16xf32> -> vector<16x16xf32>
    %738 = vector.extract_strided_slice %725 {offsets = [0, 8], sizes = [1, 16], strides = [1, 1]} : vector<1x24xf32> to vector<1x16xf32>
    %739 = vector.broadcast %738 : vector<1x16xf32> to vector<16x16xf32>
    %740 = arith.addf %737, %739 : vector<16x16xf32>
    %741 = vector.extract_strided_slice %740 {offsets = [0, 0], sizes = [16, 8], strides = [1, 1]} : vector<16x16xf32> to vector<16x8xf32>
    %742 = vector.extract_strided_slice %740 {offsets = [0, 8], sizes = [16, 8], strides = [1, 1]} : vector<16x16xf32> to vector<16x8xf32>
    %743 = vector.shape_cast %735 : vector<16x8xf32> to vector<2x8x8xf32>
    %744 = vector.shape_cast %741 : vector<16x8xf32> to vector<2x8x8xf32>
    %745 = vector.shape_cast %742 : vector<16x8xf32> to vector<2x8x8xf32>
    %746 = vector.extract_strided_slice %743 {offsets = [0, 0, 0], sizes = [2, 8, 2], strides = [1, 1, 1]} : vector<2x8x8xf32> to vector<2x8x2xf32>
    %747 = vector.extract_strided_slice %744 {offsets = [0, 0, 0], sizes = [2, 8, 2], strides = [1, 1, 1]} : vector<2x8x8xf32> to vector<2x8x2xf32>
    "tpu.trace_start"() <{level = 10 : i32, message = "bqd,bkd->bqk"}> : () -> ()
    %cst_274 = arith.constant dense<0.000000e+00> : vector<2x8x8xf32>
    %748 = tpu.matmul %746, %747, %cst_274 {dimension_numbers = #tpu.dot_dimension_numbers<[2], [2], [1], [1], [0, 0, 0, 1, 1, 1], [0], [0]>} : vector<2x8x2xf32>, vector<2x8x2xf32>, vector<2x8x8xf32> -> vector<2x8x8xf32>
    "tpu.trace_stop"() : () -> ()
    %cst_275 = arith.constant dense<0xFF800000> : vector<2x8xf32>
    %749 = vector.multi_reduction <maximumf>, %748, %cst_275 [2] : vector<2x8x8xf32> to vector<2x8xf32>
    %750 = vector.shape_cast %749 : vector<2x8xf32> to vector<2x8x1xf32>
    %751 = vector.broadcast %750 : vector<2x8x1xf32> to vector<2x8x8xf32>
    %752 = arith.subf %748, %751 : vector<2x8x8xf32>
    %753 = math.exp %752 : vector<2x8x8xf32>
    %cst_276 = arith.constant dense<0.000000e+00> : vector<2x8xf32>
    %754 = vector.multi_reduction <add>, %753, %cst_276 [2] : vector<2x8x8xf32> to vector<2x8xf32>
    %755 = vector.shape_cast %754 : vector<2x8xf32> to vector<2x8x1xf32>
    %756 = vector.broadcast %755 : vector<2x8x1xf32> to vector<2x8x8xf32>
    %757 = arith.divf %753, %756 : vector<2x8x8xf32>
    %758 = vector.extract_strided_slice %745 {offsets = [0, 0, 0], sizes = [2, 8, 2], strides = [1, 1, 1]} : vector<2x8x8xf32> to vector<2x8x2xf32>
    "tpu.trace_start"() <{level = 10 : i32, message = "bqk,bkd->bqd"}> : () -> ()
    %cst_277 = arith.constant dense<0.000000e+00> : vector<2x8x2xf32>
    %759 = tpu.matmul %757, %758, %cst_277 {dimension_numbers = #tpu.dot_dimension_numbers<[2], [1], [1], [2], [0, 0, 0, 1, 1, 2], [0], [0]>} : vector<2x8x8xf32>, vector<2x8x2xf32>, vector<2x8x2xf32> -> vector<2x8x2xf32>
    "tpu.trace_stop"() : () -> ()
    %760 = vector.extract_strided_slice %743 {offsets = [0, 0, 2], sizes = [2, 8, 2], strides = [1, 1, 1]} : vector<2x8x8xf32> to vector<2x8x2xf32>
    %761 = vector.extract_strided_slice %744 {offsets = [0, 0, 2], sizes = [2, 8, 2], strides = [1, 1, 1]} : vector<2x8x8xf32> to vector<2x8x2xf32>
    "tpu.trace_start"() <{level = 10 : i32, message = "bqd,bkd->bqk"}> : () -> ()
    %cst_278 = arith.constant dense<0.000000e+00> : vector<2x8x8xf32>
    %762 = tpu.matmul %760, %761, %cst_278 {dimension_numbers = #tpu.dot_dimension_numbers<[2], [2], [1], [1], [0, 0, 0, 1, 1, 1], [0], [0]>} : vector<2x8x2xf32>, vector<2x8x2xf32>, vector<2x8x8xf32> -> vector<2x8x8xf32>
    "tpu.trace_stop"() : () -> ()
    %cst_279 = arith.constant dense<0xFF800000> : vector<2x8xf32>
    %763 = vector.multi_reduction <maximumf>, %762, %cst_279 [2] : vector<2x8x8xf32> to vector<2x8xf32>
    %764 = vector.shape_cast %763 : vector<2x8xf32> to vector<2x8x1xf32>
    %765 = vector.broadcast %764 : vector<2x8x1xf32> to vector<2x8x8xf32>
    %766 = arith.subf %762, %765 : vector<2x8x8xf32>
    %767 = math.exp %766 : vector<2x8x8xf32>
    %cst_280 = arith.constant dense<0.000000e+00> : vector<2x8xf32>
    %768 = vector.multi_reduction <add>, %767, %cst_280 [2] : vector<2x8x8xf32> to vector<2x8xf32>
    %769 = vector.shape_cast %768 : vector<2x8xf32> to vector<2x8x1xf32>
    %770 = vector.broadcast %769 : vector<2x8x1xf32> to vector<2x8x8xf32>
    %771 = arith.divf %767, %770 : vector<2x8x8xf32>
    %772 = vector.extract_strided_slice %745 {offsets = [0, 0, 2], sizes = [2, 8, 2], strides = [1, 1, 1]} : vector<2x8x8xf32> to vector<2x8x2xf32>
    "tpu.trace_start"() <{level = 10 : i32, message = "bqk,bkd->bqd"}> : () -> ()
    %cst_281 = arith.constant dense<0.000000e+00> : vector<2x8x2xf32>
    %773 = tpu.matmul %771, %772, %cst_281 {dimension_numbers = #tpu.dot_dimension_numbers<[2], [1], [1], [2], [0, 0, 0, 1, 1, 2], [0], [0]>} : vector<2x8x8xf32>, vector<2x8x2xf32>, vector<2x8x2xf32> -> vector<2x8x2xf32>
    "tpu.trace_stop"() : () -> ()
    %774 = vector.extract_strided_slice %743 {offsets = [0, 0, 4], sizes = [2, 8, 2], strides = [1, 1, 1]} : vector<2x8x8xf32> to vector<2x8x2xf32>
    %775 = vector.extract_strided_slice %744 {offsets = [0, 0, 4], sizes = [2, 8, 2], strides = [1, 1, 1]} : vector<2x8x8xf32> to vector<2x8x2xf32>
    "tpu.trace_start"() <{level = 10 : i32, message = "bqd,bkd->bqk"}> : () -> ()
    %cst_282 = arith.constant dense<0.000000e+00> : vector<2x8x8xf32>
    %776 = tpu.matmul %774, %775, %cst_282 {dimension_numbers = #tpu.dot_dimension_numbers<[2], [2], [1], [1], [0, 0, 0, 1, 1, 1], [0], [0]>} : vector<2x8x2xf32>, vector<2x8x2xf32>, vector<2x8x8xf32> -> vector<2x8x8xf32>
    "tpu.trace_stop"() : () -> ()
    %cst_283 = arith.constant dense<0xFF800000> : vector<2x8xf32>
    %777 = vector.multi_reduction <maximumf>, %776, %cst_283 [2] : vector<2x8x8xf32> to vector<2x8xf32>
    %778 = vector.shape_cast %777 : vector<2x8xf32> to vector<2x8x1xf32>
    %779 = vector.broadcast %778 : vector<2x8x1xf32> to vector<2x8x8xf32>
    %780 = arith.subf %776, %779 : vector<2x8x8xf32>
    %781 = math.exp %780 : vector<2x8x8xf32>
    %cst_284 = arith.constant dense<0.000000e+00> : vector<2x8xf32>
    %782 = vector.multi_reduction <add>, %781, %cst_284 [2] : vector<2x8x8xf32> to vector<2x8xf32>
    %783 = vector.shape_cast %782 : vector<2x8xf32> to vector<2x8x1xf32>
    %784 = vector.broadcast %783 : vector<2x8x1xf32> to vector<2x8x8xf32>
    %785 = arith.divf %781, %784 : vector<2x8x8xf32>
    %786 = vector.extract_strided_slice %745 {offsets = [0, 0, 4], sizes = [2, 8, 2], strides = [1, 1, 1]} : vector<2x8x8xf32> to vector<2x8x2xf32>
    "tpu.trace_start"() <{level = 10 : i32, message = "bqk,bkd->bqd"}> : () -> ()
    %cst_285 = arith.constant dense<0.000000e+00> : vector<2x8x2xf32>
    %787 = tpu.matmul %785, %786, %cst_285 {dimension_numbers = #tpu.dot_dimension_numbers<[2], [1], [1], [2], [0, 0, 0, 1, 1, 2], [0], [0]>} : vector<2x8x8xf32>, vector<2x8x2xf32>, vector<2x8x2xf32> -> vector<2x8x2xf32>
    "tpu.trace_stop"() : () -> ()
    %788 = vector.extract_strided_slice %743 {offsets = [0, 0, 6], sizes = [2, 8, 2], strides = [1, 1, 1]} : vector<2x8x8xf32> to vector<2x8x2xf32>
    %789 = vector.extract_strided_slice %744 {offsets = [0, 0, 6], sizes = [2, 8, 2], strides = [1, 1, 1]} : vector<2x8x8xf32> to vector<2x8x2xf32>
    "tpu.trace_start"() <{level = 10 : i32, message = "bqd,bkd->bqk"}> : () -> ()
    %cst_286 = arith.constant dense<0.000000e+00> : vector<2x8x8xf32>
    %790 = tpu.matmul %788, %789, %cst_286 {dimension_numbers = #tpu.dot_dimension_numbers<[2], [2], [1], [1], [0, 0, 0, 1, 1, 1], [0], [0]>} : vector<2x8x2xf32>, vector<2x8x2xf32>, vector<2x8x8xf32> -> vector<2x8x8xf32>
    "tpu.trace_stop"() : () -> ()
    %cst_287 = arith.constant dense<0xFF800000> : vector<2x8xf32>
    %791 = vector.multi_reduction <maximumf>, %790, %cst_287 [2] : vector<2x8x8xf32> to vector<2x8xf32>
    %792 = vector.shape_cast %791 : vector<2x8xf32> to vector<2x8x1xf32>
    %793 = vector.broadcast %792 : vector<2x8x1xf32> to vector<2x8x8xf32>
    %794 = arith.subf %790, %793 : vector<2x8x8xf32>
    %795 = math.exp %794 : vector<2x8x8xf32>
    %cst_288 = arith.constant dense<0.000000e+00> : vector<2x8xf32>
    %796 = vector.multi_reduction <add>, %795, %cst_288 [2] : vector<2x8x8xf32> to vector<2x8xf32>
    %797 = vector.shape_cast %796 : vector<2x8xf32> to vector<2x8x1xf32>
    %798 = vector.broadcast %797 : vector<2x8x1xf32> to vector<2x8x8xf32>
    %799 = arith.divf %795, %798 : vector<2x8x8xf32>
    %800 = vector.extract_strided_slice %745 {offsets = [0, 0, 6], sizes = [2, 8, 2], strides = [1, 1, 1]} : vector<2x8x8xf32> to vector<2x8x2xf32>
    "tpu.trace_start"() <{level = 10 : i32, message = "bqk,bkd->bqd"}> : () -> ()
    %cst_289 = arith.constant dense<0.000000e+00> : vector<2x8x2xf32>
    %801 = tpu.matmul %799, %800, %cst_289 {dimension_numbers = #tpu.dot_dimension_numbers<[2], [1], [1], [2], [0, 0, 0, 1, 1, 2], [0], [0]>} : vector<2x8x8xf32>, vector<2x8x2xf32>, vector<2x8x2xf32> -> vector<2x8x2xf32>
    "tpu.trace_stop"() : () -> ()
    %802 = tpu.concatenate %759, %773, %787, %801 in 2 : vector<2x8x2xf32>, vector<2x8x2xf32>, vector<2x8x2xf32>, vector<2x8x2xf32> -> vector<2x8x8xf32>
    %803 = vector.shape_cast %802 : vector<2x8x8xf32> to vector<16x8xf32>
    %cst_290 = arith.constant dense<0.000000e+00> : vector<16x8xf32>
    %804 = tpu.matmul %803, %727, %cst_290 {dimension_numbers = #tpu.dot_dimension_numbers<[1], [0], [0], [1], [0, 0, 1, 1], [], []>} : vector<16x8xf32>, vector<8x8xf32>, vector<16x8xf32> -> vector<16x8xf32>
    %805 = vector.broadcast %730 : vector<1x8xf32> to vector<16x8xf32>
    %806 = arith.addf %804, %805 : vector<16x8xf32>
    %807 = arith.addf %720, %806 : vector<16x8xf32>
    %c6 = arith.constant 6 : index
    %c0_291 = arith.constant 0 : index
    %808 = vector.load %arg8[%c6, %c0_291] : memref<8x8xf32, #tpu.memory_space<vmem>>, vector<1x8xf32>
    %809 = vector.shape_cast %808 : vector<1x8xf32> to vector<8xf32>
    %810 = vector.shape_cast %809 : vector<8xf32> to vector<1x8xf32>
    %c6_292 = arith.constant 6 : index
    %c0_293 = arith.constant 0 : index
    %811 = vector.load %arg9[%c6_292, %c0_293] : memref<8x8xf32, #tpu.memory_space<vmem>>, vector<1x8xf32>
    %812 = vector.shape_cast %811 : vector<1x8xf32> to vector<8xf32>
    %813 = vector.shape_cast %812 : vector<8xf32> to vector<1x8xf32>
    %cst_294 = arith.constant dense<0.000000e+00> : vector<16xf32>
    %814 = vector.multi_reduction <add>, %807, %cst_294 [1] : vector<16x8xf32> to vector<16xf32>
    %815 = vector.shape_cast %814 : vector<16xf32> to vector<16x1xf32>
    %cst_295 = arith.constant 8.000000e+00 : f32
    %816 = vector.broadcast %cst_295 : f32 to vector<16x1xf32>
    %817 = arith.divf %815, %816 : vector<16x1xf32>
    %818 = vector.broadcast %817 : vector<16x1xf32> to vector<16x8xf32>
    %819 = arith.subf %807, %818 : vector<16x8xf32>
    %820 = arith.mulf %819, %819 : vector<16x8xf32>
    %cst_296 = arith.constant dense<0.000000e+00> : vector<16xf32>
    %821 = vector.multi_reduction <add>, %820, %cst_296 [1] : vector<16x8xf32> to vector<16xf32>
    %822 = vector.shape_cast %821 : vector<16xf32> to vector<16x1xf32>
    %cst_297 = arith.constant 8.000000e+00 : f32
    %823 = vector.broadcast %cst_297 : f32 to vector<16x1xf32>
    %824 = arith.divf %822, %823 : vector<16x1xf32>
    %825 = vector.broadcast %817 : vector<16x1xf32> to vector<16x8xf32>
    %826 = arith.subf %807, %825 : vector<16x8xf32>
    %cst_298 = arith.constant 9.99999974E-6 : f32
    %827 = vector.broadcast %cst_298 : f32 to vector<16x1xf32>
    %828 = arith.addf %824, %827 : vector<16x1xf32>
    %829 = math.rsqrt %828 : vector<16x1xf32>
    %830 = vector.broadcast %829 : vector<16x1xf32> to vector<16x8xf32>
    %831 = arith.mulf %826, %830 : vector<16x8xf32>
    %832 = vector.broadcast %810 : vector<1x8xf32> to vector<16x8xf32>
    %833 = arith.mulf %831, %832 : vector<16x8xf32>
    %834 = vector.broadcast %813 : vector<1x8xf32> to vector<16x8xf32>
    %835 = arith.addf %833, %834 : vector<16x8xf32>
    %c2_299 = arith.constant 2 : index
    %c0_300 = arith.constant 0 : index
    %c0_301 = arith.constant 0 : index
    %836 = vector.load %arg10[%c2_299, %c0_300, %c0_301] : memref<3x8x16xf32, #tpu.memory_space<vmem>>, vector<1x8x16xf32>
    %837 = vector.shape_cast %836 : vector<1x8x16xf32> to vector<8x16xf32>
    %cst_302 = arith.constant dense<0.000000e+00> : vector<16x16xf32>
    %838 = tpu.matmul %835, %837, %cst_302 {dimension_numbers = #tpu.dot_dimension_numbers<[1], [0], [0], [1], [0, 0, 1, 1], [], []>} : vector<16x8xf32>, vector<8x16xf32>, vector<16x16xf32> -> vector<16x16xf32>
    %c2_303 = arith.constant 2 : index
    %c0_304 = arith.constant 0 : index
    %839 = vector.load %arg11[%c2_303, %c0_304] : memref<3x16xf32, #tpu.memory_space<vmem>>, vector<1x16xf32>
    %840 = vector.shape_cast %839 : vector<1x16xf32> to vector<16xf32>
    %841 = vector.shape_cast %840 : vector<16xf32> to vector<1x16xf32>
    %842 = vector.broadcast %841 : vector<1x16xf32> to vector<16x16xf32>
    %843 = arith.addf %838, %842 : vector<16x16xf32>
    %cst_305 = arith.constant 0.000000e+00 : f32
    %844 = vector.broadcast %cst_305 : f32 to vector<16x16xf32>
    %845 = arith.maximumf %843, %844 : vector<16x16xf32>
    %c2_306 = arith.constant 2 : index
    %c0_307 = arith.constant 0 : index
    %c0_308 = arith.constant 0 : index
    %846 = vector.load %arg12[%c2_306, %c0_307, %c0_308] : memref<3x16x8xf32, #tpu.memory_space<vmem>>, vector<1x16x8xf32>
    %847 = vector.shape_cast %846 : vector<1x16x8xf32> to vector<16x8xf32>
    %cst_309 = arith.constant dense<0.000000e+00> : vector<16x8xf32>
    %848 = tpu.matmul %845, %847, %cst_309 {dimension_numbers = #tpu.dot_dimension_numbers<[1], [0], [0], [1], [0, 0, 1, 1], [], []>} : vector<16x16xf32>, vector<16x8xf32>, vector<16x8xf32> -> vector<16x8xf32>
    %c2_310 = arith.constant 2 : index
    %c0_311 = arith.constant 0 : index
    %849 = vector.load %arg13[%c2_310, %c0_311] : memref<3x8xf32, #tpu.memory_space<vmem>>, vector<1x8xf32>
    %850 = vector.shape_cast %849 : vector<1x8xf32> to vector<8xf32>
    %851 = vector.shape_cast %850 : vector<8xf32> to vector<1x8xf32>
    %852 = vector.broadcast %851 : vector<1x8xf32> to vector<16x8xf32>
    %853 = arith.addf %848, %852 : vector<16x8xf32>
    %854 = arith.addf %835, %853 : vector<16x8xf32>
    %c7 = arith.constant 7 : index
    %c0_312 = arith.constant 0 : index
    %855 = vector.load %arg8[%c7, %c0_312] : memref<8x8xf32, #tpu.memory_space<vmem>>, vector<1x8xf32>
    %856 = vector.shape_cast %855 : vector<1x8xf32> to vector<8xf32>
    %857 = vector.shape_cast %856 : vector<8xf32> to vector<1x8xf32>
    %c7_313 = arith.constant 7 : index
    %c0_314 = arith.constant 0 : index
    %858 = vector.load %arg9[%c7_313, %c0_314] : memref<8x8xf32, #tpu.memory_space<vmem>>, vector<1x8xf32>
    %859 = vector.shape_cast %858 : vector<1x8xf32> to vector<8xf32>
    %860 = vector.shape_cast %859 : vector<8xf32> to vector<1x8xf32>
    %cst_315 = arith.constant dense<0.000000e+00> : vector<16xf32>
    %861 = vector.multi_reduction <add>, %854, %cst_315 [1] : vector<16x8xf32> to vector<16xf32>
    %862 = vector.shape_cast %861 : vector<16xf32> to vector<16x1xf32>
    %cst_316 = arith.constant 8.000000e+00 : f32
    %863 = vector.broadcast %cst_316 : f32 to vector<16x1xf32>
    %864 = arith.divf %862, %863 : vector<16x1xf32>
    %865 = vector.broadcast %864 : vector<16x1xf32> to vector<16x8xf32>
    %866 = arith.subf %854, %865 : vector<16x8xf32>
    %867 = arith.mulf %866, %866 : vector<16x8xf32>
    %cst_317 = arith.constant dense<0.000000e+00> : vector<16xf32>
    %868 = vector.multi_reduction <add>, %867, %cst_317 [1] : vector<16x8xf32> to vector<16xf32>
    %869 = vector.shape_cast %868 : vector<16xf32> to vector<16x1xf32>
    %cst_318 = arith.constant 8.000000e+00 : f32
    %870 = vector.broadcast %cst_318 : f32 to vector<16x1xf32>
    %871 = arith.divf %869, %870 : vector<16x1xf32>
    %872 = vector.broadcast %864 : vector<16x1xf32> to vector<16x8xf32>
    %873 = arith.subf %854, %872 : vector<16x8xf32>
    %cst_319 = arith.constant 9.99999974E-6 : f32
    %874 = vector.broadcast %cst_319 : f32 to vector<16x1xf32>
    %875 = arith.addf %871, %874 : vector<16x1xf32>
    %876 = math.rsqrt %875 : vector<16x1xf32>
    %877 = vector.broadcast %876 : vector<16x1xf32> to vector<16x8xf32>
    %878 = arith.mulf %873, %877 : vector<16x8xf32>
    %879 = vector.broadcast %857 : vector<1x8xf32> to vector<16x8xf32>
    %880 = arith.mulf %878, %879 : vector<16x8xf32>
    %881 = vector.broadcast %860 : vector<1x8xf32> to vector<16x8xf32>
    %882 = arith.addf %880, %881 : vector<16x8xf32>
    %c0_320 = arith.constant 0 : index
    %c0_321 = arith.constant 0 : index
    %883 = vector.load %arg14[%c0_320, %c0_321] : memref<8x4xf32, #tpu.memory_space<vmem>>, vector<8x4xf32>
    %cst_322 = arith.constant dense<0.000000e+00> : vector<16x4xf32>
    %884 = tpu.matmul %882, %883, %cst_322 {dimension_numbers = #tpu.dot_dimension_numbers<[1], [0], [0], [1], [0, 0, 1, 1], [], []>} : vector<16x8xf32>, vector<8x4xf32>, vector<16x4xf32> -> vector<16x4xf32>
    %c0_323 = arith.constant 0 : index
    %c0_324 = arith.constant 0 : index
    %885 = vector.load %arg15[%c0_323, %c0_324] : memref<1x4xf32, #tpu.memory_space<vmem>>, vector<1x4xf32>
    %886 = vector.broadcast %885 : vector<1x4xf32> to vector<16x4xf32>
    %887 = arith.addf %884, %886 : vector<16x4xf32>
    %888 = arith.negf %887 : vector<16x4xf32>
    %889 = math.exp %888 : vector<16x4xf32>
    %cst_325 = arith.constant 1.000000e+00 : f32
    %890 = vector.broadcast %cst_325 : f32 to vector<16x4xf32>
    %891 = arith.addf %890, %889 : vector<16x4xf32>
    %892 = arith.divf %890, %891 : vector<16x4xf32>
    %893 = tpu.concatenate %442, %892 in 1 : vector<16x4xf32>, vector<16x4xf32> -> vector<16x8xf32>
    %894 = vector.shape_cast %893 : vector<16x8xf32> to vector<2x8x8xf32>
    %c0_326 = arith.constant 0 : index
    %c0_327 = arith.constant 0 : index
    %c0_328 = arith.constant 0 : index
    %895 = vector.load %arg16[%c0_326, %c0_327, %c0_328] : memref<2x8x8xf32, #tpu.memory_space<vmem>>, vector<2x8x8xf32>
    tpu.vector_store %arg16[%c0_326, %c0_327, %c0_328], %894 {strides = array<i32>} : memref<2x8x8xf32, #tpu.memory_space<vmem>>, vector<2x8x8xf32>,
    return
  }
  func.func @transform_0(%arg0: i32) -> (i32, i32, i32) {
    %c0_i32 = arith.constant 0 : i32
    %c0_i32_0 = arith.constant 0 : i32
    %c0_i32_1 = arith.constant 0 : i32
    return %arg0, %c0_i32, %c0_i32_0 : i32, i32, i32
  }
  func.func @transform_1(%arg0: i32) -> (i32, i32, i32) {
    %c0_i32 = arith.constant 0 : i32
    %c0_i32_0 = arith.constant 0 : i32
    %c0_i32_1 = arith.constant 0 : i32
    return %arg0, %c0_i32, %c0_i32_0 : i32, i32, i32
  }
  func.func @transform_2(%arg0: i32) -> (i32, i32, i32) {
    %c0_i32 = arith.constant 0 : i32
    %c0_i32_0 = arith.constant 0 : i32
    %c0_i32_1 = arith.constant 0 : i32
    return %arg0, %c0_i32, %c0_i32_0 : i32, i32, i32
  }
  func.func @transform_3(%arg0: i32) -> (i32, i32, i32) {
    %c0_i32 = arith.constant 0 : i32
    %c0_i32_0 = arith.constant 0 : i32
    %c0_i32_1 = arith.constant 0 : i32
    %c0_i32_2 = arith.constant 0 : i32
    return %c0_i32, %c0_i32_0, %c0_i32_1 : i32, i32, i32
  }
  func.func @transform_4(%arg0: i32) -> (i32, i32) {
    %c0_i32 = arith.constant 0 : i32
    %c0_i32_0 = arith.constant 0 : i32
    %c0_i32_1 = arith.constant 0 : i32
    return %c0_i32, %c0_i32_0 : i32, i32
  }
  func.func @transform_5(%arg0: i32) -> (i32, i32, i32) {
    %c0_i32 = arith.constant 0 : i32
    %c0_i32_0 = arith.constant 0 : i32
    %c0_i32_1 = arith.constant 0 : i32
    %c0_i32_2 = arith.constant 0 : i32
    return %c0_i32, %c0_i32_0, %c0_i32_1 : i32, i32, i32
  }
  func.func @transform_6(%arg0: i32) -> (i32, i32) {
    %c0_i32 = arith.constant 0 : i32
    %c0_i32_0 = arith.constant 0 : i32
    %c0_i32_1 = arith.constant 0 : i32
    return %c0_i32, %c0_i32_0 : i32, i32
  }
  func.func @transform_7(%arg0: i32) -> (i32, i32) {
    %c0_i32 = arith.constant 0 : i32
    %c0_i32_0 = arith.constant 0 : i32
    %c0_i32_1 = arith.constant 0 : i32
    return %c0_i32, %c0_i32_0 : i32, i32
  }
  func.func @transform_8(%arg0: i32) -> (i32, i32) {
    %c0_i32 = arith.constant 0 : i32
    %c0_i32_0 = arith.constant 0 : i32
    %c0_i32_1 = arith.constant 0 : i32
    return %c0_i32, %c0_i32_0 : i32, i32
  }
  func.func @transform_9(%arg0: i32) -> (i32, i32, i32) {
    %c0_i32 = arith.constant 0 : i32
    %c0_i32_0 = arith.constant 0 : i32
    %c0_i32_1 = arith.constant 0 : i32
    %c0_i32_2 = arith.constant 0 : i32
    return %c0_i32, %c0_i32_0, %c0_i32_1 : i32, i32, i32
  }
  func.func @transform_10(%arg0: i32) -> (i32, i32) {
    %c0_i32 = arith.constant 0 : i32
    %c0_i32_0 = arith.constant 0 : i32
    %c0_i32_1 = arith.constant 0 : i32
    return %c0_i32, %c0_i32_0 : i32, i32
  }
  func.func @transform_11(%arg0: i32) -> (i32, i32, i32) {
    %c0_i32 = arith.constant 0 : i32
    %c0_i32_0 = arith.constant 0 : i32
    %c0_i32_1 = arith.constant 0 : i32
    %c0_i32_2 = arith.constant 0 : i32
    return %c0_i32, %c0_i32_0, %c0_i32_1 : i32, i32, i32
  }
  func.func @transform_12(%arg0: i32) -> (i32, i32) {
    %c0_i32 = arith.constant 0 : i32
    %c0_i32_0 = arith.constant 0 : i32
    %c0_i32_1 = arith.constant 0 : i32
    return %c0_i32, %c0_i32_0 : i32, i32
  }
  func.func @transform_13(%arg0: i32) -> (i32, i32) {
    %c0_i32 = arith.constant 0 : i32
    %c0_i32_0 = arith.constant 0 : i32
    %c0_i32_1 = arith.constant 0 : i32
    return %c0_i32, %c0_i32_0 : i32, i32
  }
  func.func @transform_14(%arg0: i32) -> (i32, i32) {
    %c0_i32 = arith.constant 0 : i32
    %c0_i32_0 = arith.constant 0 : i32
    %c0_i32_1 = arith.constant 0 : i32
    return %c0_i32, %c0_i32_0 : i32, i32
  }
  func.func @transform_15(%arg0: i32) -> (i32, i32, i32) {
    %c0_i32 = arith.constant 0 : i32
    %c0_i32_0 = arith.constant 0 : i32
    %c0_i32_1 = arith.constant 0 : i32
    return %arg0, %c0_i32, %c0_i32_0 : i32, i32, i32
  }
}

</mosaic_0001>

<bundles_post_ra>
// kernel: tranad_forward.1
= control target key start
LH: loop header
LB: loop body
LE: loop exit
PB: predicated region body
PF: predicated region fallthrough
CT: control target
= control target key end

     0   :  { %vm64_vm0 = vcmask 64512   ;;  %v12229_v3 = vmov 0.0   ;;  %vm12230_vm1 = vmmov 0   ;;  %s13768_s26 = smov 120   ;;  %vm149_vm2 = vcmask 15360   ;;  %s13758_s27 = smov 112   ;;  %s13726_s3 = inlined_call_operand.vmem [shape: f32[5,8,24], index: 3, kind: input, shape index: {}]   ;;  %s13727_s1 = inlined_call_operand.vmem [shape: f32[2,8,8], index: 1, kind: input, shape index: {}]   ;;  %s13728_s4 = inlined_call_operand.vmem [shape: f32[5,24], index: 4, kind: input, shape index: {}]   ;;  %s13729_s5 = inlined_call_operand.vmem [shape: f32[5,8,8], index: 5, kind: input, shape index: {}]   ;;  %s13730_s6 = inlined_call_operand.vmem [shape: f32[5,8], index: 6, kind: input, shape index: {}]   ;;  %s13731_s9 = inlined_call_operand.vmem [shape: f32[3,8,16], index: 9, kind: input, shape index: {}]   ;;  %s13732_s7 = inlined_call_operand.vmem [shape: f32[8,8], index: 7, kind: input, shape index: {}]   ;;  %s13733_s8 = inlined_call_operand.vmem [shape: f32[8,8], index: 8, kind: input, shape index: {}]   ;;  %s13734_s2 = inlined_call_operand.vmem [shape: f32[2,8,8], index: 2, kind: input, shape index: {}]   ;;  %s13735_s11 = inlined_call_operand.vmem [shape: f32[3,16,8], index: 11, kind: input, shape index: {}]   ;;  %s13736_s10 = inlined_call_operand.vmem [shape: f32[3,16], index: 10, kind: input, shape index: {}]   ;;  %s13737_s12 = inlined_call_operand.vmem [shape: f32[3,8], index: 12, kind: input, shape index: {}]   ;;  %s13738_s13 = inlined_call_operand.vmem [shape: f32[8,4], index: 13, kind: input, shape index: {}]   ;;  %s13739_s14 = inlined_call_operand.vmem [shape: f32[1,4], index: 14, kind: input, shape index: {}]   ;;  %s13740_s0 = inlined_call_operand.vmem [shape: f32[2,8,4], index: 0, kind: input, shape index: {}]   ;;  %s13741_s15 = inlined_call_operand.vmem [shape: f32[2,8,8], index: 15, kind: output, shape index: {}]  }
   0x1   :  { %13772 = sst [smem:[#allocation2_spill]] %s13739_s14  ;;  %v56_v0 = vld [vmem:[%s13726_s3] sm:$0xff]  ;;  %v12336_v2 = vld [vmem:[%s13727_s1 + $0x8] sm:$0xff]  ;;  %11353 = vmatprep.subr.mxu1 %v12229_v3  ;;  %11355 = vmatprep.mubr.msk.f32.mxu1 %vm12230_vm1, %v12229_v3  ;;  %s13764_s28 = smov 126   ;;  %vm1491_vm3 = vcmask 31744   ;;  %vm1494_vm4 = vcmask 48128  }
   0x2   :  { %13773 = sst [smem:[#allocation3_spill]] %s13741_s15  ;;  %v12331_v1 = vld [vmem:[%s13727_s1] sm:$0xff]  ;;  %11348 = vmatprep.subr.mxu0 %v56_v0  ;;  %s13766_s29 = smov 118   ;;  %vm1721_vm5 = vcmask 130048   ;;  %vm5404_vm6 = vcmask 1043456  }
   0x3   :  { %11350 = vmatprep.mubr.msk.f32.mxu0 %vm64_vm0, %v12331_v1  ;;  %11349 = vmatpush3.msra.mxu0 %v56_v0  ;;  %v10821_v5 = vld [vmem:[%s13728_s4] ss:$0 sm:$0xff]  ;;  %s13756_s30 = smov 110   ;;  %s13760_s16 = smov 116  }
   0x4   :  { %11351 = vmatmul.mubr.msk.f32.vlgmr.msra.gmra.mxu0 %vm64_vm0, %v12336_v2  ;;  %11358 = vmatprep.subr.mxu0 %v12229_v3  ;;  %s13762_s17 = smov 124   ;;  %s13754_s18 = smov 108  }
   0x5   :  { %11360 = vmatprep.mubr.msk.f32.mxu0 %vm12230_vm1, %v12229_v3  ;;  %s13752_s19 = smov 114   ;;  %s13750_s20 = smov 122  }
   0x6   :  { %s13748_s21 = smov 106   ;;  %s13746_s22 = smov 2  }
   0x7   :  { %s13742_s23 = smov 4   ;;  %s13775_s25 = smov 122  }
   0x8   :  { %s13789_s15 = sld [smem:[#allocation3_spill]] }
  0xc4   :  { %v11352_v4 = vpop.f32.mrf.mxu0 }
  0xc5   :  { %v12355_v8 = vadd.f32 %v11352_v4, %v10821_v5 }
  0xc6   :  { %v137_v6 = vpop.f32.mrf.mxu0 }
  0xc7   :  { %v12351_v7 = vadd.f32 %v10821_v5, %v137_v6 }
  0xc9   :  { %147 = vrot.lane.b32.xlu0 %v12351_v7, %s13768_s26 }
  0xcd   :  { %225 = vrot.lane.b32.xlu0 %v12355_v8, %s13768_s26 }
 0x13b   :  { %v148_v9 = vpop.permute.xlu0 %147 }
 0x13c   :  { %11354 = vmatpush3.xpose.msk.msra.mxu1 %vm149_vm2, %v148_v9 }
 0x13d   :  { %11363 = vmatprep.subr.mxu1 %v12229_v3 }
 0x13f   :  { %11356 = vmatmul.mubr.msk.f32.vlgmr.msra.gmra.mxu1 %vm149_vm2, %v12351_v7  ;;  %v226_v10 = vpop.permute.xlu0 %225 }
 0x140   :  { %11359 = vmatpush3.xpose.msk.msra.mxu0 %vm149_vm2, %v226_v10  ;;  %11365 = vmatprep.mubr.msk.f32.mxu1 %vm12230_vm1, %v12229_v3 }
 0x141   :  { %11368 = vmatprep.subr.mxu0 %v12229_v3 }
 0x143   :  { %11361 = vmatmul.mubr.msk.f32.vlgmr.msra.gmra.mxu0 %vm149_vm2, %v12355_v8 }
 0x144   :  { %11370 = vmatprep.mubr.msk.f32.mxu0 %vm12230_vm1, %v12229_v3 }
 0x1ff   :  { %v220_v11 = vpop.f32.mrf.mxu1 }
 0x200   :  { %v301_v12 = vsel %vm64_vm0, %v220_v11, -inf }
 0x201   :  { %302 = vmax.xlane.f32.xlu1 %v301_v12  ;;  %v11357_v13 = vpop.f32.mrf.mxu1 }
 0x203   :  { %v297_v14 = vpop.f32.mrf.mxu0 }
 0x204   :  { %v304_v15 = vsel %vm64_vm0, %v297_v14, -inf }
 0x205   :  { %305 = vmax.xlane.f32.xlu1 %v304_v15  ;;  %v11362_v16 = vpop.f32.mrf.mxu0 }
 0x28a   :  { %v303_v17 = vpop.xlane.xlu1 %302 }
 0x28b   :  { %v307_v18 = vsub.f32 %v220_v11, %v303_v17 }
 0x28d   :  { %v309_v19 = vmul.f32 1.442695, %v307_v18 }
 0x28e   :  { %v306_v20 = vpop.xlane.xlu1 %305 }
 0x28f   :  { %11977 = vpow2.f32 %v309_v19  ;;  %v308_v21 = vsub.f32 %v297_v14, %v306_v20 }
 0x291   :  { %v311_v22 = vmul.f32 1.442695, %v308_v21 }
 0x293   :  { %11979 = vpow2.f32 %v311_v22 }
 0x29c   :  { %v11978_v23 = vpop.eup %11977 }
 0x29d   :  { %v313_v24 = vsel %vm64_vm0, %v11978_v23, 0.0 }
 0x29e   :  { %314 = vadd.xlane.f32.xlu0 %v313_v24 }
 0x2a0   :  { %v11980_v25 = vpop.eup %11979 }
 0x2a1   :  { %v316_v26 = vsel %vm64_vm0, %v11980_v25, 0.0 }
 0x2a2   :  { %317 = vadd.xlane.f32.xlu1 %v316_v26 }
 0x2b3   :  { %323 = vrot.lane.b32.xlu1 %v12351_v7, %s13758_s27 }
 0x2b4   :  { %475 = vrot.lane.b32.xlu0 %v12351_v7, %s13764_s28 }
 0x2b7   :  { %399 = vrot.lane.b32.xlu1 %v12355_v8, %s13758_s27 }
 0x2bb   :  { %477 = vrot.lane.b32.xlu1 %v12351_v7, %s13766_s29 }
 0x2bf   :  { %555 = vrot.lane.b32.xlu1 %v12355_v8, %s13766_s29 }
 0x2c3   :  { %553 = vrot.lane.b32.xlu1 %v12355_v8, %s13764_s28 }
 0x327   :  { %v315_v27 = vpop.xlane.xlu0 %314 }
 0x328   :  { %11981 = vrcp.f32 %v315_v27 }
 0x32b   :  { %v318_v28 = vpop.xlane.xlu1 %317  ;;  %v476_v36 = vpop.permute.xlu0 %475 }
 0x32c   :  { %11983 = vrcp.f32 %v318_v28 }
 0x32f   :  { %v324_v29 = vpop.permute.xlu1 %323 }
 0x330   :  { %11364 = vmatpush3.msra.mxu1 %v324_v29 }
 0x331   :  { %11373 = vmatprep.subr.mxu1 %v12229_v3 }
 0x333   :  { %v400_v30 = vpop.permute.xlu1 %399 }
 0x334   :  { %11369 = vmatpush3.msra.mxu0 %v400_v30 }
 0x335   :  { %v11982_v31 = vpop.eup %11981  ;;  %11378 = vmatprep.subr.mxu0 %v12229_v3 }
 0x336   :  { %v320_v32 = vmul.f32 %v11982_v31, %v11978_v23 }
 0x337   :  { %v478_v33 = vpop.permute.xlu1 %477 }
 0x338   :  { %11366 = vmatmul.mubr.msk.f32.vlgmr.msra.gmra.mxu1 %vm64_vm0, %v320_v32 }
 0x339   :  { %v11984_v34 = vpop.eup %11983  ;;  %11374 = vmatpush3.xpose.msk.msra.mxu1 %vm149_vm2, %v478_v33  ;;  %11375 = vmatprep.mubr.msk.f32.mxu1 %vm12230_vm1, %v12229_v3 }
 0x33a   :  { %v322_v35 = vmul.f32 %v11984_v34, %v11980_v25  ;;  %11383 = vmatprep.subr.mxu1 %v12229_v3 }
 0x33b   :  { %v556_v37 = vpop.permute.xlu1 %555 }
 0x33c   :  { %11371 = vmatmul.mubr.msk.f32.vlgmr.msra.gmra.mxu0 %vm64_vm0, %v322_v35  ;;  %11376 = vmatmul.mubr.msk.f32.vlgmr.msra.gmra.mxu1 %vm149_vm2, %v476_v36 }
 0x33d   :  { %11379 = vmatpush3.xpose.msk.msra.mxu0 %vm149_vm2, %v556_v37  ;;  %11380 = vmatprep.mubr.msk.f32.mxu0 %vm12230_vm1, %v12229_v3 }
 0x33e   :  { %11388 = vmatprep.subr.mxu0 %v12229_v3  ;;  %11385 = vmatprep.mubr.msk.f32.mxu1 %vm12230_vm1, %v12229_v3 }
 0x33f   :  { %v554_v38 = vpop.permute.xlu1 %553 }
 0x340   :  { %11381 = vmatmul.mubr.msk.f32.vlgmr.msra.gmra.mxu0 %vm149_vm2, %v554_v38 }
 0x341   :  { %11390 = vmatprep.mubr.msk.f32.mxu0 %vm12230_vm1, %v12229_v3 }
 0x3f8   :  { %v12405_v39 = vpop.f32.mrf.mxu1 }
 0x3fa   :  { %v11367_v40 = vpop.f32.mrf.mxu1 }
 0x3fc   :  { %v12407_v41 = vpop.f32.mrf.mxu0  ;;  %v549_v42 = vpop.f32.mrf.mxu1 }
 0x3fd   :  { %v631_v43 = vsel %vm64_vm0, %v549_v42, -inf }
 0x3fe   :  { %v11372_v44 = vpop.f32.mrf.mxu0  ;;  %632 = vmax.xlane.f32.xlu1 %v631_v43  ;;  %v11377_v45 = vpop.f32.mrf.mxu1 }
 0x400   :  { %v627_v46 = vpop.f32.mrf.mxu0 }
 0x401   :  { %v634_v47 = vsel %vm64_vm0, %v627_v46, -inf }
 0x402   :  { %635 = vmax.xlane.f32.xlu0 %v634_v47  ;;  %v11382_v48 = vpop.f32.mrf.mxu0 }
 0x40f   :  { %653 = vrot.lane.b32.xlu1 %v12351_v7, %s13756_s30 }
 0x413   :  { %807 = vrot.lane.b32.xlu1 %v12351_v7, %s13760_s16 }
 0x417   :  { %885 = vrot.lane.b32.xlu1 %v12355_v8, %s13760_s16 }
 0x418   :  { %729 = vrot.lane.b32.xlu0 %v12355_v8, %s13756_s30 }
 0x41c   :  { %805 = vrot.lane.b32.xlu0 %v12351_v7, %s13762_s17 }
 0x487   :  { %v633_v49 = vpop.xlane.xlu1 %632 }
 0x488   :  { %v637_v50 = vsub.f32 %v549_v42, %v633_v49 }
 0x48a   :  { %v639_v54 = vmul.f32 1.442695, %v637_v50 }
 0x48b   :  { %v654_v51 = vpop.permute.xlu1 %653  ;;  %v636_v52 = vpop.xlane.xlu0 %635 }
 0x48c   :  { %v638_v53 = vsub.f32 %v627_v46, %v636_v52  ;;  %11384 = vmatpush3.msra.mxu1 %v654_v51 }
 0x48d   :  { %11393 = vmatprep.subr.mxu1 %v12229_v3 }
 0x48e   :  { %v641_v55 = vmul.f32 1.442695, %v638_v53 }
 0x48f   :  { %v730_v56 = vpop.permute.xlu0 %729  ;;  %v808_v61 = vpop.permute.xlu1 %807 }
 0x490   :  { %11985 = vpow2.f32 %v641_v55  ;;  %11389 = vmatpush3.msra.mxu0 %v730_v56 }
 0x491   :  { %11398 = vmatprep.subr.mxu0 %v12229_v3  ;;  %11987 = vpow2.f32 %v639_v54 }
 0x493   :  { %v886_v62 = vpop.permute.xlu1 %885  ;;  %v806_v11 = vpop.permute.xlu0 %805 }
 0x49d   :  { %v11986_v57 = vpop.eup %11985 }
 0x49e   :  { %v646_v58 = vsel %vm64_vm0, %v11986_v57, 0.0  ;;  %v11988_v59 = vpop.eup %11987 }
 0x49f   :  { %647 = vadd.xlane.f32.xlu1 %v646_v58  ;;  %v643_v60 = vsel %vm64_vm0, %v11988_v59, 0.0 }
 0x4a3   :  { %644 = vadd.xlane.f32.xlu1 %v643_v60 }
 0x4b4   :  { %883 = vrot.lane.b32.xlu1 %v12355_v8, %s13762_s17 }
 0x528   :  { %v648_v63 = vpop.xlane.xlu1 %647 }
 0x529   :  { %11989 = vrcp.f32 %v648_v63 }
 0x52c   :  { %v645_v0 = vpop.xlane.xlu1 %644 }
 0x52d   :  { %11991 = vrcp.f32 %v645_v0 }
 0x530   :  { %v884_v10 = vpop.permute.xlu1 %883 }
 0x536   :  { %v11990_v4 = vpop.eup %11989 }
 0x537   :  { %v652_v5 = vmul.f32 %v11990_v4, %v11986_v57 }
 0x539   :  { %11391 = vmatmul.mubr.msk.f32.vlgmr.msra.gmra.mxu0 %vm64_vm0, %v652_v5 }
 0x53a   :  { %v11992_v6 = vpop.eup %11991  ;;  %11399 = vmatpush3.xpose.msk.msra.mxu0 %vm149_vm2, %v886_v62  ;;  %11400 = vmatprep.mubr.msk.f32.mxu0 %vm12230_vm1, %v12229_v3 }
 0x53b   :  { %v650_v9 = vmul.f32 %v11992_v6, %v11988_v59  ;;  %11408 = vmatprep.subr.mxu0 %v12229_v3 }
 0x53d   :  { %11386 = vmatmul.mubr.msk.f32.vlgmr.msra.gmra.mxu1 %vm64_vm0, %v650_v9  ;;  %11401 = vmatmul.mubr.msk.f32.vlgmr.msra.gmra.mxu0 %vm149_vm2, %v884_v10 }
 0x53e   :  { %11394 = vmatpush3.xpose.msk.msra.mxu1 %vm149_vm2, %v808_v61  ;;  %11395 = vmatprep.mubr.msk.f32.mxu1 %vm12230_vm1, %v12229_v3 }
 0x53f   :  { %11403 = vmatprep.subr.mxu1 %v12229_v3  ;;  %11410 = vmatprep.mubr.msk.f32.mxu0 %vm12230_vm1, %v12229_v3 }
 0x541   :  { %11396 = vmatmul.mubr.msk.f32.vlgmr.msra.gmra.mxu1 %vm149_vm2, %v806_v11 }
 0x542   :  { %11405 = vmatprep.mubr.msk.f32.mxu1 %vm12230_vm1, %v12229_v3 }
 0x5f9   :  { %v12443_v12 = vpop.f32.mrf.mxu0 }
 0x5fb   :  { %v11392_v13 = vpop.f32.mrf.mxu0 }
 0x5fd   :  { %v12445_v14 = vpop.f32.mrf.mxu1  ;;  %v957_v15 = vpop.f32.mrf.mxu0 }
 0x5fe   :  { %v964_v16 = vsel %vm64_vm0, %v957_v15, -inf }
 0x5ff   :  { %v11387_v17 = vpop.f32.mrf.mxu1  ;;  %965 = vmax.xlane.f32.xlu1 %v964_v16  ;;  %v11402_v18 = vpop.f32.mrf.mxu0 }
 0x601   :  { %v879_v19 = vpop.f32.mrf.mxu1 }
 0x602   :  { %v961_v20 = vsel %vm64_vm0, %v879_v19, -inf }
 0x603   :  { %962 = vmax.xlane.f32.xlu0 %v961_v20  ;;  %v11397_v21 = vpop.f32.mrf.mxu1 }
 0x610   :  { %983 = vrot.lane.b32.xlu1 %v12351_v7, %s13754_s18 }
 0x614   :  { %1137 = vrot.lane.b32.xlu1 %v12351_v7, %s13752_s19 }
 0x618   :  { %1215 = vrot.lane.b32.xlu1 %v12355_v8, %s13752_s19  ;;  %s13774_s19 = smov 114  }
 0x61c   :  { %1213 = vrot.lane.b32.xlu1 %v12355_v8, %s13750_s20 }
 0x688   :  { %v966_v22 = vpop.xlane.xlu1 %965 }
 0x689   :  { %v968_v23 = vsub.f32 %v957_v15, %v966_v22 }
 0x68b   :  { %v971_v24 = vmul.f32 1.442695, %v968_v23 }
 0x68c   :  { %v984_v25 = vpop.permute.xlu1 %983  ;;  %v963_v26 = vpop.xlane.xlu0 %962 }
 0x68d   :  { %11993 = vpow2.f32 %v971_v24  ;;  %v967_v27 = vsub.f32 %v879_v19, %v963_v26  ;;  %11404 = vmatpush3.msra.mxu1 %v984_v25 }
 0x68e   :  { %11413 = vmatprep.subr.mxu1 %v12229_v3 }
 0x68f   :  { %v969_v28 = vmul.f32 1.442695, %v967_v27 }
 0x690   :  { %v1138_v35 = vpop.permute.xlu1 %1137 }
 0x691   :  { %11995 = vpow2.f32 %v969_v28 }
 0x694   :  { %v1216_v38 = vpop.permute.xlu1 %1215 }
 0x698   :  { %v1214_v44 = vpop.permute.xlu1 %1213 }
 0x69a   :  { %v11994_v29 = vpop.eup %11993 }
 0x69b   :  { %v976_v30 = vsel %vm64_vm0, %v11994_v29, 0.0 }
 0x69c   :  { %977 = vadd.xlane.f32.xlu0 %v976_v30 }
 0x69e   :  { %v11996_v31 = vpop.eup %11995 }
 0x69f   :  { %v973_v32 = vsel %vm64_vm0, %v11996_v31, 0.0 }
 0x6a0   :  { %974 = vadd.xlane.f32.xlu0 %v973_v32 }
 0x6b6   :  { %1059 = vrot.lane.b32.xlu0 %v12355_v8, %s13754_s18 }
 0x6ba   :  { %1135 = vrot.lane.b32.xlu0 %v12351_v7, %s13750_s20  ;;  %s13778_s20 = smov 4  }
 0x725   :  { %v978_v33 = vpop.xlane.xlu0 %977 }
 0x726   :  { %11997 = vrcp.f32 %v978_v33 }
 0x729   :  { %v975_v34 = vpop.xlane.xlu0 %974 }
 0x72a   :  { %11999 = vrcp.f32 %v975_v34 }
 0x72d   :  { %v1060_v36 = vpop.permute.xlu0 %1059 }
 0x72e   :  { %11409 = vmatpush3.msra.mxu0 %v1060_v36 }
 0x72f   :  { %11418 = vmatprep.subr.mxu0 %v12229_v3 }
 0x731   :  { %v1136_v45 = vpop.permute.xlu0 %1135 }
 0x733   :  { %v11998_v37 = vpop.eup %11997 }
 0x734   :  { %v982_v40 = vmul.f32 %v11998_v37, %v11994_v29 }
 0x736   :  { %11411 = vmatmul.mubr.msk.f32.vlgmr.msra.gmra.mxu0 %vm64_vm0, %v982_v40 }
 0x737   :  { %v12000_v42 = vpop.eup %11999  ;;  %11419 = vmatpush3.xpose.msk.msra.mxu0 %vm149_vm2, %v1216_v38  ;;  %11420 = vmatprep.mubr.msk.f32.mxu0 %vm12230_vm1, %v12229_v3 }
 0x738   :  { %v980_v43 = vmul.f32 %v12000_v42, %v11996_v31  ;;  %11428 = vmatprep.subr.mxu0 %v12229_v3 }
 0x73a   :  { %11406 = vmatmul.mubr.msk.f32.vlgmr.msra.gmra.mxu1 %vm64_vm0, %v980_v43  ;;  %11421 = vmatmul.mubr.msk.f32.vlgmr.msra.gmra.mxu0 %vm149_vm2, %v1214_v44 }
 0x73b   :  { %11414 = vmatpush3.xpose.msk.msra.mxu1 %vm149_vm2, %v1138_v35  ;;  %11415 = vmatprep.mubr.msk.f32.mxu1 %vm12230_vm1, %v12229_v3 }
 0x73c   :  { %11423 = vmatprep.subr.mxu1 %v12229_v3  ;;  %11430 = vmatprep.mubr.msk.f32.mxu0 %vm12230_vm1, %v12229_v3 }
 0x73e   :  { %11416 = vmatmul.mubr.msk.f32.vlgmr.msra.gmra.mxu1 %vm149_vm2, %v1136_v45 }
 0x73f   :  { %11425 = vmatprep.mubr.msk.f32.mxu1 %vm12230_vm1, %v12229_v3 }
 0x7f6   :  { %v1131_v46 = vpop.f32.mrf.mxu0 }
 0x7f8   :  { %v11412_v47 = vpop.f32.mrf.mxu0 }
 0x7fa   :  { %v1055_v48 = vpop.f32.mrf.mxu1  ;;  %v1287_v49 = vpop.f32.mrf.mxu0 }
 0x7fb   :  { %v1294_v50 = vsel %vm64_vm0, %v1287_v49, -inf }
 0x7fc   :  { %1295 = vmax.xlane.f32.xlu1 %v1294_v50  ;;  %v11407_v51 = vpop.f32.mrf.mxu1  ;;  %v11422_v52 = vpop.f32.mrf.mxu0 }
 0x7fe   :  { %v1209_v53 = vpop.f32.mrf.mxu1 }
 0x7ff   :  { %v1291_v54 = vsel %vm64_vm0, %v1209_v53, -inf }
 0x800   :  { %1292 = vmax.xlane.f32.xlu0 %v1291_v54  ;;  %v11417_v55 = vpop.f32.mrf.mxu1 }
 0x80d   :  { %1313 = vrot.lane.b32.xlu1 %v12351_v7, %s13748_s21 }
 0x811   :  { %1467 = vrot.lane.b32.xlu1 %v12445_v14, %s13746_s22 }
 0x815   :  { %1469 = vrot.lane.b32.xlu1 %v12443_v12, %s13746_s22  ;;  %s13776_s22 = smov 106  }
 0x819   :  { %1477 = vrot.lane.b32.xlu1 %v1131_v46, %s13742_s23 }
 0x885   :  { %v1296_v56 = vpop.xlane.xlu1 %1295 }
 0x886   :  { %v1298_v57 = vsub.f32 %v1287_v49, %v1296_v56  ;;  %v10851_v56 = vld [vmem:[%s13732_s7] ss:$0 sm:$0xff] }
 0x888   :  { %v1301_v58 = vmul.f32 1.442695, %v1298_v57 }
 0x889   :  { %v1314_v59 = vpop.permute.xlu1 %1313  ;;  %v1293_v60 = vpop.xlane.xlu0 %1292 }
 0x88a   :  { %12001 = vpow2.f32 %v1301_v58  ;;  %v1297_v61 = vsub.f32 %v1209_v53, %v1293_v60  ;;  %11424 = vmatpush3.msra.mxu1 %v1314_v59  ;;  %v10852_v58 = vld [vmem:[%s13733_s8] ss:$0 sm:$0xff] }
 0x88c   :  { %v1299_v62 = vmul.f32 1.442695, %v1297_v61 }
 0x88d   :  { %v1468_v18 = vpop.permute.xlu1 %1467 }
 0x88e   :  { %12003 = vpow2.f32 %v1299_v62  ;;  %v1489_v22 = vsel %vm149_vm2, %v12405_v39, %v1468_v18  ;;  %v10848_v39 = vld [vmem:[%s13730_s6] ss:$0 sm:$0xff] }
 0x891   :  { %v1470_v19 = vpop.permute.xlu1 %1469 }
 0x892   :  { %v1490_v24 = vsel %vm149_vm2, %v12407_v41, %v1470_v19 }
 0x895   :  { %v1478_v20 = vpop.permute.xlu1 %1477 }
 0x896   :  { %v1493_v27 = vsel %vm1491_vm3, %v1490_v24, %v1478_v20 }
 0x897   :  { %v12002_v7 = vpop.eup %12001 }
 0x898   :  { %v1306_v63 = vsel %vm64_vm0, %v12002_v7, 0.0 }
 0x899   :  { %1307 = vadd.xlane.f32.xlu0 %v1306_v63 }
 0x89b   :  { %v12004_v0 = vpop.eup %12003 }
 0x89c   :  { %v1303_v4 = vsel %vm64_vm0, %v12004_v0, 0.0 }
 0x89d   :  { %1304 = vadd.xlane.f32.xlu0 %v1303_v4  ;;  %v12549_v4 = vld [vmem:[%s13734_s2 + $0x8] sm:$0xff] }
 0x8b3   :  { %1389 = vrot.lane.b32.xlu0 %v12355_v8, %s13748_s21  ;;  %v58_v8 = vld [vmem:[%s13729_s5] sm:$0xff] }
 0x8b4   :  { %11433 = vmatprep.subr.mxu1 %v58_v8 }
 0x8b7   :  { %1475 = vrot.lane.b32.xlu0 %v1055_v48, %s13742_s23  ;;  %s13744_s23 = smov 6   ;;  %v10861_v48 = vld [vmem:[%s13726_s3 + $0x8] sm:$0xff] }
 0x922   :  { %v1308_v5 = vpop.xlane.xlu0 %1307 }
 0x923   :  { %12005 = vrcp.f32 %v1308_v5  ;;  %v1715_v5 = vld [vmem:[%s13735_s11 + $0x8] sm:$0xff] }
 0x926   :  { %v1305_v6 = vpop.xlane.xlu0 %1304 }
 0x927   :  { %12007 = vrcp.f32 %v1305_v6  ;;  %v1714_v6 = vld [vmem:[%s13735_s11] sm:$0xff] }
 0x92a   :  { %v1390_v9 = vpop.permute.xlu0 %1389 }
 0x92b   :  { %11429 = vmatpush3.msra.mxu0 %v1390_v9  ;;  %v10853_v9 = vld [vmem:[%s13736_s10] ss:$0 sm:$0xff] }
 0x92e   :  { %v1476_v21 = vpop.permute.xlu0 %1475 }
 0x92f   :  { %v1492_v25 = vsel %vm1491_vm3, %v1489_v22, %v1476_v21 }
 0x930   :  { %v12006_v10 = vpop.eup %12005 }
 0x931   :  { %v1312_v11 = vmul.f32 %v12006_v10, %v12002_v7 }
 0x933   :  { %11431 = vmatmul.mubr.msk.f32.vlgmr.msra.gmra.mxu0 %vm64_vm0, %v1312_v11 }
 0x934   :  { %v12008_v12 = vpop.eup %12007 }
 0x935   :  { %v1310_v13 = vmul.f32 %v12008_v12, %v12004_v0  ;;  %v12542_v0 = vld [vmem:[%s13734_s2] sm:$0xff] }
 0x937   :  { %11426 = vmatmul.mubr.msk.f32.vlgmr.msra.gmra.mxu1 %vm64_vm0, %v1310_v13  ;;  %v10863_v13 = vld [vmem:[%s13728_s4 + $0x1] ss:$0 sm:$0xff] }
 0x938   :  { %11434 = vmatpush3.msra.mxu1 %v58_v8 }
 0x939   :  { %11443 = vmatprep.subr.mxu1 %v1715_v5 }
 0x9f3   :  { %v1461_v14 = vpop.f32.mrf.mxu0 }
 0x9f4   :  { %1485 = vrot.lane.b32.xlu1 %v1461_v14, %s13744_s23 }
 0x9f5   :  { %v11432_v15 = vpop.f32.mrf.mxu0 }
 0x9f7   :  { %v1385_v16 = vpop.f32.mrf.mxu1 }
 0x9f8   :  { %1483 = vrot.lane.b32.xlu0 %v1385_v16, %s13744_s23  ;;  %s13777_s23 = smov 2  }
 0x9f9   :  { %v11427_v17 = vpop.f32.mrf.mxu1 }
 0xa66   :  { %v1486_v23 = vpop.permute.xlu1 %1485 }
 0xa67   :  { %v1496_v29 = vsel %vm1494_vm4, %v1493_v27, %v1486_v23 }
 0xa6a   :  { %v1484_v26 = vpop.permute.xlu0 %1483 }
 0xa6b   :  { %v1495_v28 = vsel %vm1494_vm4, %v1492_v25, %v1484_v26 }
 0xa6c   :  { %11435 = vmatprep.mubr.msk.f32.mxu1 %vm64_vm0, %v1495_v28 }
 0xa6d   :  { %11436 = vmatmul.mubr.msk.f32.vlgmr.msra.gmra.mxu1 %vm64_vm0, %v1496_v29 }
 0xa6e   :  { %11444 = vmatpush3.msra.mxu1 %v1715_v5 }
 0xa6f   :  { %11445 = vmatprep.subr.mxu1 %v1714_v6 }
 0xa70   :  { %11446 = vmatpush3.msra.mxu1 %v1714_v6 }
 0xa71   :  { %11455 = vmatprep.subr.mxu1 %v12229_v3 }
 0xb2d   :  { %v11437_v30 = vpop.f32.mrf.mxu1 }
 0xb2e   :  { %v1579_v31 = vadd.f32 %v11437_v30, %v10848_v39 }
 0xb2f   :  { %v1573_v41 = vpop.f32.mrf.mxu1 }
 0xb30   :  { %v1574_v32 = vadd.f32 %v10848_v39, %v1573_v41  ;;  %v1583_v33 = vadd.f32 %v1579_v31, %v12336_v2 }
 0xb32   :  { %v1589_v34 = vsel %vm64_vm0, %v1583_v33, 0.0  ;;  %v1582_v35 = vadd.f32 %v1574_v32, %v12331_v1  ;;  %v1625_v1 = vld [vmem:[%s13731_s9] sm:$0xff] }
 0xb33   :  { %1590 = vadd.xlane.f32.xlu1 %v1589_v34  ;;  %11438 = vmatprep.subr.mxu0 %v1625_v1 }
 0xb34   :  { %v1586_v36 = vsel %vm64_vm0, %v1582_v35, 0.0  ;;  %11439 = vmatpush3.msra.mxu0 %v1625_v1 }
 0xb35   :  { %1587 = vadd.xlane.f32.xlu0 %v1586_v36  ;;  %11450 = vmatprep.subr.mxu0 %v10861_v48 }
 0xbbc   :  { %v1591_v37 = vpop.xlane.xlu1 %1590 }
 0xbbd   :  { %v1594_v38 = vmul.f32 0.125, %v1591_v37 }
 0xbbe   :  { %v1588_v40 = vpop.xlane.xlu0 %1587 }
 0xbbf   :  { %v1593_v42 = vmul.f32 0.125, %v1588_v40  ;;  %v1596_v43 = vsub.f32 %v1583_v33, %v1594_v38 }
 0xbc1   :  { %v1595_v44 = vsub.f32 %v1582_v35, %v1593_v42  ;;  %v1598_v47 = vmul.f32 %v1596_v43, %v1596_v43 }
 0xbc3   :  { %v1597_v45 = vmul.f32 %v1595_v44, %v1595_v44  ;;  %v1602_v2 = vsel %vm64_vm0, %v1598_v47, 0.0 }
 0xbc5   :  { %v1599_v46 = vsel %vm64_vm0, %v1597_v45, 0.0 }
 0xbc6   :  { %1600 = vadd.xlane.f32.xlu0 %v1599_v46 }
 0xbca   :  { %1603 = vadd.xlane.f32.xlu0 %v1602_v2 }
 0xc4f   :  { %v1601_v49 = vpop.xlane.xlu0 %1600 }
 0xc50   :  { %v1605_v50 = vmul.f32 0.125, %v1601_v49 }
 0xc52   :  { %v1607_v51 = vadd.f32 1e-05, %v1605_v50 }
 0xc53   :  { %v1604_v52 = vpop.xlane.xlu0 %1603 }
 0xc54   :  { %12009 = vrsqrt.f32 %v1607_v51  ;;  %v1606_v53 = vmul.f32 0.125, %v1604_v52 }
 0xc56   :  { %v1608_v54 = vadd.f32 1e-05, %v1606_v53 }
 0xc58   :  { %12011 = vrsqrt.f32 %v1608_v54 }
 0xc61   :  { %v12010_v55 = vpop.eup %12009 }
 0xc62   :  { %v1611_v57 = vmul.f32 %v12010_v55, %v1595_v44 }
 0xc64   :  { %v1617_v59 = vmul.f32 %v10851_v56, %v1611_v57 }
 0xc65   :  { %v12012_v60 = vpop.eup %12011 }
 0xc66   :  { %v1612_v61 = vmul.f32 %v12012_v60, %v1596_v43  ;;  %v12533_v62 = vadd.f32 %v10852_v58, %v1617_v59 }
 0xc68   :  { %v1618_v7 = vmul.f32 %v10851_v56, %v1612_v61  ;;  %11440 = vmatprep.mubr.msk.f32.mxu0 %vm64_vm0, %v12533_v62 }
 0xc6a   :  { %v12537_v63 = vadd.f32 %v10852_v58, %v1618_v7 }
 0xc6c   :  { %11441 = vmatmul.mubr.msk.f32.vlgmr.msra.gmra.mxu0 %vm64_vm0, %v12537_v63 }
 0xc6d   :  { %11451 = vmatpush3.msra.mxu0 %v10861_v48  ;;  %11452 = vmatprep.mubr.msk.f32.mxu0 %vm64_vm0, %v12542_v0 }
 0xc6e   :  { %11460 = vmatprep.subr.mxu0 %v12229_v3 }
 0xc70   :  { %11453 = vmatmul.mubr.msk.f32.vlgmr.msra.gmra.mxu0 %vm64_vm0, %v12549_v4 }
 0xc71   :  { %11462 = vmatprep.mubr.msk.f32.mxu0 %vm12230_vm1, %v12229_v3 }
 0xd2c   :  { %v11442_v10 = vpop.f32.mrf.mxu0 }
 0xd2d   :  { %v1709_v11 = vadd.f32 %v11442_v10, %v10853_v9 }
 0xd2e   :  { %v1703_v12 = vpop.f32.mrf.mxu0 }
 0xd2f   :  { %v1704_v8 = vadd.f32 %v10853_v9, %v1703_v12  ;;  %v1713_v17 = vmax.f32 %v1709_v11, 0.0 }
 0xd30   :  { %v11454_v14 = vpop.f32.mrf.mxu0 }
 0xd31   :  { %v1712_v15 = vmax.f32 %v1704_v8, 0.0  ;;  %v12571_v16 = vadd.f32 %v11454_v14, %v10863_v13 }
 0xd32   :  { %v1927_v18 = vpop.f32.mrf.mxu0 }
 0xd33   :  { %v12573_v19 = vadd.f32 %v10863_v13, %v1927_v18  ;;  %2014 = vrot.lane.b32.xlu0 %v12571_v16, %s13768_s26  ;;  %11447 = vmatprep.mubr.msk.f32.mxu1 %vm1721_vm5, %v1712_v15 }
 0xd34   :  { %11448 = vmatmul.mubr.msk.f32.vlgmr.msra.gmra.mxu1 %vm1721_vm5, %v1713_v17 }
 0xd35   :  { %1937 = vrot.lane.b32.xlu1 %v12573_v19, %s13768_s26  ;;  %11457 = vmatprep.mubr.msk.f32.mxu1 %vm12230_vm1, %v12229_v3 }
 0xda5   :  { %v2015_v20 = vpop.permute.xlu0 %2014 }
 0xda6   :  { %11461 = vmatpush3.xpose.msk.msra.mxu0 %vm149_vm2, %v2015_v20 }
 0xda7   :  { %v1938_v21 = vpop.permute.xlu1 %1937  ;;  %11470 = vmatprep.subr.mxu0 %v12229_v3 }
 0xda8   :  { %11456 = vmatpush3.xpose.msk.msra.mxu1 %vm149_vm2, %v1938_v21 }
 0xda9   :  { %11463 = vmatmul.mubr.msk.f32.vlgmr.msra.gmra.mxu0 %vm149_vm2, %v12571_v16  ;;  %11465 = vmatprep.subr.mxu1 %v12229_v3 }
 0xdaa   :  { %11472 = vmatprep.mubr.msk.f32.mxu0 %vm12230_vm1, %v12229_v3 }
 0xdab   :  { %11458 = vmatmul.mubr.msk.f32.vlgmr.msra.gmra.mxu1 %vm149_vm2, %v12573_v19 }
 0xdac   :  { %11467 = vmatprep.mubr.msk.f32.mxu1 %vm12230_vm1, %v12229_v3 }
 0xdf4   :  { %v12595_v22 = vpop.f32.mrf.mxu1 }
 0xdf6   :  { %v12597_v23 = vpop.f32.mrf.mxu1 }
 0xe69   :  { %v2086_v24 = vpop.f32.mrf.mxu0 }
 0xe6a   :  { %v2093_v25 = vsel %vm64_vm0, %v2086_v24, -inf }
 0xe6b   :  { %2094 = vmax.xlane.f32.xlu0 %v2093_v25  ;;  %v2009_v26 = vpop.f32.mrf.mxu1  ;;  %v11464_v27 = vpop.f32.mrf.mxu0 }
 0xe6c   :  { %v2090_v28 = vsel %vm64_vm0, %v2009_v26, -inf }
 0xe6d   :  { %2091 = vmax.xlane.f32.xlu1 %v2090_v28  ;;  %v11459_v29 = vpop.f32.mrf.mxu1 }
 0xe7e   :  { %2112 = vrot.lane.b32.xlu1 %v12573_v19, %s13758_s27 }
 0xe81   :  { %2188 = vrot.lane.b32.xlu0 %v12571_v16, %s13758_s27  ;;  %s13787_s27 = smov 120  }
 0xe82   :  { %2266 = vrot.lane.b32.xlu1 %v12573_v19, %s13766_s29 }
 0xe86   :  { %2344 = vrot.lane.b32.xlu1 %v12571_v16, %s13766_s29 }
 0xef4   :  { %v2095_v39 = vpop.xlane.xlu0 %2094 }
 0xef5   :  { %v2097_v30 = vsub.f32 %v2086_v24, %v2095_v39 }
 0xef6   :  { %v2092_v31 = vpop.xlane.xlu1 %2091 }
 0xef7   :  { %v2100_v41 = vmul.f32 1.442695, %v2097_v30  ;;  %v2096_v32 = vsub.f32 %v2009_v26, %v2092_v31 }
 0xef8   :  { %v2189_v33 = vpop.permute.xlu0 %2188 }
 0xef9   :  { %12013 = vpow2.f32 %v2100_v41  ;;  %v2098_v34 = vmul.f32 1.442695, %v2096_v32  ;;  %11471 = vmatpush3.msra.mxu0 %v2189_v33 }
 0xefa   :  { %v2113_v35 = vpop.permute.xlu1 %2112  ;;  %11480 = vmatprep.subr.mxu0 %v12229_v3 }
 0xefb   :  { %12015 = vpow2.f32 %v2098_v34  ;;  %11466 = vmatpush3.msra.mxu1 %v2113_v35 }
 0xefc   :  { %11475 = vmatprep.subr.mxu1 %v12229_v3 }
 0xefe   :  { %v2267_v42 = vpop.permute.xlu1 %2266 }
 0xf02   :  { %v2345_v43 = vpop.permute.xlu1 %2344 }
 0xf06   :  { %v12014_v36 = vpop.eup %12013 }
 0xf07   :  { %v2105_v37 = vsel %vm64_vm0, %v12014_v36, 0.0 }
 0xf08   :  { %v12016_v38 = vpop.eup %12015  ;;  %2106 = vadd.xlane.f32.xlu0 %v2105_v37 }
 0xf09   :  { %v2102_v40 = vsel %vm64_vm0, %v12016_v38, 0.0 }
 0xf0a   :  { %2103 = vadd.xlane.f32.xlu1 %v2102_v40 }
 0xf1b   :  { %2342 = vrot.lane.b32.xlu1 %v12571_v16, %s13764_s28 }
 0xf1e   :  { %2264 = vrot.lane.b32.xlu0 %v12573_v19, %s13764_s28 }
 0xf91   :  { %v2107_v44 = vpop.xlane.xlu0 %2106 }
 0xf92   :  { %12017 = vrcp.f32 %v2107_v44 }
 0xf93   :  { %v2104_v45 = vpop.xlane.xlu1 %2103 }
 0xf94   :  { %12019 = vrcp.f32 %v2104_v45 }
 0xf95   :  { %v2265_v49 = vpop.permute.xlu0 %2264 }
 0xf97   :  { %v2343_v48 = vpop.permute.xlu1 %2342 }
 0xf9f   :  { %v12018_v46 = vpop.eup %12017 }
 0xfa0   :  { %v2111_v47 = vmul.f32 %v12018_v46, %v12014_v36 }
 0xfa1   :  { %v12020_v2 = vpop.eup %12019 }
 0xfa2   :  { %11473 = vmatmul.mubr.msk.f32.vlgmr.msra.gmra.mxu0 %vm64_vm0, %v2111_v47  ;;  %v2109_v1 = vmul.f32 %v12020_v2, %v12016_v38 }
 0xfa3   :  { %11481 = vmatpush3.xpose.msk.msra.mxu0 %vm149_vm2, %v2345_v43  ;;  %11482 = vmatprep.mubr.msk.f32.mxu0 %vm12230_vm1, %v12229_v3 }
 0xfa4   :  { %11468 = vmatmul.mubr.msk.f32.vlgmr.msra.gmra.mxu1 %vm64_vm0, %v2109_v1  ;;  %11490 = vmatprep.subr.mxu0 %v12229_v3 }
 0xfa5   :  { %11476 = vmatpush3.xpose.msk.msra.mxu1 %vm149_vm2, %v2267_v42  ;;  %11477 = vmatprep.mubr.msk.f32.mxu1 %vm12230_vm1, %v12229_v3 }
 0xfa6   :  { %11483 = vmatmul.mubr.msk.f32.vlgmr.msra.gmra.mxu0 %vm149_vm2, %v2343_v48  ;;  %11485 = vmatprep.subr.mxu1 %v12229_v3 }
 0xfa7   :  { %11492 = vmatprep.mubr.msk.f32.mxu0 %vm12230_vm1, %v12229_v3 }
 0xfa8   :  { %11478 = vmatmul.mubr.msk.f32.vlgmr.msra.gmra.mxu1 %vm149_vm2, %v2265_v49 }
 0xfa9   :  { %11487 = vmatprep.mubr.msk.f32.mxu1 %vm12230_vm1, %v12229_v3 }
0x1062   :  { %v12633_v50 = vpop.f32.mrf.mxu0 }
0x1064   :  { %v12635_v51 = vpop.f32.mrf.mxu1  ;;  %v11474_v52 = vpop.f32.mrf.mxu0 }
0x1066   :  { %v11469_v53 = vpop.f32.mrf.mxu1  ;;  %v2416_v54 = vpop.f32.mrf.mxu0 }
0x1067   :  { %v2423_v55 = vsel %vm64_vm0, %v2416_v54, -inf }
0x1068   :  { %2424 = vmax.xlane.f32.xlu1 %v2423_v55  ;;  %v2338_v56 = vpop.f32.mrf.mxu1  ;;  %v11484_v57 = vpop.f32.mrf.mxu0 }
0x1069   :  { %v2420_v58 = vsel %vm64_vm0, %v2338_v56, -inf }
0x106a   :  { %2421 = vmax.xlane.f32.xlu0 %v2420_v58  ;;  %v11479_v59 = vpop.f32.mrf.mxu1 }
0x1079   :  { %2442 = vrot.lane.b32.xlu1 %v12573_v19, %s13756_s30 }
0x107d   :  { %2596 = vrot.lane.b32.xlu1 %v12573_v19, %s13760_s16 }
0x1081   :  { %2674 = vrot.lane.b32.xlu1 %v12571_v16, %s13760_s16  ;;  %s13780_s16 = smov 124  }
0x1085   :  { %2672 = vrot.lane.b32.xlu1 %v12571_v16, %s13762_s17 }
0x10f1   :  { %v2425_v60 = vpop.xlane.xlu1 %2424 }
0x10f2   :  { %v2427_v61 = vsub.f32 %v2416_v54, %v2425_v60 }
0x10f3   :  { %v2422_v7 = vpop.xlane.xlu0 %2421 }
0x10f4   :  { %v2430_v5 = vmul.f32 1.442695, %v2427_v61  ;;  %v2426_v6 = vsub.f32 %v2338_v56, %v2422_v7 }
0x10f5   :  { %v2443_v9 = vpop.permute.xlu1 %2442 }
0x10f6   :  { %12021 = vpow2.f32 %v2430_v5  ;;  %v2428_v10 = vmul.f32 1.442695, %v2426_v6  ;;  %11486 = vmatpush3.msra.mxu1 %v2443_v9 }
0x10f7   :  { %11495 = vmatprep.subr.mxu1 %v12229_v3 }
0x10f8   :  { %12023 = vpow2.f32 %v2428_v10 }
0x10f9   :  { %v2597_v17 = vpop.permute.xlu1 %2596 }
0x10fd   :  { %v2675_v21 = vpop.permute.xlu1 %2674 }
0x1101   :  { %v2673_v27 = vpop.permute.xlu1 %2672 }
0x1103   :  { %v12022_v11 = vpop.eup %12021 }
0x1104   :  { %v2435_v12 = vsel %vm64_vm0, %v12022_v11, 0.0 }
0x1105   :  { %v12024_v13 = vpop.eup %12023  ;;  %2436 = vadd.xlane.f32.xlu0 %v2435_v12 }
0x1106   :  { %v2432_v8 = vsel %vm64_vm0, %v12024_v13, 0.0 }
0x1109   :  { %2433 = vadd.xlane.f32.xlu0 %v2432_v8 }
0x111f   :  { %2518 = vrot.lane.b32.xlu0 %v12571_v16, %s13756_s30  ;;  %s13783_s30 = smov 118  }
0x1123   :  { %2594 = vrot.lane.b32.xlu0 %v12573_v19, %s13762_s17  ;;  %s13781_s17 = smov 116  }
0x118e   :  { %v2437_v14 = vpop.xlane.xlu0 %2436 }
0x118f   :  { %12025 = vrcp.f32 %v2437_v14 }
0x1192   :  { %v2434_v15 = vpop.xlane.xlu0 %2433 }
0x1193   :  { %12027 = vrcp.f32 %v2434_v15 }
0x1196   :  { %v2519_v18 = vpop.permute.xlu0 %2518 }
0x1197   :  { %11491 = vmatpush3.msra.mxu0 %v2519_v18 }
0x1198   :  { %11500 = vmatprep.subr.mxu0 %v12229_v3 }
0x119a   :  { %v2595_v28 = vpop.permute.xlu0 %2594 }
0x119c   :  { %v12026_v20 = vpop.eup %12025 }
0x119d   :  { %v2441_v24 = vmul.f32 %v12026_v20, %v12022_v11 }
0x119f   :  { %11493 = vmatmul.mubr.msk.f32.vlgmr.msra.gmra.mxu0 %vm64_vm0, %v2441_v24 }
0x11a0   :  { %v12028_v25 = vpop.eup %12027  ;;  %11501 = vmatpush3.xpose.msk.msra.mxu0 %vm149_vm2, %v2675_v21  ;;  %11502 = vmatprep.mubr.msk.f32.mxu0 %vm12230_vm1, %v12229_v3 }
0x11a1   :  { %v2439_v26 = vmul.f32 %v12028_v25, %v12024_v13  ;;  %11510 = vmatprep.subr.mxu0 %v12229_v3 }
0x11a3   :  { %11488 = vmatmul.mubr.msk.f32.vlgmr.msra.gmra.mxu1 %vm64_vm0, %v2439_v26  ;;  %11503 = vmatmul.mubr.msk.f32.vlgmr.msra.gmra.mxu0 %vm149_vm2, %v2673_v27 }
0x11a4   :  { %11496 = vmatpush3.xpose.msk.msra.mxu1 %vm149_vm2, %v2597_v17  ;;  %11497 = vmatprep.mubr.msk.f32.mxu1 %vm12230_vm1, %v12229_v3 }
0x11a5   :  { %11505 = vmatprep.subr.mxu1 %v12229_v3  ;;  %11512 = vmatprep.mubr.msk.f32.mxu0 %vm12230_vm1, %v12229_v3 }
0x11a7   :  { %11498 = vmatmul.mubr.msk.f32.vlgmr.msra.gmra.mxu1 %vm149_vm2, %v2595_v28 }
0x11a8   :  { %11507 = vmatprep.mubr.msk.f32.mxu1 %vm12230_vm1, %v12229_v3 }
0x125f   :  { %v12671_v29 = vpop.f32.mrf.mxu0 }
0x1261   :  { %v11494_v39 = vpop.f32.mrf.mxu0 }
0x1263   :  { %v12673_v30 = vpop.f32.mrf.mxu1  ;;  %v2746_v31 = vpop.f32.mrf.mxu0 }
0x1264   :  { %v2753_v41 = vsel %vm64_vm0, %v2746_v31, -inf }
0x1265   :  { %2754 = vmax.xlane.f32.xlu1 %v2753_v41  ;;  %v11489_v32 = vpop.f32.mrf.mxu1  ;;  %v11504_v33 = vpop.f32.mrf.mxu0 }
0x1267   :  { %v2668_v34 = vpop.f32.mrf.mxu1 }
0x1268   :  { %v2750_v35 = vsel %vm64_vm0, %v2668_v34, -inf }
0x1269   :  { %2751 = vmax.xlane.f32.xlu0 %v2750_v35  ;;  %v11499_v36 = vpop.f32.mrf.mxu1 }
0x1276   :  { %2772 = vrot.lane.b32.xlu1 %v12573_v19, %s13754_s18 }
0x127a   :  { %2926 = vrot.lane.b32.xlu1 %v12573_v19, %s13774_s19 }
0x127e   :  { %3004 = vrot.lane.b32.xlu1 %v12571_v16, %s13774_s19 }
0x1282   :  { %3002 = vrot.lane.b32.xlu1 %v12571_v16, %s13775_s25 }
0x12ee   :  { %v2755_v37 = vpop.xlane.xlu1 %2754 }
0x12ef   :  { %v2757_v38 = vsub.f32 %v2746_v31, %v2755_v37  ;;  %v10856_v37 = vld [vmem:[%s13737_s12] ss:$0 sm:$0xff] }
0x12f1   :  { %v2760_v40 = vmul.f32 1.442695, %v2757_v38  ;;  %v1795_v38 = vadd.f32 %v10856_v37, %v12597_v23 }
0x12f2   :  { %v2773_v42 = vpop.permute.xlu1 %2772  ;;  %v2752_v43 = vpop.xlane.xlu0 %2751 }
0x12f3   :  { %12029 = vpow2.f32 %v2760_v40  ;;  %v2756_v44 = vsub.f32 %v2668_v34, %v2752_v43  ;;  %11506 = vmatpush3.msra.mxu1 %v2773_v42  ;;  %v1800_v40 = vadd.f32 %v12595_v22, %v10856_v37  ;;  %v1803_v42 = vadd.f32 %v1795_v38, %v12533_v62 }
0x12f4   :  { %11515 = vmatprep.subr.mxu1 %v12229_v3 }
0x12f5   :  { %v2758_v45 = vmul.f32 1.442695, %v2756_v44  ;;  %v1804_v43 = vadd.f32 %v1800_v40, %v12537_v63  ;;  %v1807_v44 = vsel %vm64_vm0, %v1803_v42, 0.0 }
0x12f6   :  { %v2927_v52 = vpop.permute.xlu1 %2926 }
0x12f7   :  { %12031 = vpow2.f32 %v2758_v45  ;;  %v1810_v45 = vsel %vm64_vm0, %v1804_v43, 0.0 }
0x12fa   :  { %v3005_v55 = vpop.permute.xlu1 %3004 }
0x12fe   :  { %v3003_v59 = vpop.permute.xlu1 %3002 }
0x1300   :  { %v12030_v46 = vpop.eup %12029 }
0x1301   :  { %v2765_v47 = vsel %vm64_vm0, %v12030_v46, 0.0 }
0x1302   :  { %2766 = vadd.xlane.f32.xlu0 %v2765_v47 }
0x1304   :  { %v12032_v2 = vpop.eup %12031 }
0x1305   :  { %v2762_v1 = vsel %vm64_vm0, %v12032_v2, 0.0 }
0x1306   :  { %2763 = vadd.xlane.f32.xlu0 %v2762_v1 }
0x131c   :  { %2848 = vrot.lane.b32.xlu0 %v12571_v16, %s13754_s18  ;;  %s13779_s18 = smov 6  }
0x1320   :  { %2924 = vrot.lane.b32.xlu0 %v12573_v19, %s13775_s25 }
0x138b   :  { %v2767_v48 = vpop.xlane.xlu0 %2766 }
0x138c   :  { %12033 = vrcp.f32 %v2767_v48 }
0x138f   :  { %v2764_v49 = vpop.xlane.xlu0 %2763 }
0x1390   :  { %12035 = vrcp.f32 %v2764_v49 }
0x1393   :  { %v2849_v53 = vpop.permute.xlu0 %2848 }
0x1394   :  { %11511 = vmatpush3.msra.mxu0 %v2849_v53 }
0x1395   :  { %11520 = vmatprep.subr.mxu0 %v12229_v3 }
0x1397   :  { %v2925_v60 = vpop.permute.xlu0 %2924 }
0x1399   :  { %v12034_v54 = vpop.eup %12033 }
0x139a   :  { %v2771_v56 = vmul.f32 %v12034_v54, %v12030_v46 }
0x139c   :  { %11513 = vmatmul.mubr.msk.f32.vlgmr.msra.gmra.mxu0 %vm64_vm0, %v2771_v56 }
0x139d   :  { %v12036_v57 = vpop.eup %12035  ;;  %11521 = vmatpush3.xpose.msk.msra.mxu0 %vm149_vm2, %v3005_v55  ;;  %11522 = vmatprep.mubr.msk.f32.mxu0 %vm12230_vm1, %v12229_v3 }
0x139e   :  { %v2769_v58 = vmul.f32 %v12036_v57, %v12032_v2  ;;  %11530 = vmatprep.subr.mxu0 %v12229_v3 }
0x13a0   :  { %11508 = vmatmul.mubr.msk.f32.vlgmr.msra.gmra.mxu1 %vm64_vm0, %v2769_v58  ;;  %11523 = vmatmul.mubr.msk.f32.vlgmr.msra.gmra.mxu0 %vm149_vm2, %v3003_v59  ;;  %v10890_v59 = vld [vmem:[%s13730_s6 + $0x1] ss:$0 sm:$0xff] }
0x13a1   :  { %11516 = vmatpush3.xpose.msk.msra.mxu1 %vm149_vm2, %v2927_v52  ;;  %11517 = vmatprep.mubr.msk.f32.mxu1 %vm12230_vm1, %v12229_v3 }
0x13a2   :  { %11525 = vmatprep.subr.mxu1 %v12229_v3  ;;  %11532 = vmatprep.mubr.msk.f32.mxu0 %vm12230_vm1, %v12229_v3 }
0x13a4   :  { %11518 = vmatmul.mubr.msk.f32.vlgmr.msra.gmra.mxu1 %vm149_vm2, %v2925_v60 }
0x13a5   :  { %11527 = vmatprep.mubr.msk.f32.mxu1 %vm12230_vm1, %v12229_v3 }
0x145c   :  { %v2920_v61 = vpop.f32.mrf.mxu0 }
0x145e   :  { %v11514_v7 = vpop.f32.mrf.mxu0 }
0x1460   :  { %v2844_v5 = vpop.f32.mrf.mxu1  ;;  %v3076_v6 = vpop.f32.mrf.mxu0 }
0x1461   :  { %v3083_v9 = vsel %vm64_vm0, %v3076_v6, -inf }
0x1462   :  { %3084 = vmax.xlane.f32.xlu1 %v3083_v9  ;;  %v11509_v10 = vpop.f32.mrf.mxu1  ;;  %v11524_v11 = vpop.f32.mrf.mxu0 }
0x1464   :  { %v2998_v12 = vpop.f32.mrf.mxu1 }
0x1465   :  { %v3080_v13 = vsel %vm64_vm0, %v2998_v12, -inf }
0x1466   :  { %3081 = vmax.xlane.f32.xlu0 %v3080_v13  ;;  %v11519_v8 = vpop.f32.mrf.mxu1 }
0x1473   :  { %3102 = vrot.lane.b32.xlu1 %v12573_v19, %s13776_s22 }
0x1477   :  { %3256 = vrot.lane.b32.xlu1 %v12673_v30, %s13777_s23 }
0x147b   :  { %3258 = vrot.lane.b32.xlu1 %v12671_v29, %s13777_s23 }
0x147f   :  { %3266 = vrot.lane.b32.xlu1 %v2920_v61, %s13778_s20 }
0x14eb   :  { %v3085_v14 = vpop.xlane.xlu1 %3084 }
0x14ec   :  { %v3087_v15 = vsub.f32 %v3076_v6, %v3085_v14 }
0x14ee   :  { %v3090_v17 = vmul.f32 1.442695, %v3087_v15 }
0x14ef   :  { %v3103_v18 = vpop.permute.xlu1 %3102  ;;  %v3082_v20 = vpop.xlane.xlu0 %3081 }
0x14f0   :  { %12037 = vpow2.f32 %v3090_v17  ;;  %v3086_v21 = vsub.f32 %v2998_v12, %v3082_v20  ;;  %11526 = vmatpush3.msra.mxu1 %v3103_v18 }
0x14f2   :  { %v3088_v24 = vmul.f32 1.442695, %v3086_v21  ;;  %v10860_v21 = vld [vmem:[%s13733_s8 + $0x1] ss:$0 sm:$0xff] }
0x14f3   :  { %v3257_v46 = vpop.permute.xlu1 %3256 }
0x14f4   :  { %12039 = vpow2.f32 %v3088_v24  ;;  %v3278_v48 = vsel %vm149_vm2, %v12635_v51, %v3257_v46 }
0x14f7   :  { %v3259_v47 = vpop.permute.xlu1 %3258 }
0x14f8   :  { %v3279_v22 = vsel %vm149_vm2, %v12633_v50, %v3259_v47 }
0x14fb   :  { %v3267_v2 = vpop.permute.xlu1 %3266 }
0x14fc   :  { %v3281_v49 = vsel %vm1491_vm3, %v3279_v22, %v3267_v2  ;;  %v10894_v22 = vld [vmem:[%s13733_s8 + $0x2] ss:$0 sm:$0xff] }
0x14fd   :  { %v12038_v25 = vpop.eup %12037 }
0x14fe   :  { %v3095_v19 = vsel %vm64_vm0, %v12038_v25, 0.0 }
0x14ff   :  { %3096 = vadd.xlane.f32.xlu0 %v3095_v19 }
0x1501   :  { %v12040_v26 = vpop.eup %12039 }
0x1502   :  { %v3092_v27 = vsel %vm64_vm0, %v12040_v26, 0.0 }
0x1503   :  { %3093 = vadd.xlane.f32.xlu0 %v3092_v27 }
0x1519   :  { %3178 = vrot.lane.b32.xlu0 %v12571_v16, %s13776_s22  ;;  %v10862_v16 = vld [vmem:[%s13729_s5 + $0x8] sm:$0xff] }
0x151a   :  { %11535 = vmatprep.subr.mxu1 %v10862_v16 }
0x151d   :  { %3264 = vrot.lane.b32.xlu0 %v2844_v5, %s13778_s20 }
0x1588   :  { %v3097_v28 = vpop.xlane.xlu0 %3096 }
0x1589   :  { %12041 = vrcp.f32 %v3097_v28 }
0x158c   :  { %v3094_v29 = vpop.xlane.xlu0 %3093 }
0x158d   :  { %12043 = vrcp.f32 %v3094_v29 }
0x1590   :  { %v3179_v39 = vpop.permute.xlu0 %3178 }
0x1591   :  { %11531 = vmatpush3.msra.mxu0 %v3179_v39 }
0x1594   :  { %v3265_v1 = vpop.permute.xlu0 %3264 }
0x1595   :  { %v3280_v62 = vsel %vm1491_vm3, %v3278_v48, %v3265_v1  ;;  %v10893_v48 = vld [vmem:[%s13732_s7 + $0x2] ss:$0 sm:$0xff] }
0x1596   :  { %v12042_v30 = vpop.eup %12041 }
0x1597   :  { %v3101_v31 = vmul.f32 %v12042_v30, %v12038_v25  ;;  %v10895_v25 = vld [vmem:[%s13726_s3 + $0x10] sm:$0xff] }
0x1598   :  { %11540 = vmatprep.subr.mxu0 %v10895_v25 }
0x1599   :  { %11533 = vmatmul.mubr.msk.f32.vlgmr.msra.gmra.mxu0 %vm64_vm0, %v3101_v31 }
0x159a   :  { %v12044_v41 = vpop.eup %12043  ;;  %11541 = vmatpush3.msra.mxu0 %v10895_v25 }
0x159b   :  { %v3099_v32 = vmul.f32 %v12044_v41, %v12040_v26  ;;  %11550 = vmatprep.subr.mxu0 %v12229_v3 }
0x159d   :  { %11528 = vmatmul.mubr.msk.f32.vlgmr.msra.gmra.mxu1 %vm64_vm0, %v3099_v32 }
0x159e   :  { %11536 = vmatpush3.msra.mxu1 %v10862_v16  ;;  %v10897_v16 = vld [vmem:[%s13728_s4 + $0x2] ss:$0 sm:$0xff] }
0x1659   :  { %v3250_v33 = vpop.f32.mrf.mxu0 }
0x165a   :  { %3274 = vrot.lane.b32.xlu1 %v3250_v33, %s13779_s18 }
0x165b   :  { %v11534_v34 = vpop.f32.mrf.mxu0 }
0x165d   :  { %v3174_v35 = vpop.f32.mrf.mxu1 }
0x165e   :  { %3272 = vrot.lane.b32.xlu0 %v3174_v35, %s13779_s18 }
0x165f   :  { %v11529_v36 = vpop.f32.mrf.mxu1 }
0x167d   :  { %1808 = vadd.xlane.f32.xlu0 %v1807_v44 }
0x167e   :  { %1811 = vadd.xlane.f32.xlu1 %v1810_v45 }
0x16cc   :  { %v3275_v23 = vpop.permute.xlu1 %3274 }
0x16cd   :  { %v3283_v53 = vsel %vm1494_vm4, %v3281_v49, %v3275_v23 }
0x16d0   :  { %v3273_v63 = vpop.permute.xlu0 %3272 }
0x16d1   :  { %v3282_v52 = vsel %vm1494_vm4, %v3280_v62, %v3273_v63 }
0x16d2   :  { %11537 = vmatprep.mubr.msk.f32.mxu1 %vm64_vm0, %v3282_v52 }
0x16d3   :  { %11538 = vmatmul.mubr.msk.f32.vlgmr.msra.gmra.mxu1 %vm64_vm0, %v3283_v53 }
0x1706   :  { %v1809_v54 = vpop.xlane.xlu0 %1808 }
0x1707   :  { %v1813_v55 = vmul.f32 0.125, %v1809_v54  ;;  %v1812_v50 = vpop.xlane.xlu1 %1811 }
0x1708   :  { %v1814_v61 = vmul.f32 0.125, %v1812_v50 }
0x1709   :  { %v1815_v51 = vsub.f32 %v1803_v42, %v1813_v55 }
0x170a   :  { %v1816_v11 = vsub.f32 %v1804_v43, %v1814_v61 }
0x170b   :  { %v1817_v56 = vmul.f32 %v1815_v51, %v1815_v51 }
0x170c   :  { %v1818_v15 = vmul.f32 %v1816_v11, %v1816_v11 }
0x170d   :  { %v1819_v57 = vsel %vm64_vm0, %v1817_v56, 0.0 }
0x170e   :  { %1820 = vadd.xlane.f32.xlu1 %v1819_v57  ;;  %v1822_v17 = vsel %vm64_vm0, %v1818_v15, 0.0 }
0x1793   :  { %v11539_v58 = vpop.f32.mrf.mxu1 }
0x1794   :  { %v3366_v7 = vadd.f32 %v11539_v58, %v10890_v59 }
0x1795   :  { %v3360_v60 = vpop.f32.mrf.mxu1 }
0x1796   :  { %v3361_v5 = vadd.f32 %v10890_v59, %v3360_v60  ;;  %v3370_v8 = vadd.f32 %v3366_v7, %v12549_v4 }
0x1797   :  { %v1821_v6 = vpop.xlane.xlu1 %1820 }
0x1798   :  { %v1825_v9 = vmul.f32 0.125, %v1821_v6  ;;  %v3369_v10 = vadd.f32 %v3361_v5, %v12542_v0  ;;  %v3376_v14 = vsel %vm64_vm0, %v3370_v8, 0.0  ;;  %v10859_v0 = vld [vmem:[%s13732_s7 + $0x1] ss:$0 sm:$0xff] }
0x179a   :  { %v1827_v12 = vadd.f32 1e-05, %v1825_v9  ;;  %v3373_v13 = vsel %vm64_vm0, %v3369_v10, 0.0 }
0x179b   :  { %3374 = vadd.xlane.f32.xlu0 %v3373_v13 }
0x179c   :  { %12045 = vrsqrt.f32 %v1827_v12 }
0x179f   :  { %3377 = vadd.xlane.f32.xlu0 %v3376_v14 }
0x17a3   :  { %1823 = vadd.xlane.f32.xlu0 %v1822_v17 }
0x17a9   :  { %v12046_v18 = vpop.eup %12045 }
0x17aa   :  { %v1831_v20 = vmul.f32 %v12046_v18, %v1815_v51 }
0x17ac   :  { %v1837_v4 = vmul.f32 %v10859_v0, %v1831_v20 }
0x17ae   :  { %v1843_v24 = vadd.f32 %v10860_v21, %v1837_v4 }
0x17b0   :  { %11547 = vmatprep.mubr.msk.f32.mxu1 %vm64_vm0, %v1843_v24 }
0x1824   :  { %v3375_v19 = vpop.xlane.xlu0 %3374 }
0x1825   :  { %v3379_v26 = vmul.f32 0.125, %v3375_v19 }
0x1827   :  { %v3381_v27 = vsub.f32 %v3369_v10, %v3379_v26 }
0x1828   :  { %v3378_v28 = vpop.xlane.xlu0 %3377 }
0x1829   :  { %v3380_v29 = vmul.f32 0.125, %v3378_v28  ;;  %v3383_v39 = vmul.f32 %v3381_v27, %v3381_v27 }
0x182b   :  { %v3382_v30 = vsub.f32 %v3370_v8, %v3380_v29  ;;  %v3385_v31 = vsel %vm64_vm0, %v3383_v39, 0.0 }
0x182c   :  { %3386 = vadd.xlane.f32.xlu1 %v3385_v31  ;;  %v1824_v33 = vpop.xlane.xlu0 %1823 }
0x182d   :  { %v3384_v41 = vmul.f32 %v3382_v30, %v3382_v30  ;;  %v1826_v34 = vmul.f32 0.125, %v1824_v33 }
0x182f   :  { %v3388_v32 = vsel %vm64_vm0, %v3384_v41, 0.0  ;;  %v1828_v35 = vadd.f32 1e-05, %v1826_v34 }
0x1830   :  { %3389 = vadd.xlane.f32.xlu0 %v3388_v32 }
0x1831   :  { %12047 = vrsqrt.f32 %v1828_v35 }
0x183d   :  { %3503 = vrot.lane.b32.xlu1 %v10895_v25, %s13768_s26 }
0x183e   :  { %v12048_v36 = vpop.eup %12047 }
0x183f   :  { %v1832_v37 = vmul.f32 %v12048_v36, %v1816_v11 }
0x1841   :  { %v1838_v42 = vmul.f32 %v10859_v0, %v1832_v37 }
0x1843   :  { %v1844_v47 = vadd.f32 %v10860_v21, %v1838_v42 }
0x1846   :  { %3507 = vrot.lane.b32.xlu0 %v10897_v16, %s13768_s26 }
0x18b5   :  { %v3387_v38 = vpop.xlane.xlu1 %3386 }
0x18b6   :  { %v3391_v40 = vmul.f32 0.125, %v3387_v38 }
0x18b8   :  { %v3393_v43 = vadd.f32 1e-05, %v3391_v40 }
0x18b9   :  { %v3504_v44 = vpop.permute.xlu1 %3503  ;;  %v3390_v45 = vpop.xlane.xlu0 %3389 }
0x18ba   :  { %12049 = vrsqrt.f32 %v3393_v43  ;;  %v3392_v46 = vmul.f32 0.125, %v3390_v45  ;;  %11545 = vmatprep.subr.mxu1 %v3504_v44 }
0x18bb   :  { %11546 = vmatpush3.msra.mxu1 %v3504_v44 }
0x18bc   :  { %v3394_v2 = vadd.f32 1e-05, %v3392_v46  ;;  %11548 = vmatmul.mubr.msk.f32.vlgmr.msra.gmra.mxu1 %vm64_vm0, %v1844_v47  ;;  %11555 = vmatprep.subr.mxu1 %v12229_v3 }
0x18bd   :  { %11557 = vmatprep.mubr.msk.f32.mxu1 %vm12230_vm1, %v12229_v3  ;;  %v3508_v55 = vpop.permute.xlu0 %3507 }
0x18be   :  { %12051 = vrsqrt.f32 %v3394_v2 }
0x18c7   :  { %v12050_v1 = vpop.eup %12049 }
0x18c8   :  { %v3397_v23 = vmul.f32 %v12050_v1, %v3381_v27 }
0x18ca   :  { %v3403_v62 = vmul.f32 %v10893_v48, %v3397_v23 }
0x18cb   :  { %v12052_v63 = vpop.eup %12051 }
0x18cc   :  { %v3398_v49 = vmul.f32 %v12052_v63, %v3382_v30  ;;  %v12786_v52 = vadd.f32 %v10894_v22, %v3403_v62 }
0x18ce   :  { %v3404_v53 = vmul.f32 %v10893_v48, %v3398_v49  ;;  %11542 = vmatprep.mubr.msk.f32.mxu0 %vm64_vm0, %v12786_v52 }
0x18d0   :  { %v12790_v54 = vadd.f32 %v10894_v22, %v3404_v53 }
0x18d2   :  { %11543 = vmatmul.mubr.msk.f32.vlgmr.msra.gmra.mxu0 %vm64_vm0, %v12790_v54 }
0x18d3   :  { %11552 = vmatprep.mubr.msk.f32.mxu0 %vm12230_vm1, %v12229_v3 }
0x197c   :  { %v11549_v51 = vpop.f32.mrf.mxu1 }
0x197d   :  { %v12796_v56 = vadd.f32 %v11549_v51, %v3508_v55 }
0x197e   :  { %v3582_v57 = vpop.f32.mrf.mxu1 }
0x197f   :  { %v12798_v50 = vadd.f32 %v3582_v57, %v3508_v55  ;;  %11556 = vmatpush3.xpose.msk.msra.mxu1 %vm149_vm2, %v12796_v56 }
0x1980   :  { %11565 = vmatprep.subr.mxu1 %v12229_v3 }
0x1981   :  { %11551 = vmatpush3.xpose.msk.msra.mxu0 %vm149_vm2, %v12798_v50 }
0x1982   :  { %11560 = vmatprep.subr.mxu0 %v12229_v3 }
0x1992   :  { %v11544_v58 = vpop.f32.mrf.mxu0 }
0x1993   :  { %v12806_v59 = vadd.f32 %v11544_v58, %v10897_v16 }
0x1994   :  { %v3493_v60 = vpop.f32.mrf.mxu0 }
0x1995   :  { %v12808_v61 = vadd.f32 %v10897_v16, %v3493_v60  ;;  %11558 = vmatmul.mubr.msk.f32.vlgmr.msra.gmra.mxu1 %vm149_vm2, %v12806_v59 }
0x1996   :  { %11567 = vmatprep.mubr.msk.f32.mxu1 %vm12230_vm1, %v12229_v3 }
0x1997   :  { %11553 = vmatmul.mubr.msk.f32.vlgmr.msra.gmra.mxu0 %vm149_vm2, %v12808_v61 }
0x1998   :  { %11562 = vmatprep.mubr.msk.f32.mxu0 %vm12230_vm1, %v12229_v3 }
0x1a55   :  { %v3739_v7 = vpop.f32.mrf.mxu1 }
0x1a56   :  { %v3746_v5 = vsel %vm64_vm0, %v3739_v7, -inf }
0x1a57   :  { %3747 = vmax.xlane.f32.xlu0 %v3746_v5  ;;  %v3663_v6 = vpop.f32.mrf.mxu0  ;;  %v11559_v9 = vpop.f32.mrf.mxu1 }
0x1a58   :  { %v3743_v10 = vsel %vm64_vm0, %v3663_v6, -inf }
0x1a59   :  { %3744 = vmax.xlane.f32.xlu1 %v3743_v10  ;;  %v11554_v11 = vpop.f32.mrf.mxu0 }
0x1a6a   :  { %3765 = vrot.lane.b32.xlu1 %v12798_v50, %s13768_s26 }
0x1a6d   :  { %3841 = vrot.lane.b32.xlu0 %v12796_v56, %s13768_s26 }
0x1a6e   :  { %3919 = vrot.lane.b32.xlu1 %v12798_v50, %s13764_s28 }
0x1a72   :  { %3997 = vrot.lane.b32.xlu1 %v12796_v56, %s13764_s28 }
0x1ae0   :  { %v3748_v12 = vpop.xlane.xlu0 %3747 }
0x1ae1   :  { %v3750_v13 = vsub.f32 %v3739_v7, %v3748_v12 }
0x1ae2   :  { %v3745_v8 = vpop.xlane.xlu1 %3744 }
0x1ae3   :  { %v3753_v14 = vmul.f32 1.442695, %v3750_v13  ;;  %v3749_v15 = vsub.f32 %v3663_v6, %v3745_v8 }
0x1ae4   :  { %v3842_v17 = vpop.permute.xlu0 %3841 }
0x1ae5   :  { %12053 = vpow2.f32 %v3753_v14  ;;  %v3751_v18 = vmul.f32 1.442695, %v3749_v15  ;;  %11566 = vmatpush3.msra.mxu1 %v3842_v17 }
0x1ae6   :  { %v3766_v0 = vpop.permute.xlu1 %3765  ;;  %11575 = vmatprep.subr.mxu1 %v12229_v3 }
0x1ae7   :  { %12055 = vpow2.f32 %v3751_v18  ;;  %11561 = vmatpush3.msra.mxu0 %v3766_v0 }
0x1ae8   :  { %11570 = vmatprep.subr.mxu0 %v12229_v3 }
0x1aea   :  { %v3920_v25 = vpop.permute.xlu1 %3919 }
0x1aee   :  { %v3998_v19 = vpop.permute.xlu1 %3997 }
0x1af2   :  { %v12054_v20 = vpop.eup %12053 }
0x1af3   :  { %v3758_v21 = vsel %vm64_vm0, %v12054_v20, 0.0 }
0x1af4   :  { %v12056_v4 = vpop.eup %12055  ;;  %3759 = vadd.xlane.f32.xlu0 %v3758_v21 }
0x1af5   :  { %v3755_v24 = vsel %vm64_vm0, %v12056_v4, 0.0 }
0x1af6   :  { %3756 = vadd.xlane.f32.xlu1 %v3755_v24 }
0x1b07   :  { %3995 = vrot.lane.b32.xlu1 %v12806_v59, %s13764_s28 }
0x1b0a   :  { %3917 = vrot.lane.b32.xlu0 %v12808_v61, %s13764_s28  ;;  %s13785_s28 = smov 110  }
0x1b7d   :  { %v3760_v26 = vpop.xlane.xlu0 %3759 }
0x1b7e   :  { %12057 = vrcp.f32 %v3760_v26 }
0x1b7f   :  { %v3757_v27 = vpop.xlane.xlu1 %3756 }
0x1b80   :  { %12059 = vrcp.f32 %v3757_v27 }
0x1b81   :  { %v3918_v41 = vpop.permute.xlu0 %3917 }
0x1b83   :  { %v3996_v31 = vpop.permute.xlu1 %3995 }
0x1b8b   :  { %v12058_v28 = vpop.eup %12057 }
0x1b8c   :  { %v3764_v29 = vmul.f32 %v12058_v28, %v12054_v20 }
0x1b8d   :  { %v12060_v39 = vpop.eup %12059 }
0x1b8e   :  { %11568 = vmatmul.mubr.msk.f32.vlgmr.msra.gmra.mxu1 %vm64_vm0, %v3764_v29  ;;  %v3762_v30 = vmul.f32 %v12060_v39, %v12056_v4 }
0x1b8f   :  { %11576 = vmatpush3.xpose.msk.msra.mxu1 %vm149_vm2, %v3998_v19  ;;  %11577 = vmatprep.mubr.msk.f32.mxu1 %vm12230_vm1, %v12229_v3 }
0x1b90   :  { %11563 = vmatmul.mubr.msk.f32.vlgmr.msra.gmra.mxu0 %vm64_vm0, %v3762_v30  ;;  %11585 = vmatprep.subr.mxu1 %v12229_v3 }
0x1b91   :  { %11571 = vmatpush3.xpose.msk.msra.mxu0 %vm149_vm2, %v3920_v25  ;;  %11572 = vmatprep.mubr.msk.f32.mxu0 %vm12230_vm1, %v12229_v3 }
0x1b92   :  { %11578 = vmatmul.mubr.msk.f32.vlgmr.msra.gmra.mxu1 %vm149_vm2, %v3996_v31  ;;  %11580 = vmatprep.subr.mxu0 %v12229_v3 }
0x1b93   :  { %11587 = vmatprep.mubr.msk.f32.mxu1 %vm12230_vm1, %v12229_v3 }
0x1b94   :  { %11573 = vmatmul.mubr.msk.f32.vlgmr.msra.gmra.mxu0 %vm149_vm2, %v3918_v41 }
0x1b95   :  { %11582 = vmatprep.mubr.msk.f32.mxu0 %vm12230_vm1, %v12229_v3 }
0x1c4e   :  { %v12852_v32 = vpop.f32.mrf.mxu1 }
0x1c50   :  { %v12854_v16 = vpop.f32.mrf.mxu0  ;;  %v11569_v33 = vpop.f32.mrf.mxu1 }
0x1c52   :  { %v11564_v34 = vpop.f32.mrf.mxu0  ;;  %v4069_v35 = vpop.f32.mrf.mxu1 }
0x1c53   :  { %v4076_v36 = vsel %vm64_vm0, %v4069_v35, -inf }
0x1c54   :  { %4077 = vmax.xlane.f32.xlu1 %v4076_v36  ;;  %v3991_v37 = vpop.f32.mrf.mxu0  ;;  %v11579_v38 = vpop.f32.mrf.mxu1 }
0x1c55   :  { %v4073_v40 = vsel %vm64_vm0, %v3991_v37, -inf }
0x1c56   :  { %4074 = vmax.xlane.f32.xlu0 %v4073_v40  ;;  %v11574_v42 = vpop.f32.mrf.mxu0 }
0x1c65   :  { %4095 = vrot.lane.b32.xlu1 %v12798_v50, %s13766_s29 }
0x1c69   :  { %4249 = vrot.lane.b32.xlu1 %v12798_v50, %s13780_s16 }
0x1c6d   :  { %4327 = vrot.lane.b32.xlu1 %v12796_v56, %s13780_s16 }
0x1c71   :  { %4325 = vrot.lane.b32.xlu1 %v12806_v59, %s13780_s16 }
0x1cdd   :  { %v4078_v43 = vpop.xlane.xlu1 %4077 }
0x1cde   :  { %v4080_v44 = vsub.f32 %v4069_v35, %v4078_v43 }
0x1cdf   :  { %v4075_v45 = vpop.xlane.xlu0 %4074 }
0x1ce0   :  { %v4083_v46 = vmul.f32 1.442695, %v4080_v44  ;;  %v4079_v47 = vsub.f32 %v3991_v37, %v4075_v45 }
0x1ce1   :  { %v4096_v2 = vpop.permute.xlu1 %4095 }
0x1ce2   :  { %12061 = vpow2.f32 %v4083_v46  ;;  %v4081_v1 = vmul.f32 1.442695, %v4079_v47  ;;  %11581 = vmatpush3.msra.mxu0 %v4096_v2 }
0x1ce3   :  { %11590 = vmatprep.subr.mxu0 %v12229_v3 }
0x1ce4   :  { %12063 = vpow2.f32 %v4081_v1 }
0x1ce5   :  { %v4250_v53 = vpop.permute.xlu1 %4249 }
0x1ce9   :  { %v4328_v57 = vpop.permute.xlu1 %4327 }
0x1ced   :  { %v4326_v5 = vpop.permute.xlu1 %4325 }
0x1cef   :  { %v12062_v48 = vpop.eup %12061 }
0x1cf0   :  { %v4088_v23 = vsel %vm64_vm0, %v12062_v48, 0.0 }
0x1cf1   :  { %v12064_v22 = vpop.eup %12063  ;;  %4089 = vadd.xlane.f32.xlu0 %v4088_v23 }
0x1cf2   :  { %v4085_v62 = vsel %vm64_vm0, %v12064_v22, 0.0 }
0x1cf5   :  { %4086 = vadd.xlane.f32.xlu0 %v4085_v62 }
0x1d0b   :  { %4171 = vrot.lane.b32.xlu0 %v12796_v56, %s13766_s29  ;;  %s13786_s29 = smov 108  }
0x1d0f   :  { %4247 = vrot.lane.b32.xlu0 %v12808_v61, %s13780_s16 }
0x1d7a   :  { %v4090_v63 = vpop.xlane.xlu0 %4089 }
0x1d7b   :  { %12065 = vrcp.f32 %v4090_v63 }
0x1d7e   :  { %v4087_v49 = vpop.xlane.xlu0 %4086 }
0x1d7f   :  { %12067 = vrcp.f32 %v4087_v49 }
0x1d82   :  { %v4172_v55 = vpop.permute.xlu0 %4171 }
0x1d83   :  { %11586 = vmatpush3.msra.mxu1 %v4172_v55 }
0x1d84   :  { %11595 = vmatprep.subr.mxu1 %v12229_v3 }
0x1d86   :  { %v4248_v6 = vpop.permute.xlu0 %4247 }
0x1d88   :  { %v12066_v51 = vpop.eup %12065 }
0x1d89   :  { %v4094_v58 = vmul.f32 %v12066_v51, %v12062_v48 }
0x1d8b   :  { %11588 = vmatmul.mubr.msk.f32.vlgmr.msra.gmra.mxu1 %vm64_vm0, %v4094_v58 }
0x1d8c   :  { %v12068_v60 = vpop.eup %12067  ;;  %11596 = vmatpush3.xpose.msk.msra.mxu1 %vm149_vm2, %v4328_v57  ;;  %11597 = vmatprep.mubr.msk.f32.mxu1 %vm12230_vm1, %v12229_v3 }
0x1d8d   :  { %v4092_v7 = vmul.f32 %v12068_v60, %v12064_v22  ;;  %11605 = vmatprep.subr.mxu1 %v12229_v3 }
0x1d8f   :  { %11583 = vmatmul.mubr.msk.f32.vlgmr.msra.gmra.mxu0 %vm64_vm0, %v4092_v7  ;;  %11598 = vmatmul.mubr.msk.f32.vlgmr.msra.gmra.mxu1 %vm149_vm2, %v4326_v5 }
0x1d90   :  { %11591 = vmatpush3.xpose.msk.msra.mxu0 %vm149_vm2, %v4250_v53  ;;  %11592 = vmatprep.mubr.msk.f32.mxu0 %vm12230_vm1, %v12229_v3 }
0x1d91   :  { %11600 = vmatprep.subr.mxu0 %v12229_v3  ;;  %11607 = vmatprep.mubr.msk.f32.mxu1 %vm12230_vm1, %v12229_v3 }
0x1d93   :  { %11593 = vmatmul.mubr.msk.f32.vlgmr.msra.gmra.mxu0 %vm149_vm2, %v4248_v6 }
0x1d94   :  { %11602 = vmatprep.mubr.msk.f32.mxu0 %vm12230_vm1, %v12229_v3 }
0x1e4b   :  { %v12890_v9 = vpop.f32.mrf.mxu1 }
0x1e4d   :  { %v11589_v10 = vpop.f32.mrf.mxu1 }
0x1e4f   :  { %v12892_v11 = vpop.f32.mrf.mxu0  ;;  %v4399_v12 = vpop.f32.mrf.mxu1 }
0x1e50   :  { %v4406_v13 = vsel %vm64_vm0, %v4399_v12, -inf }
0x1e51   :  { %4407 = vmax.xlane.f32.xlu1 %v4406_v13  ;;  %v11584_v8 = vpop.f32.mrf.mxu0  ;;  %v11599_v14 = vpop.f32.mrf.mxu1 }
0x1e53   :  { %v4321_v15 = vpop.f32.mrf.mxu0 }
0x1e54   :  { %v4403_v17 = vsel %vm64_vm0, %v4321_v15, -inf }
0x1e55   :  { %4404 = vmax.xlane.f32.xlu0 %v4403_v17  ;;  %v11594_v18 = vpop.f32.mrf.mxu0 }
0x1e62   :  { %4425 = vrot.lane.b32.xlu1 %v12798_v50, %s13781_s17 }
0x1e66   :  { %4579 = vrot.lane.b32.xlu1 %v12798_v50, %s13775_s25 }
0x1e6a   :  { %4657 = vrot.lane.b32.xlu1 %v12796_v56, %s13775_s25 }
0x1e6e   :  { %4655 = vrot.lane.b32.xlu1 %v12806_v59, %s13775_s25 }
0x1eda   :  { %v4408_v0 = vpop.xlane.xlu1 %4407 }
0x1edb   :  { %v4410_v20 = vsub.f32 %v4399_v12, %v4408_v0 }
0x1edd   :  { %v4413_v21 = vmul.f32 1.442695, %v4410_v20 }
0x1ede   :  { %v4426_v4 = vpop.permute.xlu1 %4425  ;;  %v4405_v24 = vpop.xlane.xlu0 %4404 }
0x1edf   :  { %12069 = vpow2.f32 %v4413_v21  ;;  %v4409_v25 = vsub.f32 %v4321_v15, %v4405_v24  ;;  %11601 = vmatpush3.msra.mxu0 %v4426_v4 }
0x1ee0   :  { %11610 = vmatprep.subr.mxu0 %v12229_v3 }
0x1ee1   :  { %v4411_v19 = vmul.f32 1.442695, %v4409_v25 }
0x1ee2   :  { %v4580_v30 = vpop.permute.xlu1 %4579 }
0x1ee3   :  { %12071 = vpow2.f32 %v4411_v19 }
0x1ee6   :  { %v4658_v33 = vpop.permute.xlu1 %4657 }
0x1eea   :  { %v4656_v36 = vpop.permute.xlu1 %4655 }
0x1eec   :  { %v12070_v26 = vpop.eup %12069 }
0x1eed   :  { %v4418_v27 = vsel %vm64_vm0, %v12070_v26, 0.0 }
0x1eee   :  { %4419 = vadd.xlane.f32.xlu0 %v4418_v27 }
0x1ef0   :  { %v12072_v28 = vpop.eup %12071 }
0x1ef1   :  { %v4415_v29 = vsel %vm64_vm0, %v12072_v28, 0.0 }
0x1ef2   :  { %4416 = vadd.xlane.f32.xlu0 %v4415_v29 }
0x1f08   :  { %4501 = vrot.lane.b32.xlu0 %v12796_v56, %s13781_s17 }
0x1f0c   :  { %4577 = vrot.lane.b32.xlu0 %v12808_v61, %s13775_s25 }
0x1f77   :  { %v4420_v59 = vpop.xlane.xlu0 %4419 }
0x1f78   :  { %12073 = vrcp.f32 %v4420_v59 }
0x1f7b   :  { %v4417_v39 = vpop.xlane.xlu0 %4416 }
0x1f7c   :  { %12075 = vrcp.f32 %v4417_v39 }
0x1f7f   :  { %v4502_v31 = vpop.permute.xlu0 %4501 }
0x1f80   :  { %11606 = vmatpush3.msra.mxu1 %v4502_v31 }
0x1f81   :  { %11615 = vmatprep.subr.mxu1 %v12229_v3 }
0x1f83   :  { %v4578_v37 = vpop.permute.xlu0 %4577 }
0x1f85   :  { %v12074_v41 = vpop.eup %12073 }
0x1f86   :  { %v4424_v34 = vmul.f32 %v12074_v41, %v12070_v26 }
0x1f88   :  { %11608 = vmatmul.mubr.msk.f32.vlgmr.msra.gmra.mxu1 %vm64_vm0, %v4424_v34 }
0x1f89   :  { %v12076_v35 = vpop.eup %12075  ;;  %11616 = vmatpush3.xpose.msk.msra.mxu1 %vm149_vm2, %v4658_v33  ;;  %11617 = vmatprep.mubr.msk.f32.mxu1 %vm12230_vm1, %v12229_v3 }
0x1f8a   :  { %v4422_v61 = vmul.f32 %v12076_v35, %v12072_v28  ;;  %11625 = vmatprep.subr.mxu1 %v12229_v3 }
0x1f8c   :  { %11603 = vmatmul.mubr.msk.f32.vlgmr.msra.gmra.mxu0 %vm64_vm0, %v4422_v61  ;;  %11618 = vmatmul.mubr.msk.f32.vlgmr.msra.gmra.mxu1 %vm149_vm2, %v4656_v36 }
0x1f8d   :  { %11611 = vmatpush3.xpose.msk.msra.mxu0 %vm149_vm2, %v4580_v30  ;;  %11612 = vmatprep.mubr.msk.f32.mxu0 %vm12230_vm1, %v12229_v3 }
0x1f8e   :  { %11620 = vmatprep.subr.mxu0 %v12229_v3  ;;  %11627 = vmatprep.mubr.msk.f32.mxu1 %vm12230_vm1, %v12229_v3 }
0x1f90   :  { %11613 = vmatmul.mubr.msk.f32.vlgmr.msra.gmra.mxu0 %vm149_vm2, %v4578_v37 }
0x1f91   :  { %11622 = vmatprep.mubr.msk.f32.mxu0 %vm12230_vm1, %v12229_v3 }
0x2048   :  { %v4573_v38 = vpop.f32.mrf.mxu1 }
0x204a   :  { %v11609_v40 = vpop.f32.mrf.mxu1 }
0x204c   :  { %v4497_v42 = vpop.f32.mrf.mxu0  ;;  %v4729_v43 = vpop.f32.mrf.mxu1 }
0x204d   :  { %v4736_v44 = vsel %vm64_vm0, %v4729_v43, -inf }
0x204e   :  { %4737 = vmax.xlane.f32.xlu1 %v4736_v44  ;;  %v11604_v45 = vpop.f32.mrf.mxu0  ;;  %v11619_v46 = vpop.f32.mrf.mxu1 }
0x2050   :  { %v4651_v47 = vpop.f32.mrf.mxu0 }
0x2051   :  { %v4733_v2 = vsel %vm64_vm0, %v4651_v47, -inf }
0x2052   :  { %4734 = vmax.xlane.f32.xlu0 %v4733_v2  ;;  %v11614_v1 = vpop.f32.mrf.mxu0 }
0x2053   :  { %v10929_v1 = vld [vmem:[%s13732_s7 + $0x3] ss:$0 sm:$0xff] }
0x205f   :  { %4755 = vrot.lane.b32.xlu1 %v12798_v50, %s13774_s19 }
0x2063   :  { %4909 = vrot.lane.b32.xlu1 %v12892_v11, %s13777_s23 }
0x2067   :  { %4911 = vrot.lane.b32.xlu1 %v12890_v9, %s13777_s23 }
0x206b   :  { %4919 = vrot.lane.b32.xlu1 %v4573_v38, %s13778_s20 }
0x20d7   :  { %v4738_v48 = vpop.xlane.xlu1 %4737 }
0x20d8   :  { %v4740_v23 = vsub.f32 %v4729_v43, %v4738_v48 }
0x20da   :  { %v4743_v22 = vmul.f32 1.442695, %v4740_v23  ;;  %v10930_v23 = vld [vmem:[%s13733_s8 + $0x3] ss:$0 sm:$0xff] }
0x20db   :  { %v4756_v62 = vpop.permute.xlu1 %4755  ;;  %v4735_v63 = vpop.xlane.xlu0 %4734 }
0x20dc   :  { %12077 = vpow2.f32 %v4743_v22  ;;  %v4739_v49 = vsub.f32 %v4651_v47, %v4735_v63  ;;  %11621 = vmatpush3.msra.mxu0 %v4756_v62 }
0x20de   :  { %v4741_v53 = vmul.f32 1.442695, %v4739_v49 }
0x20df   :  { %v4910_v14 = vpop.permute.xlu1 %4909 }
0x20e0   :  { %12079 = vpow2.f32 %v4741_v53  ;;  %v4931_v0 = vsel %vm149_vm2, %v12854_v16, %v4910_v14  ;;  %v10926_v16 = vld [vmem:[%s13730_s6 + $0x2] ss:$0 sm:$0xff] }
0x20e3   :  { %v4912_v15 = vpop.permute.xlu1 %4911 }
0x20e4   :  { %v4932_v21 = vsel %vm149_vm2, %v12852_v32, %v4912_v15 }
0x20e7   :  { %v4920_v17 = vpop.permute.xlu1 %4919 }
0x20e8   :  { %v4934_v25 = vsel %vm1491_vm3, %v4932_v21, %v4920_v17 }
0x20e9   :  { %v12078_v55 = vpop.eup %12077 }
0x20ea   :  { %v4748_v50 = vsel %vm64_vm0, %v12078_v55, 0.0 }
0x20eb   :  { %4749 = vadd.xlane.f32.xlu0 %v4748_v50  ;;  %v10936_v50 = vld [vmem:[%s13735_s11 + $0x18] sm:$0xff] }
0x20ed   :  { %v12080_v51 = vpop.eup %12079 }
0x20ee   :  { %v4745_v57 = vsel %vm64_vm0, %v12080_v51, 0.0 }
0x20ef   :  { %4746 = vadd.xlane.f32.xlu0 %v4745_v57  ;;  %v10932_v57 = vld [vmem:[%s13736_s10 + $0x1] ss:$0 sm:$0xff] }
0x2105   :  { %4831 = vrot.lane.b32.xlu0 %v12796_v56, %s13774_s19  ;;  %v10896_v56 = vld [vmem:[%s13729_s5 + $0x10] sm:$0xff] }
0x2106   :  { %11630 = vmatprep.subr.mxu0 %v10896_v56 }
0x2109   :  { %4917 = vrot.lane.b32.xlu0 %v4497_v42, %s13778_s20 }
0x2174   :  { %v4750_v58 = vpop.xlane.xlu0 %4749 }
0x2175   :  { %12081 = vrcp.f32 %v4750_v58 }
0x2178   :  { %v4747_v60 = vpop.xlane.xlu0 %4746 }
0x2179   :  { %12083 = vrcp.f32 %v4747_v60 }
0x217c   :  { %v4832_v7 = vpop.permute.xlu0 %4831 }
0x217d   :  { %11626 = vmatpush3.msra.mxu1 %v4832_v7 }
0x2180   :  { %v4918_v18 = vpop.permute.xlu0 %4917 }
0x2181   :  { %v4933_v4 = vsel %vm1491_vm3, %v4931_v0, %v4918_v18 }
0x2182   :  { %v12082_v5 = vpop.eup %12081 }
0x2183   :  { %v4754_v6 = vmul.f32 %v12082_v5, %v12078_v55 }
0x2185   :  { %11628 = vmatmul.mubr.msk.f32.vlgmr.msra.gmra.mxu1 %vm64_vm0, %v4754_v6 }
0x2186   :  { %v12084_v9 = vpop.eup %12083 }
0x2187   :  { %v4752_v10 = vmul.f32 %v12084_v9, %v12080_v51  ;;  %v10935_v51 = vld [vmem:[%s13735_s11 + $0x10] sm:$0xff] }
0x2189   :  { %11623 = vmatmul.mubr.msk.f32.vlgmr.msra.gmra.mxu0 %vm64_vm0, %v4752_v10  ;;  %v10937_v10 = vld [vmem:[%s13737_s12 + $0x1] ss:$0 sm:$0xff] }
0x218a   :  { %11631 = vmatpush3.msra.mxu0 %v10896_v56 }
0x218b   :  { %11640 = vmatprep.subr.mxu0 %v10936_v50 }
0x2245   :  { %v4903_v11 = vpop.f32.mrf.mxu1 }
0x2246   :  { %4927 = vrot.lane.b32.xlu1 %v4903_v11, %s13779_s18 }
0x2247   :  { %v11629_v12 = vpop.f32.mrf.mxu1 }
0x2249   :  { %v4827_v13 = vpop.f32.mrf.mxu0 }
0x224a   :  { %4925 = vrot.lane.b32.xlu0 %v4827_v13, %s13779_s18 }
0x224b   :  { %v11624_v8 = vpop.f32.mrf.mxu0 }
0x22b8   :  { %v4928_v20 = vpop.permute.xlu1 %4927 }
0x22b9   :  { %v4936_v26 = vsel %vm1494_vm4, %v4934_v25, %v4928_v20 }
0x22bc   :  { %v4926_v24 = vpop.permute.xlu0 %4925 }
0x22bd   :  { %v4935_v19 = vsel %vm1494_vm4, %v4933_v4, %v4926_v24 }
0x22be   :  { %11632 = vmatprep.mubr.msk.f32.mxu0 %vm64_vm0, %v4935_v19 }
0x22bf   :  { %11633 = vmatmul.mubr.msk.f32.vlgmr.msra.gmra.mxu0 %vm64_vm0, %v4936_v26 }
0x22c0   :  { %11641 = vmatpush3.msra.mxu0 %v10936_v50  ;;  %v50_v50 = vld [vmem:[%s13740_s0] sm:$0xff] }
0x22c1   :  { %11642 = vmatprep.subr.mxu0 %v10935_v51 }
0x22c2   :  { %11643 = vmatpush3.msra.mxu0 %v10935_v51 }
0x237f   :  { %v11634_v27 = vpop.f32.mrf.mxu0 }
0x2380   :  { %v5019_v28 = vadd.f32 %v11634_v27, %v10926_v16  ;;  %v5285_v27 = vld [vmem:[%s13738_s13] sm:$0xff] }
0x2381   :  { %v5013_v32 = vpop.f32.mrf.mxu0 }
0x2382   :  { %v5023_v29 = vadd.f32 %v5019_v28, %v12790_v54  ;;  %v5014_v59 = vadd.f32 %v10926_v16, %v5013_v32 }
0x2384   :  { %v5022_v39 = vadd.f32 %v5014_v59, %v12786_v52  ;;  %v5029_v30 = vsel %vm64_vm0, %v5023_v29, 0.0  ;;  %v10931_v52 = vld [vmem:[%s13731_s9 + $0x8] sm:$0xff] }
0x2385   :  { %5030 = vadd.xlane.f32.xlu1 %v5029_v30  ;;  %11635 = vmatprep.subr.mxu1 %v10931_v52 }
0x2386   :  { %v5026_v31 = vsel %vm64_vm0, %v5022_v39, 0.0  ;;  %11636 = vmatpush3.msra.mxu1 %v10931_v52 }
0x2387   :  { %5027 = vadd.xlane.f32.xlu0 %v5026_v31  ;;  %11647 = vmatprep.subr.mxu1 %v5285_v27 }
0x240e   :  { %v5031_v41 = vpop.xlane.xlu1 %5030 }
0x240f   :  { %v5033_v33 = vmul.f32 0.125, %v5031_v41  ;;  %v10940_v41 = vld [vmem:[%s13732_s7 + $0x4] ss:$0 sm:$0xff] }
0x2410   :  { %v5028_v34 = vpop.xlane.xlu0 %5027 }
0x2411   :  { %v5032_v35 = vmul.f32 0.125, %v5028_v34  ;;  %v5035_v61 = vsub.f32 %v5023_v29, %v5033_v33 }
0x2413   :  { %v5034_v36 = vsub.f32 %v5022_v39, %v5032_v35  ;;  %v5037_v40 = vmul.f32 %v5035_v61, %v5035_v61 }
0x2415   :  { %v5036_v37 = vmul.f32 %v5034_v36, %v5034_v36  ;;  %v5041_v54 = vsel %vm64_vm0, %v5037_v40, 0.0 }
0x2417   :  { %v5038_v38 = vsel %vm64_vm0, %v5036_v37, 0.0 }
0x2418   :  { %5039 = vadd.xlane.f32.xlu0 %v5038_v38 }
0x241c   :  { %5042 = vadd.xlane.f32.xlu0 %v5041_v54  ;;  %v5390_v54 = vlaneseq }
0x241e   :  { %v5391_v52 = vshrl.u32 %v5390_v54, 7 }
0x24a1   :  { %v5040_v42 = vpop.xlane.xlu0 %5039 }
0x24a2   :  { %v5044_v43 = vmul.f32 0.125, %v5040_v42  ;;  %v5393_v42 = vand.u32 127, %v5390_v54 }
0x24a4   :  { %v5046_v44 = vadd.f32 1e-05, %v5044_v43  ;;  %v5394_v43 = vadd.s32 4, %v5391_v52 }
0x24a5   :  { %v5043_v45 = vpop.xlane.xlu0 %5042 }
0x24a6   :  { %12085 = vrsqrt.f32 %v5046_v44  ;;  %v5045_v46 = vmul.f32 0.125, %v5043_v45  ;;  %vm5395_vm7 = vcmp.eq.s32.totalorder %v5393_v42, %v5394_v43  ;;  %v10942_v45 = vld [vmem:[%s13739_s14] ss:$0 sm:$0xff]  ;;  %s13788_s14 = sld [smem:[#allocation2_spill]] }
0x24a7   :  { %v10947_v44 = vsel %vm5395_vm7, 1.0, %v12229_v3 }
0x24a8   :  { %v5047_v47 = vadd.f32 1e-05, %v5045_v46  ;;  %11652 = vmatprep.subr.msk.mxu0 %vm5404_vm6, %v10947_v44 }
0x24aa   :  { %12087 = vrsqrt.f32 %v5047_v47 }
0x24b3   :  { %v12086_v2 = vpop.eup %12085 }
0x24b4   :  { %v5050_v48 = vmul.f32 %v12086_v2, %v5034_v36  ;;  %v10941_v36 = vld [vmem:[%s13733_s8 + $0x4] ss:$0 sm:$0xff] }
0x24b6   :  { %v5056_v22 = vmul.f32 %v10929_v1, %v5050_v48 }
0x24b7   :  { %v12088_v62 = vpop.eup %12087 }
0x24b8   :  { %v5051_v63 = vmul.f32 %v12088_v62, %v5035_v61  ;;  %v5062_v49 = vadd.f32 %v10930_v23, %v5056_v22 }
0x24ba   :  { %v5057_v53 = vmul.f32 %v10929_v1, %v5051_v63  ;;  %11637 = vmatprep.mubr.msk.f32.mxu1 %vm64_vm0, %v5062_v49 }
0x24bc   :  { %v5063_v55 = vadd.f32 %v10930_v23, %v5057_v53  ;;  %v51_v53 = vld [vmem:[%s13740_s0 + $0x8] sm:$0xff]  ;;  %s13784_s0 = smov 126  }
0x24be   :  { %11638 = vmatmul.mubr.msk.f32.vlgmr.msra.gmra.mxu1 %vm64_vm0, %v5063_v55 }
0x24bf   :  { %11648 = vmatpush3.msra.mxu1 %v5285_v27 }
0x257e   :  { %v11639_v58 = vpop.f32.mrf.mxu1 }
0x257f   :  { %v5149_v60 = vadd.f32 %v11639_v58, %v10932_v57 }
0x2580   :  { %v5143_v7 = vpop.f32.mrf.mxu1 }
0x2581   :  { %v5144_v5 = vadd.f32 %v10932_v57, %v5143_v7  ;;  %v5153_v9 = vmax.f32 %v5149_v60, 0.0 }
0x2583   :  { %v5152_v6 = vmax.f32 %v5144_v5, 0.0  ;;  %v5487_v5 = vld [vmem:[%s13726_s3] sm:$0xff] }
0x2584   :  { %11657 = vmatprep.subr.mxu1 %v5487_v5 }
0x2585   :  { %11644 = vmatprep.mubr.msk.f32.mxu0 %vm1721_vm5, %v5152_v6 }
0x2586   :  { %11645 = vmatmul.mubr.msk.f32.vlgmr.msra.gmra.mxu0 %vm1721_vm5, %v5153_v9 }
0x2587   :  { %11653 = vmatpush3.msk.msra.mxu0 %vm5404_vm6, %v10947_v44 }
0x2588   :  { %11662 = vmatprep.subr.mxu0 %v12229_v3 }
0x2646   :  { %v11646_v56 = vpop.f32.mrf.mxu0 }
0x2647   :  { %v5240_v11 = vadd.f32 %v11646_v56, %v10937_v10 }
0x2648   :  { %v5234_v12 = vpop.f32.mrf.mxu0 }
0x2649   :  { %v5244_v13 = vadd.f32 %v5240_v11, %v5063_v55  ;;  %v5235_v8 = vadd.f32 %v10937_v10, %v5234_v12  ;;  %v12225_v11 = vld [vmem:[%s13727_s1] sm:$0xff] }
0x264b   :  { %v5243_v14 = vadd.f32 %v5235_v8, %v5062_v49  ;;  %v5250_v15 = vsel %vm64_vm0, %v5244_v13, 0.0 }
0x264c   :  { %5251 = vadd.xlane.f32.xlu0 %v5250_v15 }
0x264d   :  { %v5247_v17 = vsel %vm64_vm0, %v5243_v14, 0.0 }
0x264e   :  { %5248 = vadd.xlane.f32.xlu1 %v5247_v17 }
0x26d5   :  { %v5252_v18 = vpop.xlane.xlu0 %5251 }
0x26d6   :  { %v5254_v0 = vmul.f32 0.125, %v5252_v18 }
0x26d7   :  { %v5249_v20 = vpop.xlane.xlu1 %5248 }
0x26d8   :  { %v5256_v21 = vsub.f32 %v5244_v13, %v5254_v0  ;;  %v5253_v4 = vmul.f32 0.125, %v5249_v20  ;;  %v12226_v13 = vld [vmem:[%s13727_s1 + $0x8] sm:$0xff]  ;;  %s13782_s1 = smov 112  }
0x26da   :  { %v5255_v24 = vsub.f32 %v5243_v14, %v5253_v4  ;;  %v5258_v25 = vmul.f32 %v5256_v21, %v5256_v21  ;;  %v10951_v14 = vld [vmem:[%s13728_s4] ss:$0 sm:$0xff] }
0x26dc   :  { %v5262_v19 = vsel %vm64_vm0, %v5258_v25, 0.0  ;;  %v5257_v26 = vmul.f32 %v5255_v24, %v5255_v24 }
0x26dd   :  { %5263 = vadd.xlane.f32.xlu0 %v5262_v19 }
0x26de   :  { %v5259_v16 = vsel %vm64_vm0, %v5257_v26, 0.0 }
0x26df   :  { %5260 = vadd.xlane.f32.xlu1 %v5259_v16 }
0x2766   :  { %v5264_v28 = vpop.xlane.xlu0 %5263 }
0x2767   :  { %v5266_v32 = vmul.f32 0.125, %v5264_v28 }
0x2768   :  { %v5261_v29 = vpop.xlane.xlu1 %5260 }
0x2769   :  { %v5268_v59 = vadd.f32 1e-05, %v5266_v32  ;;  %v5265_v39 = vmul.f32 0.125, %v5261_v29 }
0x276b   :  { %12089 = vrsqrt.f32 %v5268_v59  ;;  %v5267_v30 = vadd.f32 1e-05, %v5265_v39 }
0x276d   :  { %12091 = vrsqrt.f32 %v5267_v30 }
0x2778   :  { %v12090_v31 = vpop.eup %12089 }
0x2779   :  { %v5272_v33 = vmul.f32 %v12090_v31, %v5256_v21 }
0x277a   :  { %v12092_v34 = vpop.eup %12091 }
0x277b   :  { %v5271_v35 = vmul.f32 %v12092_v34, %v5255_v24  ;;  %v5278_v61 = vmul.f32 %v10940_v41, %v5272_v33 }
0x277d   :  { %v5277_v37 = vmul.f32 %v10940_v41, %v5271_v35  ;;  %v5284_v40 = vadd.f32 %v10941_v36, %v5278_v61 }
0x277f   :  { %v5283_v38 = vadd.f32 %v10941_v36, %v5277_v37 }
0x2781   :  { %11649 = vmatprep.mubr.msk.f32.mxu1 %vm64_vm0, %v5283_v38 }
0x2782   :  { %11650 = vmatmul.mubr.msk.f32.vlgmr.msra.gmra.mxu1 %vm64_vm0, %v5284_v40 }
0x2783   :  { %11658 = vmatpush3.msra.mxu1 %v5487_v5 }
0x2784   :  { %11667 = vmatprep.subr.mxu1 %v12229_v3 }
0x2842   :  { %v11651_v46 = vpop.f32.mrf.mxu1 }
0x2843   :  { %v5371_v47 = vadd.f32 %v11651_v46, %v10942_v45 }
0x2844   :  { %v5365_v2 = vpop.f32.mrf.mxu1 }
0x2845   :  { %v10946_v1 = vmul.f32 -1.442695, %v5371_v47  ;;  %v5366_v48 = vadd.f32 %v10942_v45, %v5365_v2 }
0x2847   :  { %12093 = vpow2.f32 %v10946_v1  ;;  %v10945_v23 = vmul.f32 -1.442695, %v5366_v48 }
0x2849   :  { %12095 = vpow2.f32 %v10945_v23 }
0x2854   :  { %v12094_v22 = vpop.eup %12093 }
0x2855   :  { %v5381_v62 = vadd.f32 1.0, %v12094_v22 }
0x2856   :  { %v12096_v63 = vpop.eup %12095 }
0x2857   :  { %12097 = vrcp.f32 %v5381_v62  ;;  %v5380_v49 = vadd.f32 1.0, %v12096_v63 }
0x2859   :  { %12099 = vrcp.f32 %v5380_v49 }
0x2864   :  { %v13016_v55 = vpop.eup %12097 }
0x2865   :  { %v5387_v57 = vsub.f32 %v13016_v55, %v51_v53 }
0x2866   :  { %v13021_v51 = vpop.eup %12099 }
0x2867   :  { %v5386_v58 = vsub.f32 %v13021_v51, %v50_v50  ;;  %v5389_v7 = vmul.f32 %v5387_v57, %v5387_v57 }
0x2869   :  { %v5388_v60 = vmul.f32 %v5386_v58, %v5386_v58 }
0x286b   :  { %11654 = vmatprep.mubr.msk.f32.mxu0 %vm1491_vm3, %v5388_v60 }
0x286c   :  { %11655 = vmatmul.mubr.msk.f32.vlgmr.msra.gmra.mxu0 %vm1491_vm3, %v5389_v7 }
0x286d   :  { %11664 = vmatprep.mubr.msk.f32.mxu0 %vm12230_vm1, %v12229_v3 }
0x292c   :  { %v11656_v6 = vpop.f32.mrf.mxu0 }
0x292d   :  { %v5484_v9 = vmul.f32 2.0, %v11656_v6 }
0x292e   :  { %v5474_v10 = vpop.f32.mrf.mxu0 }
0x292f   :  { %v5483_v56 = vmul.f32 2.0, %v5474_v10  ;;  %v13041_v8 = vadd.f32 %v12226_v13, %v5484_v9 }
0x2931   :  { %v13036_v12 = vadd.f32 %v12225_v11, %v5483_v56 }
0x2933   :  { %11659 = vmatprep.mubr.msk.f32.mxu1 %vm64_vm0, %v13036_v12 }
0x2934   :  { %11660 = vmatmul.mubr.msk.f32.vlgmr.msra.gmra.mxu1 %vm64_vm0, %v13041_v8 }
0x2935   :  { %11669 = vmatprep.mubr.msk.f32.mxu1 %vm12230_vm1, %v12229_v3 }
0x29f4   :  { %v11661_v15 = vpop.f32.mrf.mxu1 }
0x29f5   :  { %v13052_v17 = vadd.f32 %v11661_v15, %v10951_v14 }
0x29f6   :  { %v5567_v18 = vpop.f32.mrf.mxu1 }
0x29f7   :  { %v13054_v0 = vadd.f32 %v10951_v14, %v5567_v18  ;;  %5654 = vrot.lane.b32.xlu0 %v13052_v17, %s13768_s26 }
0x29f9   :  { %5577 = vrot.lane.b32.xlu1 %v13054_v0, %s13768_s26 }
0x2a69   :  { %v5655_v20 = vpop.permute.xlu0 %5654 }
0x2a6a   :  { %11668 = vmatpush3.xpose.msk.msra.mxu1 %vm149_vm2, %v5655_v20 }
0x2a6b   :  { %v5578_v21 = vpop.permute.xlu1 %5577  ;;  %11677 = vmatprep.subr.mxu1 %v12229_v3 }
0x2a6c   :  { %11663 = vmatpush3.xpose.msk.msra.mxu0 %vm149_vm2, %v5578_v21 }
0x2a6d   :  { %11670 = vmatmul.mubr.msk.f32.vlgmr.msra.gmra.mxu1 %vm149_vm2, %v13052_v17  ;;  %11672 = vmatprep.subr.mxu0 %v12229_v3 }
0x2a6e   :  { %11679 = vmatprep.mubr.msk.f32.mxu1 %vm12230_vm1, %v12229_v3 }
0x2a6f   :  { %11665 = vmatmul.mubr.msk.f32.vlgmr.msra.gmra.mxu0 %vm149_vm2, %v13054_v0 }
0x2a70   :  { %11674 = vmatprep.mubr.msk.f32.mxu0 %vm12230_vm1, %v12229_v3 }
0x2b2d   :  { %v5726_v4 = vpop.f32.mrf.mxu1 }
0x2b2e   :  { %v5733_v24 = vsel %vm64_vm0, %v5726_v4, -inf }
0x2b2f   :  { %5734 = vmax.xlane.f32.xlu0 %v5733_v24  ;;  %v5649_v25 = vpop.f32.mrf.mxu0  ;;  %v11671_v19 = vpop.f32.mrf.mxu1 }
0x2b30   :  { %v5730_v26 = vsel %vm64_vm0, %v5649_v25, -inf }
0x2b31   :  { %5731 = vmax.xlane.f32.xlu1 %v5730_v26  ;;  %v11666_v16 = vpop.f32.mrf.mxu0 }
0x2b42   :  { %5752 = vrot.lane.b32.xlu1 %v13054_v0, %s13782_s1 }
0x2b45   :  { %5828 = vrot.lane.b32.xlu0 %v13052_v17, %s13782_s1 }
0x2b46   :  { %5906 = vrot.lane.b32.xlu1 %v13054_v0, %s13783_s30 }
0x2b4a   :  { %5984 = vrot.lane.b32.xlu1 %v13052_v17, %s13783_s30 }
0x2bb8   :  { %v5735_v27 = vpop.xlane.xlu0 %5734 }
0x2bb9   :  { %v5737_v28 = vsub.f32 %v5726_v4, %v5735_v27 }
0x2bba   :  { %v5732_v32 = vpop.xlane.xlu1 %5731 }
0x2bbb   :  { %v5740_v29 = vmul.f32 1.442695, %v5737_v28  ;;  %v5736_v59 = vsub.f32 %v5649_v25, %v5732_v32 }
0x2bbc   :  { %v5829_v39 = vpop.permute.xlu0 %5828 }
0x2bbd   :  { %12101 = vpow2.f32 %v5740_v29  ;;  %v5738_v30 = vmul.f32 1.442695, %v5736_v59  ;;  %11678 = vmatpush3.msra.mxu1 %v5829_v39 }
0x2bbe   :  { %v5753_v31 = vpop.permute.xlu1 %5752  ;;  %11687 = vmatprep.subr.mxu1 %v12229_v3 }
0x2bbf   :  { %12103 = vpow2.f32 %v5738_v30  ;;  %11673 = vmatpush3.msra.mxu0 %v5753_v31 }
0x2bc0   :  { %11682 = vmatprep.subr.mxu0 %v12229_v3 }
0x2bc2   :  { %v5907_v61 = vpop.permute.xlu1 %5906 }
0x2bc6   :  { %v5985_v36 = vpop.permute.xlu1 %5984 }
0x2bca   :  { %v12102_v41 = vpop.eup %12101 }
0x2bcb   :  { %v5745_v33 = vsel %vm64_vm0, %v12102_v41, 0.0 }
0x2bcc   :  { %v12104_v34 = vpop.eup %12103  ;;  %5746 = vadd.xlane.f32.xlu0 %v5745_v33 }
0x2bcd   :  { %v5742_v35 = vsel %vm64_vm0, %v12104_v34, 0.0 }
0x2bce   :  { %5743 = vadd.xlane.f32.xlu1 %v5742_v35 }
0x2bdf   :  { %5982 = vrot.lane.b32.xlu1 %v13052_v17, %s13784_s0 }
0x2be2   :  { %5904 = vrot.lane.b32.xlu0 %v13054_v0, %s13784_s0 }
0x2c55   :  { %v5747_v37 = vpop.xlane.xlu0 %5746 }
0x2c56   :  { %12105 = vrcp.f32 %v5747_v37 }
0x2c57   :  { %v5744_v38 = vpop.xlane.xlu1 %5743 }
0x2c58   :  { %12107 = vrcp.f32 %v5744_v38 }
0x2c59   :  { %v5905_v44 = vpop.permute.xlu0 %5904 }
0x2c5b   :  { %v5983_v43 = vpop.permute.xlu1 %5982 }
0x2c63   :  { %v12106_v40 = vpop.eup %12105 }
0x2c64   :  { %v5751_v54 = vmul.f32 %v12106_v40, %v12102_v41 }
0x2c65   :  { %v12108_v52 = vpop.eup %12107 }
0x2c66   :  { %11680 = vmatmul.mubr.msk.f32.vlgmr.msra.gmra.mxu1 %vm64_vm0, %v5751_v54  ;;  %v5749_v42 = vmul.f32 %v12108_v52, %v12104_v34 }
0x2c67   :  { %11688 = vmatpush3.xpose.msk.msra.mxu1 %vm149_vm2, %v5985_v36  ;;  %11689 = vmatprep.mubr.msk.f32.mxu1 %vm12230_vm1, %v12229_v3 }
0x2c68   :  { %11675 = vmatmul.mubr.msk.f32.vlgmr.msra.gmra.mxu0 %vm64_vm0, %v5749_v42  ;;  %11697 = vmatprep.subr.mxu1 %v12229_v3 }
0x2c69   :  { %11683 = vmatpush3.xpose.msk.msra.mxu0 %vm149_vm2, %v5907_v61  ;;  %11684 = vmatprep.mubr.msk.f32.mxu0 %vm12230_vm1, %v12229_v3 }
0x2c6a   :  { %11690 = vmatmul.mubr.msk.f32.vlgmr.msra.gmra.mxu1 %vm149_vm2, %v5983_v43  ;;  %11692 = vmatprep.subr.mxu0 %v12229_v3 }
0x2c6b   :  { %11699 = vmatprep.mubr.msk.f32.mxu1 %vm12230_vm1, %v12229_v3 }
0x2c6c   :  { %11685 = vmatmul.mubr.msk.f32.vlgmr.msra.gmra.mxu0 %vm149_vm2, %v5905_v44 }
0x2c6d   :  { %11694 = vmatprep.mubr.msk.f32.mxu0 %vm12230_vm1, %v12229_v3 }
0x2d26   :  { %v13106_v45 = vpop.f32.mrf.mxu1 }
0x2d28   :  { %v13108_v46 = vpop.f32.mrf.mxu0  ;;  %v11681_v47 = vpop.f32.mrf.mxu1 }
0x2d2a   :  { %v11676_v2 = vpop.f32.mrf.mxu0  ;;  %v6056_v1 = vpop.f32.mrf.mxu1 }
0x2d2b   :  { %v6063_v48 = vsel %vm64_vm0, %v6056_v1, -inf }
0x2d2c   :  { %6064 = vmax.xlane.f32.xlu1 %v6063_v48  ;;  %v5978_v23 = vpop.f32.mrf.mxu0  ;;  %v11691_v22 = vpop.f32.mrf.mxu1 }
0x2d2d   :  { %v6060_v62 = vsel %vm64_vm0, %v5978_v23, -inf }
0x2d2e   :  { %6061 = vmax.xlane.f32.xlu0 %v6060_v62  ;;  %v11686_v63 = vpop.f32.mrf.mxu0 }
0x2d3d   :  { %6082 = vrot.lane.b32.xlu1 %v13054_v0, %s13785_s28 }
0x2d41   :  { %6236 = vrot.lane.b32.xlu1 %v13054_v0, %s13781_s17 }
0x2d45   :  { %6314 = vrot.lane.b32.xlu1 %v13052_v17, %s13781_s17 }
0x2d49   :  { %6312 = vrot.lane.b32.xlu1 %v13052_v17, %s13780_s16 }
0x2db5   :  { %v6065_v49 = vpop.xlane.xlu1 %6064 }
0x2db6   :  { %v6067_v53 = vsub.f32 %v6056_v1, %v6065_v49 }
0x2db7   :  { %v6062_v50 = vpop.xlane.xlu0 %6061 }
0x2db8   :  { %v6070_v57 = vmul.f32 1.442695, %v6067_v53  ;;  %v6066_v58 = vsub.f32 %v5978_v23, %v6062_v50 }
0x2db9   :  { %v6083_v60 = vpop.permute.xlu1 %6082 }
0x2dba   :  { %12109 = vpow2.f32 %v6070_v57  ;;  %v6068_v7 = vmul.f32 1.442695, %v6066_v58  ;;  %11693 = vmatpush3.msra.mxu0 %v6083_v60 }
0x2dbb   :  { %11702 = vmatprep.subr.mxu0 %v12229_v3 }
0x2dbc   :  { %12111 = vpow2.f32 %v6068_v7 }
0x2dbd   :  { %v6237_v13 = vpop.permute.xlu1 %6236 }
0x2dc1   :  { %v6315_v18 = vpop.permute.xlu1 %6314 }
0x2dc5   :  { %v6313_v24 = vpop.permute.xlu1 %6312 }
0x2dc7   :  { %v12110_v5 = vpop.eup %12109 }
0x2dc8   :  { %v6075_v6 = vsel %vm64_vm0, %v12110_v5, 0.0 }
0x2dc9   :  { %v12112_v9 = vpop.eup %12111  ;;  %6076 = vadd.xlane.f32.xlu0 %v6075_v6 }
0x2dca   :  { %v6072_v10 = vsel %vm64_vm0, %v12112_v9, 0.0 }
0x2dcd   :  { %6073 = vadd.xlane.f32.xlu0 %v6072_v10 }
0x2de3   :  { %6158 = vrot.lane.b32.xlu0 %v13052_v17, %s13785_s28 }
0x2de7   :  { %6234 = vrot.lane.b32.xlu0 %v13054_v0, %s13780_s16 }
0x2e52   :  { %v6077_v56 = vpop.xlane.xlu0 %6076 }
0x2e53   :  { %12113 = vrcp.f32 %v6077_v56 }
0x2e56   :  { %v6074_v11 = vpop.xlane.xlu0 %6073 }
0x2e57   :  { %12115 = vrcp.f32 %v6074_v11 }
0x2e5a   :  { %v6159_v14 = vpop.permute.xlu0 %6158 }
0x2e5b   :  { %11698 = vmatpush3.msra.mxu1 %v6159_v14 }
0x2e5c   :  { %11707 = vmatprep.subr.mxu1 %v12229_v3 }
0x2e5e   :  { %v6235_v25 = vpop.permute.xlu0 %6234 }
0x2e60   :  { %v12114_v15 = vpop.eup %12113 }
0x2e61   :  { %v6081_v20 = vmul.f32 %v12114_v15, %v12110_v5 }
0x2e63   :  { %11700 = vmatmul.mubr.msk.f32.vlgmr.msra.gmra.mxu1 %vm64_vm0, %v6081_v20 }
0x2e64   :  { %v12116_v21 = vpop.eup %12115  ;;  %11708 = vmatpush3.xpose.msk.msra.mxu1 %vm149_vm2, %v6315_v18  ;;  %11709 = vmatprep.mubr.msk.f32.mxu1 %vm12230_vm1, %v12229_v3 }
0x2e65   :  { %v6079_v4 = vmul.f32 %v12116_v21, %v12112_v9  ;;  %11717 = vmatprep.subr.mxu1 %v12229_v3 }
0x2e67   :  { %11695 = vmatmul.mubr.msk.f32.vlgmr.msra.gmra.mxu0 %vm64_vm0, %v6079_v4  ;;  %11710 = vmatmul.mubr.msk.f32.vlgmr.msra.gmra.mxu1 %vm149_vm2, %v6313_v24 }
0x2e68   :  { %11703 = vmatpush3.xpose.msk.msra.mxu0 %vm149_vm2, %v6237_v13  ;;  %11704 = vmatprep.mubr.msk.f32.mxu0 %vm12230_vm1, %v12229_v3 }
0x2e69   :  { %11712 = vmatprep.subr.mxu0 %v12229_v3  ;;  %11719 = vmatprep.mubr.msk.f32.mxu1 %vm12230_vm1, %v12229_v3 }
0x2e6b   :  { %11705 = vmatmul.mubr.msk.f32.vlgmr.msra.gmra.mxu0 %vm149_vm2, %v6235_v25 }
0x2e6c   :  { %11714 = vmatprep.mubr.msk.f32.mxu0 %vm12230_vm1, %v12229_v3 }
0x2f23   :  { %v13144_v19 = vpop.f32.mrf.mxu1 }
0x2f25   :  { %v11701_v26 = vpop.f32.mrf.mxu1 }
0x2f27   :  { %v13146_v16 = vpop.f32.mrf.mxu0  ;;  %v6386_v27 = vpop.f32.mrf.mxu1 }
0x2f28   :  { %v6393_v28 = vsel %vm64_vm0, %v6386_v27, -inf }
0x2f29   :  { %6394 = vmax.xlane.f32.xlu1 %v6393_v28  ;;  %v11696_v32 = vpop.f32.mrf.mxu0  ;;  %v11711_v29 = vpop.f32.mrf.mxu1 }
0x2f2b   :  { %v6308_v59 = vpop.f32.mrf.mxu0 }
0x2f2c   :  { %v6390_v39 = vsel %vm64_vm0, %v6308_v59, -inf }
0x2f2d   :  { %6391 = vmax.xlane.f32.xlu0 %v6390_v39  ;;  %v11706_v30 = vpop.f32.mrf.mxu0 }
0x2f3a   :  { %6412 = vrot.lane.b32.xlu1 %v13054_v0, %s13786_s29 }
0x2f3e   :  { %6566 = vrot.lane.b32.xlu1 %v13054_v0, %s13774_s19 }
0x2f42   :  { %6644 = vrot.lane.b32.xlu1 %v13052_v17, %s13774_s19 }
0x2f46   :  { %6642 = vrot.lane.b32.xlu1 %v13052_v17, %s13775_s25 }
0x2fb2   :  { %v6395_v31 = vpop.xlane.xlu1 %6394 }
0x2fb3   :  { %v6397_v41 = vsub.f32 %v6386_v27, %v6395_v31 }
0x2fb5   :  { %v6400_v33 = vmul.f32 1.442695, %v6397_v41 }
0x2fb6   :  { %v6413_v34 = vpop.permute.xlu1 %6412  ;;  %v6392_v35 = vpop.xlane.xlu0 %6391 }
0x2fb7   :  { %12117 = vpow2.f32 %v6400_v33  ;;  %v6396_v61 = vsub.f32 %v6308_v59, %v6392_v35  ;;  %11713 = vmatpush3.msra.mxu0 %v6413_v34 }
0x2fb8   :  { %11722 = vmatprep.subr.mxu0 %v12229_v3 }
0x2fb9   :  { %v6398_v36 = vmul.f32 1.442695, %v6396_v61 }
0x2fba   :  { %v6567_v43 = vpop.permute.xlu1 %6566 }
0x2fbb   :  { %12119 = vpow2.f32 %v6398_v36 }
0x2fbe   :  { %v6645_v2 = vpop.permute.xlu1 %6644 }
0x2fc2   :  { %v6643_v22 = vpop.permute.xlu1 %6642 }
0x2fc4   :  { %v12118_v37 = vpop.eup %12117 }
0x2fc5   :  { %v6405_v38 = vsel %vm64_vm0, %v12118_v37, 0.0 }
0x2fc6   :  { %6406 = vadd.xlane.f32.xlu0 %v6405_v38 }
0x2fc8   :  { %v12120_v40 = vpop.eup %12119 }
0x2fc9   :  { %v6402_v54 = vsel %vm64_vm0, %v12120_v40, 0.0 }
0x2fca   :  { %6403 = vadd.xlane.f32.xlu0 %v6402_v54 }
0x2fe0   :  { %6488 = vrot.lane.b32.xlu0 %v13052_v17, %s13786_s29 }
0x2fe4   :  { %6564 = vrot.lane.b32.xlu0 %v13054_v0, %s13775_s25 }
0x304f   :  { %v6407_v52 = vpop.xlane.xlu0 %6406 }
0x3050   :  { %12121 = vrcp.f32 %v6407_v52 }
0x3053   :  { %v6404_v42 = vpop.xlane.xlu0 %6403 }
0x3054   :  { %12123 = vrcp.f32 %v6404_v42 }
0x3057   :  { %v6489_v44 = vpop.permute.xlu0 %6488 }
0x3058   :  { %11718 = vmatpush3.msra.mxu1 %v6489_v44 }
0x3059   :  { %11727 = vmatprep.subr.mxu1 %v12229_v3 }
0x305b   :  { %v6565_v62 = vpop.permute.xlu0 %6564 }
0x305d   :  { %v12122_v47 = vpop.eup %12121 }
0x305e   :  { %v6411_v1 = vmul.f32 %v12122_v47, %v12118_v37 }
0x3060   :  { %11720 = vmatmul.mubr.msk.f32.vlgmr.msra.gmra.mxu1 %vm64_vm0, %v6411_v1 }
0x3061   :  { %v12124_v48 = vpop.eup %12123  ;;  %11728 = vmatpush3.xpose.msk.msra.mxu1 %vm149_vm2, %v6645_v2  ;;  %11729 = vmatprep.mubr.msk.f32.mxu1 %vm12230_vm1, %v12229_v3 }
0x3062   :  { %v6409_v23 = vmul.f32 %v12124_v48, %v12120_v40  ;;  %11737 = vmatprep.subr.mxu1 %v12229_v3 }
0x3064   :  { %11715 = vmatmul.mubr.msk.f32.vlgmr.msra.gmra.mxu0 %vm64_vm0, %v6409_v23  ;;  %11730 = vmatmul.mubr.msk.f32.vlgmr.msra.gmra.mxu1 %vm149_vm2, %v6643_v22 }
0x3065   :  { %11723 = vmatpush3.xpose.msk.msra.mxu0 %vm149_vm2, %v6567_v43  ;;  %11724 = vmatprep.mubr.msk.f32.mxu0 %vm12230_vm1, %v12229_v3 }
0x3066   :  { %11732 = vmatprep.subr.mxu0 %v12229_v3  ;;  %11739 = vmatprep.mubr.msk.f32.mxu1 %vm12230_vm1, %v12229_v3 }
0x3068   :  { %11725 = vmatmul.mubr.msk.f32.vlgmr.msra.gmra.mxu0 %vm149_vm2, %v6565_v62 }
0x3069   :  { %11734 = vmatprep.mubr.msk.f32.mxu0 %vm12230_vm1, %v12229_v3 }
0x3120   :  { %v6560_v63 = vpop.f32.mrf.mxu1 }
0x3122   :  { %v11721_v49 = vpop.f32.mrf.mxu1 }
0x3124   :  { %v6484_v53 = vpop.f32.mrf.mxu0  ;;  %v6716_v50 = vpop.f32.mrf.mxu1 }
0x3125   :  { %v6723_v57 = vsel %vm64_vm0, %v6716_v50, -inf }
0x3126   :  { %6724 = vmax.xlane.f32.xlu1 %v6723_v57  ;;  %v11716_v58 = vpop.f32.mrf.mxu0  ;;  %v11731_v60 = vpop.f32.mrf.mxu1  ;;  %v10991_v57 = vld [vmem:[%s13726_s3 + $0x18] sm:$0xff] }
0x3128   :  { %v6638_v7 = vpop.f32.mrf.mxu0 }
0x3129   :  { %v6720_v5 = vsel %vm64_vm0, %v6638_v7, -inf }
0x312a   :  { %6721 = vmax.xlane.f32.xlu0 %v6720_v5  ;;  %v11726_v6 = vpop.f32.mrf.mxu0 }
0x3137   :  { %6742 = vrot.lane.b32.xlu1 %v13054_v0, %s13776_s22 }
0x313b   :  { %6896 = vrot.lane.b32.xlu1 %v13146_v16, %s13777_s23 }
0x313f   :  { %6898 = vrot.lane.b32.xlu1 %v13144_v19, %s13777_s23 }
0x3143   :  { %6906 = vrot.lane.b32.xlu1 %v6560_v63, %s13778_s20 }
0x31af   :  { %v6725_v9 = vpop.xlane.xlu1 %6724 }
0x31b0   :  { %v6727_v10 = vsub.f32 %v6716_v50, %v6725_v9 }
0x31b2   :  { %v6730_v56 = vmul.f32 1.442695, %v6727_v10 }
0x31b3   :  { %v6743_v11 = vpop.permute.xlu1 %6742  ;;  %v6722_v13 = vpop.xlane.xlu0 %6721 }
0x31b4   :  { %12125 = vpow2.f32 %v6730_v56  ;;  %v6726_v14 = vsub.f32 %v6638_v7, %v6722_v13  ;;  %11733 = vmatpush3.msra.mxu0 %v6743_v11  ;;  %v10981_v56 = vld [vmem:[%s13732_s7] ss:$0 sm:$0xff] }
0x31b5   :  { %v10982_v13 = vld [vmem:[%s13733_s8] ss:$0 sm:$0xff] }
0x31b6   :  { %v6728_v15 = vmul.f32 1.442695, %v6726_v14 }
0x31b7   :  { %v6897_v39 = vpop.permute.xlu1 %6896 }
0x31b8   :  { %12127 = vpow2.f32 %v6728_v15  ;;  %v6918_v33 = vsel %vm149_vm2, %v13108_v46, %v6897_v39  ;;  %v10978_v46 = vld [vmem:[%s13730_s6] ss:$0 sm:$0xff] }
0x31bb   :  { %v6899_v30 = vpop.permute.xlu1 %6898 }
0x31bc   :  { %v6919_v35 = vsel %vm149_vm2, %v13106_v45, %v6899_v30 }
0x31bf   :  { %v6907_v31 = vpop.permute.xlu1 %6906 }
0x31c0   :  { %v6921_v37 = vsel %vm1491_vm3, %v6919_v35, %v6907_v31 }
0x31c1   :  { %v12126_v18 = vpop.eup %12125 }
0x31c2   :  { %v6735_v0 = vsel %vm64_vm0, %v12126_v18, 0.0 }
0x31c3   :  { %6736 = vadd.xlane.f32.xlu0 %v6735_v0 }
0x31c5   :  { %v12128_v20 = vpop.eup %12127 }
0x31c6   :  { %v6732_v21 = vsel %vm64_vm0, %v12128_v20, 0.0 }
0x31c7   :  { %6733 = vadd.xlane.f32.xlu0 %v6732_v21 }
0x31dd   :  { %6818 = vrot.lane.b32.xlu0 %v13052_v17, %s13776_s22  ;;  %v5489_v17 = vld [vmem:[%s13729_s5] sm:$0xff] }
0x31de   :  { %11742 = vmatprep.subr.mxu0 %v5489_v17 }
0x31e1   :  { %6904 = vrot.lane.b32.xlu0 %v6484_v53, %s13778_s20 }
0x324c   :  { %v6737_v4 = vpop.xlane.xlu0 %6736 }
0x324d   :  { %12129 = vrcp.f32 %v6737_v4  ;;  %v13245_v4 = vld [vmem:[%s13734_s2] sm:$0xff] }
0x3250   :  { %v6734_v24 = vpop.xlane.xlu0 %6733 }
0x3251   :  { %12131 = vrcp.f32 %v6734_v24  ;;  %v13253_v24 = vld [vmem:[%s13734_s2 + $0x8] sm:$0xff] }
0x3254   :  { %v6819_v25 = vpop.permute.xlu0 %6818 }
0x3255   :  { %11738 = vmatpush3.msra.mxu1 %v6819_v25  ;;  %v7141_v25 = vld [vmem:[%s13735_s11 + $0x8] sm:$0xff] }
0x3258   :  { %v6905_v41 = vpop.permute.xlu0 %6904 }
0x3259   :  { %v6920_v61 = vsel %vm1491_vm3, %v6918_v33, %v6905_v41 }
0x325a   :  { %v12130_v19 = vpop.eup %12129 }
0x325b   :  { %v6741_v26 = vmul.f32 %v12130_v19, %v12126_v18  ;;  %v7140_v19 = vld [vmem:[%s13735_s11] sm:$0xff] }
0x325d   :  { %11740 = vmatmul.mubr.msk.f32.vlgmr.msra.gmra.mxu1 %vm64_vm0, %v6741_v26  ;;  %v10983_v26 = vld [vmem:[%s13736_s10] ss:$0 sm:$0xff] }
0x325e   :  { %v12132_v16 = vpop.eup %12131 }
0x325f   :  { %v6739_v27 = vmul.f32 %v12132_v16, %v12128_v20 }
0x3261   :  { %11735 = vmatmul.mubr.msk.f32.vlgmr.msra.gmra.mxu0 %vm64_vm0, %v6739_v27 }
0x3262   :  { %11743 = vmatpush3.msra.mxu0 %v5489_v17 }
0x3263   :  { %11752 = vmatprep.subr.mxu0 %v7141_v25 }
0x331d   :  { %v6890_v28 = vpop.f32.mrf.mxu1 }
0x331e   :  { %6914 = vrot.lane.b32.xlu1 %v6890_v28, %s13779_s18  ;;  %v10993_v28 = vld [vmem:[%s13728_s4 + $0x3] ss:$0 sm:$0xff] }
0x331f   :  { %v11741_v32 = vpop.f32.mrf.mxu1 }
0x3321   :  { %v6814_v29 = vpop.f32.mrf.mxu0 }
0x3322   :  { %6912 = vrot.lane.b32.xlu0 %v6814_v29, %s13779_s18 }
0x3323   :  { %v11736_v59 = vpop.f32.mrf.mxu0 }
0x3390   :  { %v6915_v34 = vpop.permute.xlu1 %6914 }
0x3391   :  { %v6923_v40 = vsel %vm1494_vm4, %v6921_v37, %v6915_v34 }
0x3394   :  { %v6913_v36 = vpop.permute.xlu0 %6912 }
0x3395   :  { %v6922_v38 = vsel %vm1494_vm4, %v6920_v61, %v6913_v36 }
0x3396   :  { %11744 = vmatprep.mubr.msk.f32.mxu0 %vm64_vm0, %v6922_v38 }
0x3397   :  { %11745 = vmatmul.mubr.msk.f32.vlgmr.msra.gmra.mxu0 %vm64_vm0, %v6923_v40 }
0x3398   :  { %11753 = vmatpush3.msra.mxu0 %v7141_v25 }
0x3399   :  { %11754 = vmatprep.subr.mxu0 %v7140_v19 }
0x339a   :  { %11755 = vmatpush3.msra.mxu0 %v7140_v19 }
0x339b   :  { %11764 = vmatprep.subr.mxu0 %v12229_v3 }
0x3457   :  { %v11746_v54 = vpop.f32.mrf.mxu0 }
0x3458   :  { %v7006_v52 = vadd.f32 %v11746_v54, %v10978_v46 }
0x3459   :  { %v7000_v45 = vpop.f32.mrf.mxu0 }
0x345a   :  { %v7010_v42 = vadd.f32 %v7006_v52, %v13041_v8  ;;  %v7001_v43 = vadd.f32 %v10978_v46, %v7000_v45 }
0x345c   :  { %v7009_v44 = vadd.f32 %v7001_v43, %v13036_v12  ;;  %v7016_v47 = vsel %vm64_vm0, %v7010_v42, 0.0  ;;  %v7051_v12 = vld [vmem:[%s13731_s9] sm:$0xff] }
0x345d   :  { %7017 = vadd.xlane.f32.xlu1 %v7016_v47  ;;  %11747 = vmatprep.subr.mxu1 %v7051_v12 }
0x345e   :  { %v7013_v2 = vsel %vm64_vm0, %v7009_v44, 0.0  ;;  %11748 = vmatpush3.msra.mxu1 %v7051_v12 }
0x345f   :  { %7014 = vadd.xlane.f32.xlu0 %v7013_v2  ;;  %11759 = vmatprep.subr.mxu1 %v10991_v57 }
0x34e6   :  { %v7018_v1 = vpop.xlane.xlu1 %7017 }
0x34e7   :  { %v7020_v48 = vmul.f32 0.125, %v7018_v1 }
0x34e8   :  { %v7015_v23 = vpop.xlane.xlu0 %7014 }
0x34e9   :  { %v7019_v22 = vmul.f32 0.125, %v7015_v23  ;;  %v7022_v62 = vsub.f32 %v7010_v42, %v7020_v48 }
0x34eb   :  { %v7021_v63 = vsub.f32 %v7009_v44, %v7019_v22  ;;  %v7024_v50 = vmul.f32 %v7022_v62, %v7022_v62 }
0x34ed   :  { %v7023_v49 = vmul.f32 %v7021_v63, %v7021_v63  ;;  %v7028_v8 = vsel %vm64_vm0, %v7024_v50, 0.0 }
0x34ef   :  { %v7025_v53 = vsel %vm64_vm0, %v7023_v49, 0.0 }
0x34f0   :  { %7026 = vadd.xlane.f32.xlu0 %v7025_v53 }
0x34f4   :  { %7029 = vadd.xlane.f32.xlu0 %v7028_v8 }
0x3579   :  { %v7027_v58 = vpop.xlane.xlu0 %7026 }
0x357a   :  { %v7031_v60 = vmul.f32 0.125, %v7027_v58 }
0x357c   :  { %v7033_v7 = vadd.f32 1e-05, %v7031_v60 }
0x357d   :  { %v7030_v5 = vpop.xlane.xlu0 %7029 }
0x357e   :  { %12133 = vrsqrt.f32 %v7033_v7  ;;  %v7032_v6 = vmul.f32 0.125, %v7030_v5 }
0x3580   :  { %v7034_v9 = vadd.f32 1e-05, %v7032_v6 }
0x3582   :  { %12135 = vrsqrt.f32 %v7034_v9 }
0x358b   :  { %v12134_v10 = vpop.eup %12133 }
0x358c   :  { %v7037_v11 = vmul.f32 %v12134_v10, %v7021_v63 }
0x358e   :  { %v7043_v14 = vmul.f32 %v10981_v56, %v7037_v11 }
0x358f   :  { %v12136_v15 = vpop.eup %12135 }
0x3590   :  { %v7038_v18 = vmul.f32 %v12136_v15, %v7022_v62  ;;  %v13234_v0 = vadd.f32 %v10982_v13, %v7043_v14 }
0x3592   :  { %v7044_v20 = vmul.f32 %v10981_v56, %v7038_v18  ;;  %11749 = vmatprep.mubr.msk.f32.mxu1 %vm64_vm0, %v13234_v0 }
0x3594   :  { %v13238_v21 = vadd.f32 %v10982_v13, %v7044_v20 }
0x3596   :  { %11750 = vmatmul.mubr.msk.f32.vlgmr.msra.gmra.mxu1 %vm64_vm0, %v13238_v21 }
0x3597   :  { %11760 = vmatpush3.msra.mxu1 %v10991_v57  ;;  %11761 = vmatprep.mubr.msk.f32.mxu1 %vm64_vm0, %v13245_v4 }
0x3598   :  { %11769 = vmatprep.subr.mxu1 %v12229_v3 }
0x359a   :  { %11762 = vmatmul.mubr.msk.f32.vlgmr.msra.gmra.mxu1 %vm64_vm0, %v13253_v24 }
0x359b   :  { %11771 = vmatprep.mubr.msk.f32.mxu1 %vm12230_vm1, %v12229_v3 }
0x3656   :  { %v11751_v16 = vpop.f32.mrf.mxu1 }
0x3657   :  { %v7135_v27 = vadd.f32 %v11751_v16, %v10983_v26 }
0x3658   :  { %v7129_v17 = vpop.f32.mrf.mxu1 }
0x3659   :  { %v7130_v32 = vadd.f32 %v10983_v26, %v7129_v17  ;;  %v7139_v30 = vmax.f32 %v7135_v27, 0.0 }
0x365a   :  { %v11763_v29 = vpop.f32.mrf.mxu1 }
0x365b   :  { %v7138_v59 = vmax.f32 %v7130_v32, 0.0  ;;  %v13272_v39 = vadd.f32 %v11763_v29, %v10993_v28 }
0x365c   :  { %v7346_v31 = vpop.f32.mrf.mxu1 }
0x365d   :  { %v13274_v41 = vadd.f32 %v10993_v28, %v7346_v31  ;;  %7433 = vrot.lane.b32.xlu0 %v13272_v39, %s13787_s27  ;;  %11756 = vmatprep.mubr.msk.f32.mxu0 %vm1721_vm5, %v7138_v59 }
0x365e   :  { %11757 = vmatmul.mubr.msk.f32.vlgmr.msra.gmra.mxu0 %vm1721_vm5, %v7139_v30 }
0x365f   :  { %7356 = vrot.lane.b32.xlu1 %v13274_v41, %s13787_s27  ;;  %11766 = vmatprep.mubr.msk.f32.mxu0 %vm12230_vm1, %v12229_v3 }
0x36cf   :  { %v7434_v33 = vpop.permute.xlu0 %7433 }
0x36d0   :  { %11770 = vmatpush3.xpose.msk.msra.mxu1 %vm149_vm2, %v7434_v33 }
0x36d1   :  { %v7357_v34 = vpop.permute.xlu1 %7356  ;;  %11779 = vmatprep.subr.mxu1 %v12229_v3 }
0x36d2   :  { %11765 = vmatpush3.xpose.msk.msra.mxu0 %vm149_vm2, %v7357_v34 }
0x36d3   :  { %11772 = vmatmul.mubr.msk.f32.vlgmr.msra.gmra.mxu1 %vm149_vm2, %v13272_v39  ;;  %11774 = vmatprep.subr.mxu0 %v12229_v3 }
0x36d4   :  { %11781 = vmatprep.mubr.msk.f32.mxu1 %vm12230_vm1, %v12229_v3 }
0x36d5   :  { %11767 = vmatmul.mubr.msk.f32.vlgmr.msra.gmra.mxu0 %vm149_vm2, %v13274_v41 }
0x36d6   :  { %11776 = vmatprep.mubr.msk.f32.mxu0 %vm12230_vm1, %v12229_v3 }
0x371e   :  { %v13296_v35 = vpop.f32.mrf.mxu0 }
0x3720   :  { %v13298_v61 = vpop.f32.mrf.mxu0 }
0x3793   :  { %v7505_v36 = vpop.f32.mrf.mxu1 }
0x3794   :  { %v7512_v37 = vsel %vm64_vm0, %v7505_v36, -inf }
0x3795   :  { %7513 = vmax.xlane.f32.xlu0 %v7512_v37  ;;  %v7428_v38 = vpop.f32.mrf.mxu0  ;;  %v11773_v40 = vpop.f32.mrf.mxu1 }
0x3796   :  { %v7509_v46 = vsel %vm64_vm0, %v7428_v38, -inf }
0x3797   :  { %7510 = vmax.xlane.f32.xlu1 %v7509_v46  ;;  %v11768_v54 = vpop.f32.mrf.mxu0 }
0x37a8   :  { %7531 = vrot.lane.b32.xlu1 %v13274_v41, %s13782_s1 }
0x37ab   :  { %7607 = vrot.lane.b32.xlu0 %v13272_v39, %s13782_s1 }
0x37ac   :  { %7685 = vrot.lane.b32.xlu1 %v13274_v41, %s13783_s30 }
0x37b0   :  { %7763 = vrot.lane.b32.xlu1 %v13272_v39, %s13783_s30 }
0x381e   :  { %v7514_v52 = vpop.xlane.xlu0 %7513 }
0x381f   :  { %v7516_v45 = vsub.f32 %v7505_v36, %v7514_v52 }
0x3820   :  { %v7511_v42 = vpop.xlane.xlu1 %7510 }
0x3821   :  { %v7519_v43 = vmul.f32 1.442695, %v7516_v45  ;;  %v7515_v44 = vsub.f32 %v7428_v38, %v7511_v42 }
0x3822   :  { %v7608_v47 = vpop.permute.xlu0 %7607 }
0x3823   :  { %12137 = vpow2.f32 %v7519_v43  ;;  %v7517_v2 = vmul.f32 1.442695, %v7515_v44  ;;  %11780 = vmatpush3.msra.mxu1 %v7608_v47 }
0x3824   :  { %v7532_v1 = vpop.permute.xlu1 %7531  ;;  %11789 = vmatprep.subr.mxu1 %v12229_v3 }
0x3825   :  { %12139 = vpow2.f32 %v7517_v2  ;;  %11775 = vmatpush3.msra.mxu0 %v7532_v1 }
0x3826   :  { %11784 = vmatprep.subr.mxu0 %v12229_v3 }
0x3828   :  { %v7686_v63 = vpop.permute.xlu1 %7685 }
0x382c   :  { %v7764_v49 = vpop.permute.xlu1 %7763 }
0x3830   :  { %v12138_v48 = vpop.eup %12137 }
0x3831   :  { %v7524_v23 = vsel %vm64_vm0, %v12138_v48, 0.0 }
0x3832   :  { %v12140_v22 = vpop.eup %12139  ;;  %7525 = vadd.xlane.f32.xlu0 %v7524_v23 }
0x3833   :  { %v7521_v62 = vsel %vm64_vm0, %v12140_v22, 0.0 }
0x3834   :  { %7522 = vadd.xlane.f32.xlu1 %v7521_v62 }
0x3845   :  { %7761 = vrot.lane.b32.xlu1 %v13272_v39, %s13784_s0 }
0x3848   :  { %7683 = vrot.lane.b32.xlu0 %v13274_v41, %s13784_s0 }
0x38bb   :  { %v7526_v53 = vpop.xlane.xlu0 %7525 }
0x38bc   :  { %12141 = vrcp.f32 %v7526_v53 }
0x38bd   :  { %v7523_v50 = vpop.xlane.xlu1 %7522 }
0x38be   :  { %12143 = vrcp.f32 %v7523_v50 }
0x38bf   :  { %v7684_v7 = vpop.permute.xlu0 %7683 }
0x38c1   :  { %v7762_v60 = vpop.permute.xlu1 %7761 }
0x38c9   :  { %v12142_v8 = vpop.eup %12141 }
0x38ca   :  { %v7530_v12 = vmul.f32 %v12142_v8, %v12138_v48 }
0x38cb   :  { %v12144_v57 = vpop.eup %12143 }
0x38cc   :  { %11782 = vmatmul.mubr.msk.f32.vlgmr.msra.gmra.mxu1 %vm64_vm0, %v7530_v12  ;;  %v7528_v58 = vmul.f32 %v12144_v57, %v12140_v22 }
0x38cd   :  { %11790 = vmatpush3.xpose.msk.msra.mxu1 %vm149_vm2, %v7764_v49  ;;  %11791 = vmatprep.mubr.msk.f32.mxu1 %vm12230_vm1, %v12229_v3 }
0x38ce   :  { %11777 = vmatmul.mubr.msk.f32.vlgmr.msra.gmra.mxu0 %vm64_vm0, %v7528_v58  ;;  %11799 = vmatprep.subr.mxu1 %v12229_v3 }
0x38cf   :  { %11785 = vmatpush3.xpose.msk.msra.mxu0 %vm149_vm2, %v7686_v63  ;;  %11786 = vmatprep.mubr.msk.f32.mxu0 %vm12230_vm1, %v12229_v3 }
0x38d0   :  { %11792 = vmatmul.mubr.msk.f32.vlgmr.msra.gmra.mxu1 %vm149_vm2, %v7762_v60  ;;  %11794 = vmatprep.subr.mxu0 %v12229_v3 }
0x38d1   :  { %11801 = vmatprep.mubr.msk.f32.mxu1 %vm12230_vm1, %v12229_v3 }
0x38d2   :  { %11787 = vmatmul.mubr.msk.f32.vlgmr.msra.gmra.mxu0 %vm149_vm2, %v7684_v7 }
0x38d3   :  { %11796 = vmatprep.mubr.msk.f32.mxu0 %vm12230_vm1, %v12229_v3 }
0x398c   :  { %v13334_v5 = vpop.f32.mrf.mxu1 }
0x398e   :  { %v13336_v6 = vpop.f32.mrf.mxu0  ;;  %v11783_v9 = vpop.f32.mrf.mxu1 }
0x3990   :  { %v11778_v10 = vpop.f32.mrf.mxu0  ;;  %v7835_v56 = vpop.f32.mrf.mxu1 }
0x3991   :  { %v7842_v11 = vsel %vm64_vm0, %v7835_v56, -inf }
0x3992   :  { %7843 = vmax.xlane.f32.xlu1 %v7842_v11  ;;  %v7757_v13 = vpop.f32.mrf.mxu0  ;;  %v11793_v14 = vpop.f32.mrf.mxu1 }
0x3993   :  { %v7839_v15 = vsel %vm64_vm0, %v7757_v13, -inf }
0x3994   :  { %7840 = vmax.xlane.f32.xlu0 %v7839_v15  ;;  %v11788_v18 = vpop.f32.mrf.mxu0 }
0x39a3   :  { %7861 = vrot.lane.b32.xlu1 %v13274_v41, %s13785_s28 }
0x39a7   :  { %8015 = vrot.lane.b32.xlu1 %v13274_v41, %s13781_s17 }
0x39ab   :  { %8093 = vrot.lane.b32.xlu1 %v13272_v39, %s13781_s17 }
0x39af   :  { %8091 = vrot.lane.b32.xlu1 %v13272_v39, %s13780_s16 }
0x3a1b   :  { %v7844_v20 = vpop.xlane.xlu1 %7843 }
0x3a1c   :  { %v7846_v25 = vsub.f32 %v7835_v56, %v7844_v20 }
0x3a1d   :  { %v7841_v19 = vpop.xlane.xlu0 %7840 }
0x3a1e   :  { %v7849_v26 = vmul.f32 1.442695, %v7846_v25  ;;  %v7845_v16 = vsub.f32 %v7757_v13, %v7841_v19 }
0x3a1f   :  { %v7862_v27 = vpop.permute.xlu1 %7861 }
0x3a20   :  { %12145 = vpow2.f32 %v7849_v26  ;;  %v7847_v17 = vmul.f32 1.442695, %v7845_v16  ;;  %11795 = vmatpush3.msra.mxu0 %v7862_v27 }
0x3a21   :  { %11804 = vmatprep.subr.mxu0 %v12229_v3 }
0x3a22   :  { %12147 = vpow2.f32 %v7847_v17 }
0x3a23   :  { %v8016_v33 = vpop.permute.xlu1 %8015 }
0x3a27   :  { %v8094_v37 = vpop.permute.xlu1 %8093 }
0x3a2b   :  { %v8092_v54 = vpop.permute.xlu1 %8091 }
0x3a2d   :  { %v12146_v28 = vpop.eup %12145 }
0x3a2e   :  { %v7854_v32 = vsel %vm64_vm0, %v12146_v28, 0.0 }
0x3a2f   :  { %v12148_v29 = vpop.eup %12147  ;;  %7855 = vadd.xlane.f32.xlu0 %v7854_v32 }
0x3a30   :  { %v7851_v59 = vsel %vm64_vm0, %v12148_v29, 0.0 }
0x3a33   :  { %7852 = vadd.xlane.f32.xlu0 %v7851_v59 }
0x3a49   :  { %7937 = vrot.lane.b32.xlu0 %v13272_v39, %s13785_s28 }
0x3a4d   :  { %8013 = vrot.lane.b32.xlu0 %v13274_v41, %s13780_s16 }
0x3ab8   :  { %v7856_v30 = vpop.xlane.xlu0 %7855 }
0x3ab9   :  { %12149 = vrcp.f32 %v7856_v30 }
0x3abc   :  { %v7853_v31 = vpop.xlane.xlu0 %7852 }
0x3abd   :  { %12151 = vrcp.f32 %v7853_v31 }
0x3ac0   :  { %v7938_v34 = vpop.permute.xlu0 %7937 }
0x3ac1   :  { %11800 = vmatpush3.msra.mxu1 %v7938_v34 }
0x3ac2   :  { %11809 = vmatprep.subr.mxu1 %v12229_v3 }
0x3ac4   :  { %v8014_v52 = vpop.permute.xlu0 %8013 }
0x3ac6   :  { %v12150_v36 = vpop.eup %12149 }
0x3ac7   :  { %v7860_v38 = vmul.f32 %v12150_v36, %v12146_v28 }
0x3ac9   :  { %11802 = vmatmul.mubr.msk.f32.vlgmr.msra.gmra.mxu1 %vm64_vm0, %v7860_v38 }
0x3aca   :  { %v12152_v40 = vpop.eup %12151  ;;  %11810 = vmatpush3.xpose.msk.msra.mxu1 %vm149_vm2, %v8094_v37  ;;  %11811 = vmatprep.mubr.msk.f32.mxu1 %vm12230_vm1, %v12229_v3 }
0x3acb   :  { %v7858_v46 = vmul.f32 %v12152_v40, %v12148_v29  ;;  %11819 = vmatprep.subr.mxu1 %v12229_v3 }
0x3acd   :  { %11797 = vmatmul.mubr.msk.f32.vlgmr.msra.gmra.mxu0 %vm64_vm0, %v7858_v46  ;;  %11812 = vmatmul.mubr.msk.f32.vlgmr.msra.gmra.mxu1 %vm149_vm2, %v8092_v54 }
0x3ace   :  { %11805 = vmatpush3.xpose.msk.msra.mxu0 %vm149_vm2, %v8016_v33  ;;  %11806 = vmatprep.mubr.msk.f32.mxu0 %vm12230_vm1, %v12229_v3 }
0x3acf   :  { %11814 = vmatprep.subr.mxu0 %v12229_v3  ;;  %11821 = vmatprep.mubr.msk.f32.mxu1 %vm12230_vm1, %v12229_v3 }
0x3ad1   :  { %11807 = vmatmul.mubr.msk.f32.vlgmr.msra.gmra.mxu0 %vm149_vm2, %v8014_v52 }
0x3ad2   :  { %11816 = vmatprep.mubr.msk.f32.mxu0 %vm12230_vm1, %v12229_v3 }
0x3b89   :  { %v13372_v45 = vpop.f32.mrf.mxu1 }
0x3b8b   :  { %v11803_v42 = vpop.f32.mrf.mxu1 }
0x3b8d   :  { %v13374_v43 = vpop.f32.mrf.mxu0  ;;  %v8165_v44 = vpop.f32.mrf.mxu1 }
0x3b8e   :  { %v8172_v47 = vsel %vm64_vm0, %v8165_v44, -inf }
0x3b8f   :  { %8173 = vmax.xlane.f32.xlu1 %v8172_v47  ;;  %v11798_v2 = vpop.f32.mrf.mxu0  ;;  %v11813_v1 = vpop.f32.mrf.mxu1 }
0x3b91   :  { %v8087_v48 = vpop.f32.mrf.mxu0 }
0x3b92   :  { %v8169_v23 = vsel %vm64_vm0, %v8087_v48, -inf }
0x3b93   :  { %8170 = vmax.xlane.f32.xlu0 %v8169_v23  ;;  %v11808_v22 = vpop.f32.mrf.mxu0 }
0x3ba0   :  { %8191 = vrot.lane.b32.xlu1 %v13274_v41, %s13786_s29 }
0x3ba4   :  { %8345 = vrot.lane.b32.xlu1 %v13274_v41, %s13774_s19 }
0x3ba8   :  { %8423 = vrot.lane.b32.xlu1 %v13272_v39, %s13774_s19 }
0x3bac   :  { %8421 = vrot.lane.b32.xlu1 %v13272_v39, %s13775_s25 }
0x3c18   :  { %v8174_v62 = vpop.xlane.xlu1 %8173 }
0x3c19   :  { %v8176_v63 = vsub.f32 %v8165_v44, %v8174_v62 }
0x3c1b   :  { %v8179_v49 = vmul.f32 1.442695, %v8176_v63 }
0x3c1c   :  { %v8192_v53 = vpop.permute.xlu1 %8191  ;;  %v8171_v50 = vpop.xlane.xlu0 %8170 }
0x3c1d   :  { %12153 = vpow2.f32 %v8179_v49  ;;  %v8175_v8 = vsub.f32 %v8087_v48, %v8171_v50  ;;  %11815 = vmatpush3.msra.mxu0 %v8192_v53  ;;  %v10986_v49 = vld [vmem:[%s13737_s12] ss:$0 sm:$0xff] }
0x3c1e   :  { %11824 = vmatprep.subr.mxu0 %v12229_v3  ;;  %v7220_v53 = vadd.f32 %v10986_v49, %v13298_v61  ;;  %v7225_v50 = vadd.f32 %v13296_v35, %v10986_v49 }
0x3c1f   :  { %v8177_v12 = vmul.f32 1.442695, %v8175_v8 }
0x3c20   :  { %v8346_v56 = vpop.permute.xlu1 %8345  ;;  %v7228_v8 = vadd.f32 %v7220_v53, %v13234_v0 }
0x3c21   :  { %12155 = vpow2.f32 %v8177_v12  ;;  %v7229_v12 = vadd.f32 %v7225_v50, %v13238_v21 }
0x3c24   :  { %v8424_v14 = vpop.permute.xlu1 %8423 }
0x3c28   :  { %v8422_v25 = vpop.permute.xlu1 %8421 }
0x3c2a   :  { %v12154_v57 = vpop.eup %12153 }
0x3c2b   :  { %v8184_v58 = vsel %vm64_vm0, %v12154_v57, 0.0 }
0x3c2c   :  { %8185 = vadd.xlane.f32.xlu0 %v8184_v58  ;;  %v7235_v58 = vsel %vm64_vm0, %v7229_v12, 0.0 }
0x3c2e   :  { %v12156_v60 = vpop.eup %12155 }
0x3c2f   :  { %v8181_v7 = vsel %vm64_vm0, %v12156_v60, 0.0 }
0x3c30   :  { %8182 = vadd.xlane.f32.xlu0 %v8181_v7 }
0x3c46   :  { %8267 = vrot.lane.b32.xlu0 %v13272_v39, %s13786_s29 }
0x3c4a   :  { %8343 = vrot.lane.b32.xlu0 %v13274_v41, %s13775_s25 }
0x3cb5   :  { %v8186_v9 = vpop.xlane.xlu0 %8185 }
0x3cb6   :  { %12157 = vrcp.f32 %v8186_v9 }
0x3cb9   :  { %v8183_v10 = vpop.xlane.xlu0 %8182 }
0x3cba   :  { %12159 = vrcp.f32 %v8183_v10 }
0x3cbd   :  { %v8268_v11 = vpop.permute.xlu0 %8267 }
0x3cbe   :  { %11820 = vmatpush3.msra.mxu1 %v8268_v11 }
0x3cbf   :  { %11829 = vmatprep.subr.mxu1 %v12229_v3 }
0x3cc1   :  { %v8344_v19 = vpop.permute.xlu0 %8343 }
0x3cc3   :  { %v12158_v13 = vpop.eup %12157 }
0x3cc4   :  { %v8190_v15 = vmul.f32 %v12158_v13, %v12154_v57  ;;  %v7232_v57 = vsel %vm64_vm0, %v7228_v8, 0.0 }
0x3cc6   :  { %11822 = vmatmul.mubr.msk.f32.vlgmr.msra.gmra.mxu1 %vm64_vm0, %v8190_v15 }
0x3cc7   :  { %v12160_v18 = vpop.eup %12159  ;;  %11830 = vmatpush3.xpose.msk.msra.mxu1 %vm149_vm2, %v8424_v14  ;;  %11831 = vmatprep.mubr.msk.f32.mxu1 %vm12230_vm1, %v12229_v3 }
0x3cc8   :  { %v8188_v20 = vmul.f32 %v12160_v18, %v12156_v60  ;;  %11839 = vmatprep.subr.mxu1 %v12229_v3 }
0x3cca   :  { %11817 = vmatmul.mubr.msk.f32.vlgmr.msra.gmra.mxu0 %vm64_vm0, %v8188_v20  ;;  %11832 = vmatmul.mubr.msk.f32.vlgmr.msra.gmra.mxu1 %vm149_vm2, %v8422_v25 }
0x3ccb   :  { %11825 = vmatpush3.xpose.msk.msra.mxu0 %vm149_vm2, %v8346_v56  ;;  %11826 = vmatprep.mubr.msk.f32.mxu0 %vm12230_vm1, %v12229_v3 }
0x3ccc   :  { %11834 = vmatprep.subr.mxu0 %v12229_v3  ;;  %11841 = vmatprep.mubr.msk.f32.mxu1 %vm12230_vm1, %v12229_v3 }
0x3cce   :  { %11827 = vmatmul.mubr.msk.f32.vlgmr.msra.gmra.mxu0 %vm149_vm2, %v8344_v19 }
0x3ccf   :  { %11836 = vmatprep.mubr.msk.f32.mxu0 %vm12230_vm1, %v12229_v3 }
0x3d86   :  { %v8339_v26 = vpop.f32.mrf.mxu1 }
0x3d88   :  { %v11823_v16 = vpop.f32.mrf.mxu1 }
0x3d8a   :  { %v8263_v27 = vpop.f32.mrf.mxu0  ;;  %v8495_v17 = vpop.f32.mrf.mxu1 }
0x3d8b   :  { %v8502_v28 = vsel %vm64_vm0, %v8495_v17, -inf }
0x3d8c   :  { %8503 = vmax.xlane.f32.xlu1 %v8502_v28  ;;  %v11818_v32 = vpop.f32.mrf.mxu0  ;;  %v11833_v29 = vpop.f32.mrf.mxu1 }
0x3d8e   :  { %v8417_v59 = vpop.f32.mrf.mxu0 }
0x3d8f   :  { %v8499_v30 = vsel %vm64_vm0, %v8417_v59, -inf }
0x3d90   :  { %8500 = vmax.xlane.f32.xlu0 %v8499_v30  ;;  %v11828_v31 = vpop.f32.mrf.mxu0 }
0x3d9d   :  { %8521 = vrot.lane.b32.xlu1 %v13274_v41, %s13776_s22 }
0x3da1   :  { %8675 = vrot.lane.b32.xlu1 %v13374_v43, %s13777_s23 }
0x3da5   :  { %8677 = vrot.lane.b32.xlu1 %v13372_v45, %s13777_s23 }
0x3da9   :  { %8685 = vrot.lane.b32.xlu1 %v8339_v26, %s13778_s20  ;;  %v11020_v26 = vld [vmem:[%s13730_s6 + $0x3] ss:$0 sm:$0xff] }
0x3e15   :  { %v8504_v33 = vpop.xlane.xlu1 %8503 }
0x3e16   :  { %v8506_v34 = vsub.f32 %v8495_v17, %v8504_v33 }
0x3e18   :  { %v8509_v36 = vmul.f32 1.442695, %v8506_v34 }
0x3e19   :  { %v8522_v37 = vpop.permute.xlu1 %8521  ;;  %v8501_v38 = vpop.xlane.xlu0 %8500 }
0x3e1a   :  { %12161 = vpow2.f32 %v8509_v36  ;;  %v8505_v40 = vsub.f32 %v8417_v59, %v8501_v38  ;;  %11835 = vmatpush3.msra.mxu0 %v8522_v37 }
0x3e1c   :  { %v8507_v46 = vmul.f32 1.442695, %v8505_v40 }
0x3e1d   :  { %v8676_v60 = vpop.permute.xlu1 %8675 }
0x3e1e   :  { %12163 = vpow2.f32 %v8507_v46  ;;  %v8697_v56 = vsel %vm149_vm2, %v13336_v6, %v8676_v60 }
0x3e21   :  { %v8678_v7 = vpop.permute.xlu1 %8677 }
0x3e22   :  { %v8698_v35 = vsel %vm149_vm2, %v13334_v5, %v8678_v7 }
0x3e25   :  { %v8686_v9 = vpop.permute.xlu1 %8685 }
0x3e26   :  { %v8700_v11 = vsel %vm1491_vm3, %v8698_v35, %v8686_v9  ;;  %v11023_v35 = vld [vmem:[%s13732_s7 + $0x5] ss:$0 sm:$0xff] }
0x3e27   :  { %v12162_v54 = vpop.eup %12161 }
0x3e28   :  { %v8514_v41 = vsel %vm64_vm0, %v12162_v54, 0.0 }
0x3e29   :  { %8515 = vadd.xlane.f32.xlu0 %v8514_v41 }
0x3e2b   :  { %v12164_v52 = vpop.eup %12163 }
0x3e2c   :  { %v8511_v42 = vsel %vm64_vm0, %v12164_v52, 0.0 }
0x3e2d   :  { %8512 = vadd.xlane.f32.xlu0 %v8511_v42 }
0x3e43   :  { %8597 = vrot.lane.b32.xlu0 %v13272_v39, %s13776_s22  ;;  %v10992_v39 = vld [vmem:[%s13729_s5 + $0x18] sm:$0xff] }
0x3e44   :  { %11844 = vmatprep.subr.mxu0 %v10992_v39 }
0x3e47   :  { %8683 = vrot.lane.b32.xlu0 %v8263_v27, %s13778_s20 }
0x3eb2   :  { %v8516_v45 = vpop.xlane.xlu0 %8515 }
0x3eb3   :  { %12165 = vrcp.f32 %v8516_v45 }
0x3eb6   :  { %v8513_v43 = vpop.xlane.xlu0 %8512 }
0x3eb7   :  { %12167 = vrcp.f32 %v8513_v43 }
0x3eba   :  { %v8598_v44 = vpop.permute.xlu0 %8597 }
0x3ebb   :  { %11840 = vmatpush3.msra.mxu1 %v8598_v44 }
0x3ebe   :  { %v8684_v10 = vpop.permute.xlu0 %8683 }
0x3ebf   :  { %v8699_v0 = vsel %vm1491_vm3, %v8697_v56, %v8684_v10 }
0x3ec0   :  { %v12166_v47 = vpop.eup %12165 }
0x3ec1   :  { %v8520_v2 = vmul.f32 %v12166_v47, %v12162_v54 }
0x3ec3   :  { %11842 = vmatmul.mubr.msk.f32.vlgmr.msra.gmra.mxu1 %vm64_vm0, %v8520_v2 }
0x3ec4   :  { %v12168_v1 = vpop.eup %12167 }
0x3ec5   :  { %v8518_v48 = vmul.f32 %v12168_v1, %v12164_v52  ;;  %v11025_v52 = vld [vmem:[%s13726_s3 + $0x20] sm:$0xff] }
0x3ec6   :  { %11849 = vmatprep.subr.mxu1 %v11025_v52 }
0x3ec7   :  { %11837 = vmatmul.mubr.msk.f32.vlgmr.msra.gmra.mxu0 %vm64_vm0, %v8518_v48  ;;  %11850 = vmatpush3.msra.mxu1 %v11025_v52 }
0x3ec8   :  { %11845 = vmatpush3.msra.mxu0 %v10992_v39  ;;  %11859 = vmatprep.subr.mxu1 %v12229_v3 }
0x3f83   :  { %v8669_v23 = vpop.f32.mrf.mxu1 }
0x3f84   :  { %8693 = vrot.lane.b32.xlu1 %v8669_v23, %s13779_s18 }
0x3f85   :  { %v11843_v22 = vpop.f32.mrf.mxu1 }
0x3f86   :  { %v11027_v22 = vld [vmem:[%s13728_s4 + $0x4] ss:$0 sm:$0xff] }
0x3f87   :  { %v8593_v62 = vpop.f32.mrf.mxu0 }
0x3f88   :  { %8691 = vrot.lane.b32.xlu0 %v8593_v62, %s13779_s18 }
0x3f89   :  { %v11838_v63 = vpop.f32.mrf.mxu0 }
0x3fa7   :  { %7233 = vadd.xlane.f32.xlu0 %v7232_v57 }
0x3fa8   :  { %7236 = vadd.xlane.f32.xlu1 %v7235_v58 }
0x3ff6   :  { %v8694_v61 = vpop.permute.xlu1 %8693 }
0x3ff7   :  { %v8702_v14 = vsel %vm1494_vm4, %v8700_v11, %v8694_v61 }
0x3ffa   :  { %v8692_v21 = vpop.permute.xlu0 %8691 }
0x3ffb   :  { %v8701_v13 = vsel %vm1494_vm4, %v8699_v0, %v8692_v21  ;;  %v11024_v21 = vld [vmem:[%s13733_s8 + $0x5] ss:$0 sm:$0xff] }
0x3ffc   :  { %11846 = vmatprep.mubr.msk.f32.mxu0 %vm64_vm0, %v8701_v13 }
0x3ffd   :  { %11847 = vmatmul.mubr.msk.f32.vlgmr.msra.gmra.mxu0 %vm64_vm0, %v8702_v14 }
0x4030   :  { %v7234_v15 = vpop.xlane.xlu0 %7233 }
0x4031   :  { %v7238_v18 = vmul.f32 0.125, %v7234_v15  ;;  %v7237_v5 = vpop.xlane.xlu1 %7236 }
0x4032   :  { %v7239_v27 = vmul.f32 0.125, %v7237_v5 }
0x4033   :  { %v7240_v6 = vsub.f32 %v7228_v8, %v7238_v18 }
0x4034   :  { %v7241_v30 = vsub.f32 %v7229_v12, %v7239_v27 }
0x4035   :  { %v7242_v20 = vmul.f32 %v7240_v6, %v7240_v6 }
0x4036   :  { %v7243_v37 = vmul.f32 %v7241_v30, %v7241_v30 }
0x4037   :  { %v7244_v25 = vsel %vm64_vm0, %v7242_v20, 0.0 }
0x4038   :  { %7245 = vadd.xlane.f32.xlu1 %v7244_v25  ;;  %v7247_v38 = vsel %vm64_vm0, %v7243_v37, 0.0 }
0x40bd   :  { %v11848_v19 = vpop.f32.mrf.mxu0 }
0x40be   :  { %v8785_v17 = vadd.f32 %v11848_v19, %v11020_v26 }
0x40bf   :  { %v8779_v16 = vpop.f32.mrf.mxu0 }
0x40c0   :  { %v8780_v28 = vadd.f32 %v11020_v26, %v8779_v16  ;;  %v8789_v31 = vadd.f32 %v13253_v24, %v8785_v17  ;;  %v10990_v24 = vld [vmem:[%s13733_s8 + $0x1] ss:$0 sm:$0xff] }
0x40c1   :  { %v7246_v32 = vpop.xlane.xlu1 %7245 }
0x40c2   :  { %v8788_v29 = vadd.f32 %v13245_v4, %v8780_v28  ;;  %v7250_v59 = vmul.f32 0.125, %v7246_v32  ;;  %v8795_v36 = vsel %vm64_vm0, %v8789_v31, 0.0  ;;  %v10989_v4 = vld [vmem:[%s13732_s7 + $0x1] ss:$0 sm:$0xff] }
0x40c4   :  { %v7252_v33 = vadd.f32 1e-05, %v7250_v59  ;;  %v8792_v34 = vsel %vm64_vm0, %v8788_v29, 0.0 }
0x40c5   :  { %8793 = vadd.xlane.f32.xlu0 %v8792_v34 }
0x40c6   :  { %12169 = vrsqrt.f32 %v7252_v33 }
0x40c9   :  { %8796 = vadd.xlane.f32.xlu0 %v8795_v36 }
0x40cd   :  { %7248 = vadd.xlane.f32.xlu0 %v7247_v38 }
0x40d3   :  { %v12170_v40 = vpop.eup %12169 }
0x40d4   :  { %v7256_v46 = vmul.f32 %v12170_v40, %v7240_v6 }
0x40d6   :  { %v7262_v54 = vmul.f32 %v10989_v4, %v7256_v46 }
0x40d8   :  { %v7268_v41 = vadd.f32 %v10990_v24, %v7262_v54 }
0x40da   :  { %11856 = vmatprep.mubr.msk.f32.mxu0 %vm64_vm0, %v7268_v41 }
0x414e   :  { %v8794_v42 = vpop.xlane.xlu0 %8793 }
0x414f   :  { %v8798_v45 = vmul.f32 0.125, %v8794_v42 }
0x4151   :  { %v8800_v43 = vsub.f32 %v8788_v29, %v8798_v45 }
0x4152   :  { %v8797_v44 = vpop.xlane.xlu0 %8796 }
0x4153   :  { %v8799_v47 = vmul.f32 0.125, %v8797_v44  ;;  %v8802_v2 = vmul.f32 %v8800_v43, %v8800_v43 }
0x4155   :  { %v8801_v1 = vsub.f32 %v8789_v31, %v8799_v47  ;;  %v8804_v48 = vsel %vm64_vm0, %v8802_v2, 0.0 }
0x4156   :  { %8805 = vadd.xlane.f32.xlu1 %v8804_v48  ;;  %v7249_v62 = vpop.xlane.xlu0 %7248 }
0x4157   :  { %v8803_v39 = vmul.f32 %v8801_v1, %v8801_v1  ;;  %v7251_v63 = vmul.f32 0.125, %v7249_v62 }
0x4159   :  { %v8807_v23 = vsel %vm64_vm0, %v8803_v39, 0.0  ;;  %v7253_v49 = vadd.f32 1e-05, %v7251_v63 }
0x415a   :  { %8808 = vadd.xlane.f32.xlu0 %v8807_v23 }
0x415b   :  { %12171 = vrsqrt.f32 %v7253_v49 }
0x4167   :  { %8922 = vrot.lane.b32.xlu1 %v11025_v52, %s13787_s27 }
0x4168   :  { %v12172_v53 = vpop.eup %12171 }
0x4169   :  { %v7257_v50 = vmul.f32 %v12172_v53, %v7241_v30 }
0x416b   :  { %v7263_v57 = vmul.f32 %v10989_v4, %v7257_v50 }
0x416d   :  { %v7269_v10 = vadd.f32 %v10990_v24, %v7263_v57 }
0x4170   :  { %8926 = vrot.lane.b32.xlu0 %v11027_v22, %s13787_s27 }
0x41df   :  { %v8806_v8 = vpop.xlane.xlu1 %8805 }
0x41e0   :  { %v8810_v12 = vmul.f32 0.125, %v8806_v8 }
0x41e2   :  { %v8812_v58 = vadd.f32 1e-05, %v8810_v12 }
0x41e3   :  { %v8923_v60 = vpop.permute.xlu1 %8922  ;;  %v8809_v7 = vpop.xlane.xlu0 %8808 }
0x41e4   :  { %12173 = vrsqrt.f32 %v8812_v58  ;;  %v8811_v9 = vmul.f32 0.125, %v8809_v7  ;;  %11854 = vmatprep.subr.mxu0 %v8923_v60 }
0x41e5   :  { %11855 = vmatpush3.msra.mxu0 %v8923_v60 }
0x41e6   :  { %v8813_v56 = vadd.f32 1e-05, %v8811_v9  ;;  %11857 = vmatmul.mubr.msk.f32.vlgmr.msra.gmra.mxu0 %vm64_vm0, %v7269_v10  ;;  %11864 = vmatprep.subr.mxu0 %v12229_v3 }
0x41e7   :  { %11866 = vmatprep.mubr.msk.f32.mxu0 %vm12230_vm1, %v12229_v3  ;;  %v8927_v20 = vpop.permute.xlu0 %8926 }
0x41e8   :  { %12175 = vrsqrt.f32 %v8813_v56 }
0x41f1   :  { %v12174_v61 = vpop.eup %12173 }
0x41f2   :  { %v8816_v0 = vmul.f32 %v12174_v61, %v8800_v43 }
0x41f4   :  { %v8822_v11 = vmul.f32 %v11023_v35, %v8816_v0 }
0x41f5   :  { %v12176_v13 = vpop.eup %12175 }
0x41f6   :  { %v8817_v14 = vmul.f32 %v12176_v13, %v8801_v1  ;;  %v13487_v15 = vadd.f32 %v11024_v21, %v8822_v11 }
0x41f8   :  { %v8823_v18 = vmul.f32 %v11023_v35, %v8817_v14  ;;  %11851 = vmatprep.mubr.msk.f32.mxu1 %vm64_vm0, %v13487_v15 }
0x41fa   :  { %v13491_v6 = vadd.f32 %v11024_v21, %v8823_v18 }
0x41fc   :  { %11852 = vmatmul.mubr.msk.f32.vlgmr.msra.gmra.mxu1 %vm64_vm0, %v13491_v6 }
0x41fd   :  { %11861 = vmatprep.mubr.msk.f32.mxu1 %vm12230_vm1, %v12229_v3 }
0x42a6   :  { %v11858_v25 = vpop.f32.mrf.mxu0 }
0x42a7   :  { %v13497_v5 = vadd.f32 %v11858_v25, %v8927_v20 }
0x42a8   :  { %v9001_v19 = vpop.f32.mrf.mxu0 }
0x42a9   :  { %v13499_v26 = vadd.f32 %v9001_v19, %v8927_v20  ;;  %11865 = vmatpush3.xpose.msk.msra.mxu0 %vm149_vm2, %v13497_v5 }
0x42aa   :  { %11874 = vmatprep.subr.mxu0 %v12229_v3 }
0x42ab   :  { %11860 = vmatpush3.xpose.msk.msra.mxu1 %vm149_vm2, %v13499_v26 }
0x42ac   :  { %11869 = vmatprep.subr.mxu1 %v12229_v3 }
0x42bc   :  { %v11853_v16 = vpop.f32.mrf.mxu1 }
0x42bd   :  { %v13507_v27 = vadd.f32 %v11853_v16, %v11027_v22 }
0x42be   :  { %v8912_v17 = vpop.f32.mrf.mxu1 }
0x42bf   :  { %v13509_v28 = vadd.f32 %v11027_v22, %v8912_v17  ;;  %11867 = vmatmul.mubr.msk.f32.vlgmr.msra.gmra.mxu0 %vm149_vm2, %v13507_v27 }
0x42c0   :  { %11876 = vmatprep.mubr.msk.f32.mxu0 %vm12230_vm1, %v12229_v3 }
0x42c1   :  { %11862 = vmatmul.mubr.msk.f32.vlgmr.msra.gmra.mxu1 %vm149_vm2, %v13509_v28 }
0x42c2   :  { %11871 = vmatprep.mubr.msk.f32.mxu1 %vm12230_vm1, %v12229_v3 }
0x437f   :  { %v9158_v32 = vpop.f32.mrf.mxu0 }
0x4380   :  { %v9165_v29 = vsel %vm64_vm0, %v9158_v32, -inf }
0x4381   :  { %9166 = vmax.xlane.f32.xlu0 %v9165_v29  ;;  %v9082_v59 = vpop.f32.mrf.mxu1  ;;  %v11868_v30 = vpop.f32.mrf.mxu0 }
0x4382   :  { %v9162_v31 = vsel %vm64_vm0, %v9082_v59, -inf }
0x4383   :  { %9163 = vmax.xlane.f32.xlu1 %v9162_v31  ;;  %v11863_v33 = vpop.f32.mrf.mxu1 }
0x4394   :  { %9184 = vrot.lane.b32.xlu1 %v13499_v26, %s13787_s27 }
0x4397   :  { %9260 = vrot.lane.b32.xlu0 %v13497_v5, %s13787_s27 }
0x4398   :  { %9338 = vrot.lane.b32.xlu1 %v13499_v26, %s13784_s0 }
0x439c   :  { %9416 = vrot.lane.b32.xlu1 %v13497_v5, %s13784_s0 }
0x440a   :  { %v9167_v34 = vpop.xlane.xlu0 %9166 }
0x440b   :  { %v9169_v36 = vsub.f32 %v9158_v32, %v9167_v34 }
0x440c   :  { %v9164_v37 = vpop.xlane.xlu1 %9163 }
0x440d   :  { %v9172_v38 = vmul.f32 1.442695, %v9169_v36  ;;  %v9168_v40 = vsub.f32 %v9082_v59, %v9164_v37 }
0x440e   :  { %v9261_v4 = vpop.permute.xlu0 %9260 }
0x440f   :  { %12177 = vpow2.f32 %v9172_v38  ;;  %v9170_v46 = vmul.f32 1.442695, %v9168_v40  ;;  %11875 = vmatpush3.msra.mxu0 %v9261_v4 }
0x4410   :  { %v9185_v24 = vpop.permute.xlu1 %9184  ;;  %11884 = vmatprep.subr.mxu0 %v12229_v3 }
0x4411   :  { %12179 = vpow2.f32 %v9170_v46  ;;  %11870 = vmatpush3.msra.mxu1 %v9185_v24 }
0x4412   :  { %11879 = vmatprep.subr.mxu1 %v12229_v3 }
0x4414   :  { %v9339_v45 = vpop.permute.xlu1 %9338 }
0x4418   :  { %v9417_v43 = vpop.permute.xlu1 %9416 }
0x441c   :  { %v12178_v54 = vpop.eup %12177 }
0x441d   :  { %v9177_v41 = vsel %vm64_vm0, %v12178_v54, 0.0 }
0x441e   :  { %v12180_v52 = vpop.eup %12179  ;;  %9178 = vadd.xlane.f32.xlu0 %v9177_v41 }
0x441f   :  { %v9174_v42 = vsel %vm64_vm0, %v12180_v52, 0.0 }
0x4420   :  { %9175 = vadd.xlane.f32.xlu1 %v9174_v42 }
0x4431   :  { %9414 = vrot.lane.b32.xlu1 %v13507_v27, %s13784_s0 }
0x4434   :  { %9336 = vrot.lane.b32.xlu0 %v13509_v28, %s13784_s0 }
0x44a7   :  { %v9179_v44 = vpop.xlane.xlu0 %9178 }
0x44a8   :  { %12181 = vrcp.f32 %v9179_v44 }
0x44a9   :  { %v9176_v47 = vpop.xlane.xlu1 %9175 }
0x44aa   :  { %12183 = vrcp.f32 %v9176_v47 }
0x44ab   :  { %v9337_v22 = vpop.permute.xlu0 %9336 }
0x44ad   :  { %v9415_v23 = vpop.permute.xlu1 %9414 }
0x44b5   :  { %v12182_v2 = vpop.eup %12181 }
0x44b6   :  { %v9183_v1 = vmul.f32 %v12182_v2, %v12178_v54 }
0x44b7   :  { %v12184_v48 = vpop.eup %12183 }
0x44b8   :  { %11877 = vmatmul.mubr.msk.f32.vlgmr.msra.gmra.mxu0 %vm64_vm0, %v9183_v1  ;;  %v9181_v39 = vmul.f32 %v12184_v48, %v12180_v52 }
0x44b9   :  { %11885 = vmatpush3.xpose.msk.msra.mxu0 %vm149_vm2, %v9417_v43  ;;  %11886 = vmatprep.mubr.msk.f32.mxu0 %vm12230_vm1, %v12229_v3 }
0x44ba   :  { %11872 = vmatmul.mubr.msk.f32.vlgmr.msra.gmra.mxu1 %vm64_vm0, %v9181_v39  ;;  %11894 = vmatprep.subr.mxu0 %v12229_v3 }
0x44bb   :  { %11880 = vmatpush3.xpose.msk.msra.mxu1 %vm149_vm2, %v9339_v45  ;;  %11881 = vmatprep.mubr.msk.f32.mxu1 %vm12230_vm1, %v12229_v3 }
0x44bc   :  { %11887 = vmatmul.mubr.msk.f32.vlgmr.msra.gmra.mxu0 %vm149_vm2, %v9415_v23  ;;  %11889 = vmatprep.subr.mxu1 %v12229_v3 }
0x44bd   :  { %11896 = vmatprep.mubr.msk.f32.mxu0 %vm12230_vm1, %v12229_v3 }
0x44be   :  { %11882 = vmatmul.mubr.msk.f32.vlgmr.msra.gmra.mxu1 %vm149_vm2, %v9337_v22 }
0x44bf   :  { %11891 = vmatprep.mubr.msk.f32.mxu1 %vm12230_vm1, %v12229_v3 }
0x4578   :  { %v13553_v62 = vpop.f32.mrf.mxu0 }
0x457a   :  { %v13555_v63 = vpop.f32.mrf.mxu1  ;;  %v11878_v49 = vpop.f32.mrf.mxu0 }
0x457c   :  { %v11873_v53 = vpop.f32.mrf.mxu1  ;;  %v9488_v50 = vpop.f32.mrf.mxu0 }
0x457d   :  { %v9495_v8 = vsel %vm64_vm0, %v9488_v50, -inf }
0x457e   :  { %9496 = vmax.xlane.f32.xlu1 %v9495_v8  ;;  %v9410_v12 = vpop.f32.mrf.mxu1  ;;  %v11888_v57 = vpop.f32.mrf.mxu0 }
0x457f   :  { %v9492_v58 = vsel %vm64_vm0, %v9410_v12, -inf }
0x4580   :  { %9493 = vmax.xlane.f32.xlu0 %v9492_v58  ;;  %v11883_v60 = vpop.f32.mrf.mxu1 }
0x458f   :  { %9514 = vrot.lane.b32.xlu1 %v13499_v26, %s13783_s30 }
0x4593   :  { %9668 = vrot.lane.b32.xlu1 %v13499_v26, %s13780_s16 }
0x4597   :  { %9746 = vrot.lane.b32.xlu1 %v13497_v5, %s13780_s16 }
0x459b   :  { %9744 = vrot.lane.b32.xlu1 %v13507_v27, %s13780_s16 }
0x4607   :  { %v9497_v7 = vpop.xlane.xlu1 %9496 }
0x4608   :  { %v9499_v9 = vsub.f32 %v9488_v50, %v9497_v7 }
0x4609   :  { %v9494_v10 = vpop.xlane.xlu0 %9493 }
0x460a   :  { %v9502_v56 = vmul.f32 1.442695, %v9499_v9  ;;  %v9498_v61 = vsub.f32 %v9410_v12, %v9494_v10 }
0x460b   :  { %v9515_v35 = vpop.permute.xlu1 %9514 }
0x460c   :  { %12185 = vpow2.f32 %v9502_v56  ;;  %v9500_v0 = vmul.f32 1.442695, %v9498_v61  ;;  %11890 = vmatpush3.msra.mxu1 %v9515_v35 }
0x460d   :  { %11899 = vmatprep.subr.mxu1 %v12229_v3 }
0x460e   :  { %12187 = vpow2.f32 %v9500_v0 }
0x460f   :  { %v9669_v25 = vpop.permute.xlu1 %9668 }
0x4613   :  { %v9747_v17 = vpop.permute.xlu1 %9746 }
0x4617   :  { %v9745_v30 = vpop.permute.xlu1 %9744 }
0x4619   :  { %v12186_v21 = vpop.eup %12185 }
0x461a   :  { %v9507_v11 = vsel %vm64_vm0, %v12186_v21, 0.0 }
0x461b   :  { %v12188_v13 = vpop.eup %12187  ;;  %9508 = vadd.xlane.f32.xlu0 %v9507_v11 }
0x461c   :  { %v9504_v14 = vsel %vm64_vm0, %v12188_v13, 0.0 }
0x461f   :  { %9505 = vadd.xlane.f32.xlu0 %v9504_v14 }
0x4635   :  { %9590 = vrot.lane.b32.xlu0 %v13497_v5, %s13783_s30 }
0x4639   :  { %9666 = vrot.lane.b32.xlu0 %v13509_v28, %s13780_s16 }
0x46a4   :  { %v9509_v18 = vpop.xlane.xlu0 %9508 }
0x46a5   :  { %12189 = vrcp.f32 %v9509_v18 }
0x46a8   :  { %v9506_v20 = vpop.xlane.xlu0 %9505 }
0x46a9   :  { %12191 = vrcp.f32 %v9506_v20 }
0x46ac   :  { %v9591_v19 = vpop.permute.xlu0 %9590 }
0x46ad   :  { %11895 = vmatpush3.msra.mxu0 %v9591_v19 }
0x46ae   :  { %11904 = vmatprep.subr.mxu0 %v12229_v3 }
0x46b0   :  { %v9667_v31 = vpop.permute.xlu0 %9666 }
0x46b2   :  { %v12190_v16 = vpop.eup %12189 }
0x46b3   :  { %v9513_v32 = vmul.f32 %v12190_v16, %v12186_v21 }
0x46b5   :  { %11897 = vmatmul.mubr.msk.f32.vlgmr.msra.gmra.mxu0 %vm64_vm0, %v9513_v32 }
0x46b6   :  { %v12192_v29 = vpop.eup %12191  ;;  %11905 = vmatpush3.xpose.msk.msra.mxu0 %vm149_vm2, %v9747_v17  ;;  %11906 = vmatprep.mubr.msk.f32.mxu0 %vm12230_vm1, %v12229_v3 }
0x46b7   :  { %v9511_v59 = vmul.f32 %v12192_v29, %v12188_v13  ;;  %11914 = vmatprep.subr.mxu0 %v12229_v3 }
0x46b9   :  { %11892 = vmatmul.mubr.msk.f32.vlgmr.msra.gmra.mxu1 %vm64_vm0, %v9511_v59  ;;  %11907 = vmatmul.mubr.msk.f32.vlgmr.msra.gmra.mxu0 %vm149_vm2, %v9745_v30 }
0x46ba   :  { %11900 = vmatpush3.xpose.msk.msra.mxu1 %vm149_vm2, %v9669_v25  ;;  %11901 = vmatprep.mubr.msk.f32.mxu1 %vm12230_vm1, %v12229_v3 }
0x46bb   :  { %11909 = vmatprep.subr.mxu1 %v12229_v3  ;;  %11916 = vmatprep.mubr.msk.f32.mxu0 %vm12230_vm1, %v12229_v3 }
0x46bd   :  { %11902 = vmatmul.mubr.msk.f32.vlgmr.msra.gmra.mxu1 %vm149_vm2, %v9667_v31 }
0x46be   :  { %11911 = vmatprep.mubr.msk.f32.mxu1 %vm12230_vm1, %v12229_v3 }
0x4775   :  { %v13591_v33 = vpop.f32.mrf.mxu0 }
0x4777   :  { %v11898_v34 = vpop.f32.mrf.mxu0 }
0x4779   :  { %v13593_v36 = vpop.f32.mrf.mxu1  ;;  %v9818_v37 = vpop.f32.mrf.mxu0 }
0x477a   :  { %v9825_v38 = vsel %vm64_vm0, %v9818_v37, -inf }
0x477b   :  { %9826 = vmax.xlane.f32.xlu1 %v9825_v38  ;;  %v11893_v40 = vpop.f32.mrf.mxu1  ;;  %v11908_v4 = vpop.f32.mrf.mxu0 }
0x477d   :  { %v9740_v46 = vpop.f32.mrf.mxu1 }
0x477e   :  { %v9822_v24 = vsel %vm64_vm0, %v9740_v46, -inf }
0x477f   :  { %9823 = vmax.xlane.f32.xlu0 %v9822_v24  ;;  %v11903_v54 = vpop.f32.mrf.mxu1 }
0x478c   :  { %9844 = vrot.lane.b32.xlu1 %v13499_v26, %s13781_s17 }
0x4790   :  { %9998 = vrot.lane.b32.xlu1 %v13499_v26, %s13775_s25 }
0x4794   :  { %10076 = vrot.lane.b32.xlu1 %v13497_v5, %s13775_s25 }
0x4798   :  { %10074 = vrot.lane.b32.xlu1 %v13507_v27, %s13775_s25 }
0x4804   :  { %v9827_v41 = vpop.xlane.xlu1 %9826 }
0x4805   :  { %v9829_v52 = vsub.f32 %v9818_v37, %v9827_v41 }
0x4807   :  { %v9832_v42 = vmul.f32 1.442695, %v9829_v52 }
0x4808   :  { %v9845_v45 = vpop.permute.xlu1 %9844  ;;  %v9824_v43 = vpop.xlane.xlu0 %9823 }
0x4809   :  { %12193 = vpow2.f32 %v9832_v42  ;;  %v9828_v44 = vsub.f32 %v9740_v46, %v9824_v43  ;;  %11910 = vmatpush3.msra.mxu1 %v9845_v45 }
0x480a   :  { %11919 = vmatprep.subr.mxu1 %v12229_v3 }
0x480b   :  { %v9830_v47 = vmul.f32 1.442695, %v9828_v44 }
0x480c   :  { %v9999_v22 = vpop.permute.xlu1 %9998 }
0x480d   :  { %12195 = vpow2.f32 %v9830_v47 }
0x4810   :  { %v10077_v50 = vpop.permute.xlu1 %10076 }
0x4814   :  { %v10075_v57 = vpop.permute.xlu1 %10074 }
0x4816   :  { %v12194_v2 = vpop.eup %12193 }
0x4817   :  { %v9837_v1 = vsel %vm64_vm0, %v12194_v2, 0.0 }
0x4818   :  { %9838 = vadd.xlane.f32.xlu0 %v9837_v1 }
0x481a   :  { %v12196_v48 = vpop.eup %12195 }
0x481b   :  { %v9834_v39 = vsel %vm64_vm0, %v12196_v48, 0.0 }
0x481c   :  { %9835 = vadd.xlane.f32.xlu0 %v9834_v39 }
0x4832   :  { %9920 = vrot.lane.b32.xlu0 %v13497_v5, %s13781_s17 }
0x4836   :  { %9996 = vrot.lane.b32.xlu0 %v13509_v28, %s13775_s25 }
0x48a1   :  { %v9839_v27 = vpop.xlane.xlu0 %9838 }
0x48a2   :  { %12197 = vrcp.f32 %v9839_v27 }
0x48a5   :  { %v9836_v23 = vpop.xlane.xlu0 %9835 }
0x48a6   :  { %12199 = vrcp.f32 %v9836_v23 }
0x48a9   :  { %v9921_v49 = vpop.permute.xlu0 %9920 }
0x48aa   :  { %11915 = vmatpush3.msra.mxu0 %v9921_v49 }
0x48ab   :  { %11924 = vmatprep.subr.mxu0 %v12229_v3 }
0x48ad   :  { %v9997_v58 = vpop.permute.xlu0 %9996 }
0x48af   :  { %v12198_v53 = vpop.eup %12197 }
0x48b0   :  { %v9843_v8 = vmul.f32 %v12198_v53, %v12194_v2 }
0x48b2   :  { %11917 = vmatmul.mubr.msk.f32.vlgmr.msra.gmra.mxu0 %vm64_vm0, %v9843_v8 }
0x48b3   :  { %v12200_v12 = vpop.eup %12199  ;;  %11925 = vmatpush3.xpose.msk.msra.mxu0 %vm149_vm2, %v10077_v50  ;;  %11926 = vmatprep.mubr.msk.f32.mxu0 %vm12230_vm1, %v12229_v3 }
0x48b4   :  { %v9841_v28 = vmul.f32 %v12200_v12, %v12196_v48  ;;  %11934 = vmatprep.subr.mxu0 %v12229_v3 }
0x48b6   :  { %11912 = vmatmul.mubr.msk.f32.vlgmr.msra.gmra.mxu1 %vm64_vm0, %v9841_v28  ;;  %11927 = vmatmul.mubr.msk.f32.vlgmr.msra.gmra.mxu0 %vm149_vm2, %v10075_v57 }
0x48b7   :  { %11920 = vmatpush3.xpose.msk.msra.mxu1 %vm149_vm2, %v9999_v22  ;;  %11921 = vmatprep.mubr.msk.f32.mxu1 %vm12230_vm1, %v12229_v3 }
0x48b8   :  { %11929 = vmatprep.subr.mxu1 %v12229_v3  ;;  %11936 = vmatprep.mubr.msk.f32.mxu0 %vm12230_vm1, %v12229_v3 }
0x48ba   :  { %11922 = vmatmul.mubr.msk.f32.vlgmr.msra.gmra.mxu1 %vm149_vm2, %v9997_v58 }
0x48bb   :  { %11931 = vmatprep.mubr.msk.f32.mxu1 %vm12230_vm1, %v12229_v3 }
0x4972   :  { %v9992_v60 = vpop.f32.mrf.mxu0 }
0x4974   :  { %v11918_v7 = vpop.f32.mrf.mxu0 }
0x4976   :  { %v9916_v9 = vpop.f32.mrf.mxu1  ;;  %v10148_v10 = vpop.f32.mrf.mxu0 }
0x4977   :  { %v10155_v56 = vsel %vm64_vm0, %v10148_v10, -inf }
0x4978   :  { %10156 = vmax.xlane.f32.xlu1 %v10155_v56  ;;  %v11913_v61 = vpop.f32.mrf.mxu1  ;;  %v11928_v35 = vpop.f32.mrf.mxu0 }
0x497a   :  { %v10070_v0 = vpop.f32.mrf.mxu1 }
0x497b   :  { %v10152_v21 = vsel %vm64_vm0, %v10070_v0, -inf }
0x497c   :  { %10153 = vmax.xlane.f32.xlu0 %v10152_v21  ;;  %v11923_v11 = vpop.f32.mrf.mxu1 }
0x4989   :  { %10174 = vrot.lane.b32.xlu1 %v13499_v26, %s13774_s19 }
0x498d   :  { %10328 = vrot.lane.b32.xlu1 %v13593_v36, %s13777_s23 }
0x4991   :  { %10330 = vrot.lane.b32.xlu1 %v13591_v33, %s13777_s23 }
0x4995   :  { %10338 = vrot.lane.b32.xlu1 %v9992_v60, %s13778_s20 }
0x4a01   :  { %v10157_v3 = vpop.xlane.xlu1 %10156 }
0x4a02   :  { %v10159_v13 = vsub.f32 %v10148_v10, %v10157_v3  ;;  %v11059_v3 = vld [vmem:[%s13732_s7 + $0x6] ss:$0 sm:$0xff] }
0x4a04   :  { %v10162_v14 = vmul.f32 1.442695, %v10159_v13 }
0x4a05   :  { %v10175_v18 = vpop.permute.xlu1 %10174  ;;  %v10154_v20 = vpop.xlane.xlu0 %10153 }
0x4a06   :  { %12201 = vpow2.f32 %v10162_v14  ;;  %v10158_v25 = vsub.f32 %v10070_v0, %v10154_v20  ;;  %11930 = vmatpush3.msra.mxu1 %v10175_v18  ;;  %v11060_v14 = vld [vmem:[%s13733_s8 + $0x6] ss:$0 sm:$0xff] }
0x4a08   :  { %v10160_v19 = vmul.f32 1.442695, %v10158_v25 }
0x4a09   :  { %v10329_v46 = vpop.permute.xlu1 %10328 }
0x4a0a   :  { %12203 = vpow2.f32 %v10160_v19  ;;  %v10350_v52 = vsel %vm149_vm2, %v13555_v63, %v10329_v46  ;;  %v11056_v63 = vld [vmem:[%s13730_s6 + $0x4] ss:$0 sm:$0xff] }
0x4a0d   :  { %v10331_v24 = vpop.permute.xlu1 %10330 }
0x4a0e   :  { %v10351_v45 = vsel %vm149_vm2, %v13553_v62, %v10331_v24 }
0x4a11   :  { %v10339_v54 = vpop.permute.xlu1 %10338 }
0x4a12   :  { %v10353_v47 = vsel %vm1491_vm3, %v10351_v45, %v10339_v54 }
0x4a13   :  { %v12202_v16 = vpop.eup %12201 }
0x4a14   :  { %v10167_v26 = vsel %vm64_vm0, %v12202_v16, 0.0 }
0x4a15   :  { %10168 = vadd.xlane.f32.xlu0 %v10167_v26 }
0x4a17   :  { %v12204_v17 = vpop.eup %12203 }
0x4a18   :  { %v10164_v32 = vsel %vm64_vm0, %v12204_v17, 0.0 }
0x4a19   :  { %10165 = vadd.xlane.f32.xlu0 %v10164_v32  ;;  %v11065_v32 = vld [vmem:[%s13735_s11 + $0x20] sm:$0xff] }
0x4a2f   :  { %10250 = vrot.lane.b32.xlu0 %v13497_v5, %s13774_s19  ;;  %v11026_v5 = vld [vmem:[%s13729_s5 + $0x20] sm:$0xff] }
0x4a30   :  { %11939 = vmatprep.subr.mxu1 %v11026_v5 }
0x4a33   :  { %10336 = vrot.lane.b32.xlu0 %v9916_v9, %s13778_s20 }
0x4a9e   :  { %v10169_v29 = vpop.xlane.xlu0 %10168 }
0x4a9f   :  { %12205 = vrcp.f32 %v10169_v29  ;;  %v11062_v29 = vld [vmem:[%s13736_s10 + $0x2] ss:$0 sm:$0xff] }
0x4aa2   :  { %v10166_v59 = vpop.xlane.xlu0 %10165 }
0x4aa3   :  { %12207 = vrcp.f32 %v10166_v59 }
0x4aa6   :  { %v10251_v30 = vpop.permute.xlu0 %10250 }
0x4aa7   :  { %11935 = vmatpush3.msra.mxu0 %v10251_v30 }
0x4aaa   :  { %v10337_v41 = vpop.permute.xlu0 %10336 }
0x4aab   :  { %v10352_v43 = vsel %vm1491_vm3, %v10350_v52, %v10337_v41 }
0x4aac   :  { %v12206_v31 = vpop.eup %12205 }
0x4aad   :  { %v10173_v33 = vmul.f32 %v12206_v31, %v12202_v16 }
0x4aaf   :  { %11937 = vmatmul.mubr.msk.f32.vlgmr.msra.gmra.mxu0 %vm64_vm0, %v10173_v33 }
0x4ab0   :  { %v12208_v34 = vpop.eup %12207 }
0x4ab1   :  { %v10171_v36 = vmul.f32 %v12208_v34, %v12204_v17  ;;  %v11066_v17 = vld [vmem:[%s13735_s11 + $0x28] sm:$0xff] }
0x4ab3   :  { %11932 = vmatmul.mubr.msk.f32.vlgmr.msra.gmra.mxu1 %vm64_vm0, %v10171_v36 }
0x4ab4   :  { %11940 = vmatpush3.msra.mxu1 %v11026_v5  ;;  %v11067_v5 = vld [vmem:[%s13737_s12 + $0x2] ss:$0 sm:$0xff] }
0x4ab5   :  { %11949 = vmatprep.subr.mxu1 %v11066_v17 }
0x4b6f   :  { %v10322_v37 = vpop.f32.mrf.mxu0 }
0x4b70   :  { %10346 = vrot.lane.b32.xlu1 %v10322_v37, %s13779_s18 }
0x4b71   :  { %v11938_v38 = vpop.f32.mrf.mxu0 }
0x4b73   :  { %v10246_v40 = vpop.f32.mrf.mxu1 }
0x4b74   :  { %10344 = vrot.lane.b32.xlu0 %v10246_v40, %s13779_s18 }
0x4b75   :  { %v11933_v4 = vpop.f32.mrf.mxu1 }
0x4be2   :  { %v10347_v42 = vpop.permute.xlu1 %10346 }
0x4be3   :  { %v10355_v1 = vsel %vm1494_vm4, %v10353_v47, %v10347_v42 }
0x4be6   :  { %v10345_v44 = vpop.permute.xlu0 %10344 }
0x4be7   :  { %v10354_v2 = vsel %vm1494_vm4, %v10352_v43, %v10345_v44 }
0x4be8   :  { %11941 = vmatprep.mubr.msk.f32.mxu1 %vm64_vm0, %v10354_v2 }
0x4be9   :  { %11942 = vmatmul.mubr.msk.f32.vlgmr.msra.gmra.mxu1 %vm64_vm0, %v10355_v1 }
0x4bea   :  { %11950 = vmatpush3.msra.mxu1 %v11066_v17 }
0x4beb   :  { %11951 = vmatprep.subr.mxu1 %v11065_v32 }
0x4bec   :  { %11952 = vmatpush3.msra.mxu1 %v11065_v32 }
0x4ca9   :  { %v11943_v48 = vpop.f32.mrf.mxu1 }
0x4caa   :  { %v10438_v39 = vadd.f32 %v11943_v48, %v11056_v63 }
0x4cab   :  { %v10432_v62 = vpop.f32.mrf.mxu1 }
0x4cac   :  { %v10442_v27 = vadd.f32 %v10438_v39, %v13491_v6  ;;  %v10433_v23 = vadd.f32 %v11056_v63, %v10432_v62  ;;  %v10704_v39 = vld [vmem:[%s13738_s13] sm:$0xff] }
0x4cae   :  { %v10441_v22 = vadd.f32 %v10433_v23, %v13487_v15  ;;  %v10448_v49 = vsel %vm64_vm0, %v10442_v27, 0.0  ;;  %v11061_v15 = vld [vmem:[%s13731_s9 + $0x10] sm:$0xff] }
0x4caf   :  { %10449 = vadd.xlane.f32.xlu1 %v10448_v49  ;;  %11944 = vmatprep.subr.mxu0 %v11061_v15 }
0x4cb0   :  { %v10445_v53 = vsel %vm64_vm0, %v10441_v22, 0.0  ;;  %11945 = vmatpush3.msra.mxu0 %v11061_v15  ;;  %v11072_v15 = vld [vmem:[%s13788_s14] ss:$0 sm:$0xff] }
0x4cb1   :  { %10446 = vadd.xlane.f32.xlu0 %v10445_v53  ;;  %11956 = vmatprep.subr.mxu0 %v10704_v39 }
0x4d38   :  { %v10450_v50 = vpop.xlane.xlu1 %10449 }
0x4d39   :  { %v10452_v8 = vmul.f32 0.125, %v10450_v50 }
0x4d3a   :  { %v10447_v12 = vpop.xlane.xlu0 %10446 }
0x4d3b   :  { %v10451_v28 = vmul.f32 0.125, %v10447_v12  ;;  %v10454_v57 = vsub.f32 %v10442_v27, %v10452_v8  ;;  %v11070_v8 = vld [vmem:[%s13732_s7 + $0x7] ss:$0 sm:$0xff] }
0x4d3d   :  { %v10453_v58 = vsub.f32 %v10441_v22, %v10451_v28  ;;  %v10456_v9 = vmul.f32 %v10454_v57, %v10454_v57 }
0x4d3f   :  { %v10455_v60 = vmul.f32 %v10453_v58, %v10453_v58  ;;  %v10460_v6 = vsel %vm64_vm0, %v10456_v9, 0.0 }
0x4d41   :  { %v10457_v7 = vsel %vm64_vm0, %v10455_v60, 0.0  ;;  %v11071_v60 = vld [vmem:[%s13733_s8 + $0x7] ss:$0 sm:$0xff] }
0x4d42   :  { %10458 = vadd.xlane.f32.xlu0 %v10457_v7 }
0x4d46   :  { %10461 = vadd.xlane.f32.xlu0 %v10460_v6 }
0x4dcb   :  { %v10459_v10 = vpop.xlane.xlu0 %10458 }
0x4dcc   :  { %v10463_v56 = vmul.f32 0.125, %v10459_v10 }
0x4dce   :  { %v10465_v61 = vadd.f32 1e-05, %v10463_v56 }
0x4dcf   :  { %v10462_v35 = vpop.xlane.xlu0 %10461 }
0x4dd0   :  { %12209 = vrsqrt.f32 %v10465_v61  ;;  %v10464_v0 = vmul.f32 0.125, %v10462_v35 }
0x4dd2   :  { %v10466_v21 = vadd.f32 1e-05, %v10464_v0 }
0x4dd4   :  { %12211 = vrsqrt.f32 %v10466_v21 }
0x4ddd   :  { %v12210_v11 = vpop.eup %12209 }
0x4dde   :  { %v10469_v13 = vmul.f32 %v12210_v11, %v10453_v58 }
0x4de0   :  { %v10475_v18 = vmul.f32 %v11059_v3, %v10469_v13 }
0x4de1   :  { %v12212_v20 = vpop.eup %12211 }
0x4de2   :  { %v10470_v25 = vmul.f32 %v12212_v20, %v10454_v57  ;;  %v10481_v19 = vadd.f32 %v11060_v14, %v10475_v18 }
0x4de4   :  { %v10476_v16 = vmul.f32 %v11059_v3, %v10470_v25  ;;  %11946 = vmatprep.mubr.msk.f32.mxu0 %vm64_vm0, %v10481_v19 }
0x4de6   :  { %v10482_v26 = vadd.f32 %v11060_v14, %v10476_v16 }
0x4de8   :  { %11947 = vmatmul.mubr.msk.f32.vlgmr.msra.gmra.mxu0 %vm64_vm0, %v10482_v26 }
0x4de9   :  { %11957 = vmatpush3.msra.mxu0 %v10704_v39 }
0x4ea8   :  { %v11948_v59 = vpop.f32.mrf.mxu0 }
0x4ea9   :  { %v10568_v30 = vadd.f32 %v11948_v59, %v11062_v29 }
0x4eaa   :  { %v10562_v31 = vpop.f32.mrf.mxu0 }
0x4eab   :  { %v10563_v33 = vadd.f32 %v11062_v29, %v10562_v31  ;;  %v10572_v36 = vmax.f32 %v10568_v30, 0.0 }
0x4ead   :  { %v10571_v34 = vmax.f32 %v10563_v33, 0.0 }
0x4eaf   :  { %11953 = vmatprep.mubr.msk.f32.mxu1 %vm1721_vm5, %v10571_v34 }
0x4eb0   :  { %11954 = vmatmul.mubr.msk.f32.vlgmr.msra.gmra.mxu1 %vm1721_vm5, %v10572_v36 }
0x4f70   :  { %v11955_v37 = vpop.f32.mrf.mxu1 }
0x4f71   :  { %v10659_v38 = vadd.f32 %v11955_v37, %v11067_v5 }
0x4f72   :  { %v10653_v40 = vpop.f32.mrf.mxu1 }
0x4f73   :  { %v10663_v4 = vadd.f32 %v10659_v38, %v10482_v26  ;;  %v10654_v46 = vadd.f32 %v11067_v5, %v10653_v40 }
0x4f75   :  { %v10662_v24 = vadd.f32 %v10654_v46, %v10481_v19  ;;  %v10669_v54 = vsel %vm64_vm0, %v10663_v4, 0.0 }
0x4f76   :  { %10670 = vadd.xlane.f32.xlu0 %v10669_v54 }
0x4f77   :  { %v10666_v41 = vsel %vm64_vm0, %v10662_v24, 0.0 }
0x4f78   :  { %10667 = vadd.xlane.f32.xlu1 %v10666_v41 }
0x4fff   :  { %v10671_v52 = vpop.xlane.xlu0 %10670 }
0x5000   :  { %v10673_v42 = vmul.f32 0.125, %v10671_v52 }
0x5001   :  { %v10668_v45 = vpop.xlane.xlu1 %10667 }
0x5002   :  { %v10675_v43 = vsub.f32 %v10663_v4, %v10673_v42  ;;  %v10672_v44 = vmul.f32 0.125, %v10668_v45 }
0x5004   :  { %v10674_v47 = vsub.f32 %v10662_v24, %v10672_v44  ;;  %v10677_v2 = vmul.f32 %v10675_v43, %v10675_v43 }
0x5006   :  { %v10681_v1 = vsel %vm64_vm0, %v10677_v2, 0.0  ;;  %v10676_v63 = vmul.f32 %v10674_v47, %v10674_v47 }
0x5007   :  { %10682 = vadd.xlane.f32.xlu0 %v10681_v1 }
0x5008   :  { %v10678_v48 = vsel %vm64_vm0, %v10676_v63, 0.0 }
0x5009   :  { %10679 = vadd.xlane.f32.xlu1 %v10678_v48 }
0x5090   :  { %v10683_v62 = vpop.xlane.xlu0 %10682 }
0x5091   :  { %v10685_v27 = vmul.f32 0.125, %v10683_v62 }
0x5092   :  { %v10680_v23 = vpop.xlane.xlu1 %10679 }
0x5093   :  { %v10687_v22 = vadd.f32 1e-05, %v10685_v27  ;;  %v10684_v49 = vmul.f32 0.125, %v10680_v23 }
0x5095   :  { %12213 = vrsqrt.f32 %v10687_v22  ;;  %v10686_v53 = vadd.f32 1e-05, %v10684_v49 }
0x5097   :  { %12215 = vrsqrt.f32 %v10686_v53 }
0x50a2   :  { %v12214_v50 = vpop.eup %12213 }
0x50a3   :  { %v10691_v12 = vmul.f32 %v12214_v50, %v10675_v43 }
0x50a4   :  { %v12216_v28 = vpop.eup %12215 }
0x50a5   :  { %v10690_v57 = vmul.f32 %v12216_v28, %v10674_v47  ;;  %v10697_v58 = vmul.f32 %v11070_v8, %v10691_v12 }
0x50a7   :  { %v10696_v7 = vmul.f32 %v11070_v8, %v10690_v57  ;;  %v10703_v6 = vadd.f32 %v11071_v60, %v10697_v58 }
0x50a9   :  { %v10702_v9 = vadd.f32 %v11071_v60, %v10696_v7 }
0x50ab   :  { %11958 = vmatprep.mubr.msk.f32.mxu0 %vm64_vm0, %v10702_v9 }
0x50ac   :  { %11959 = vmatmul.mubr.msk.f32.vlgmr.msra.gmra.mxu0 %vm64_vm0, %v10703_v6 }
0x516c   :  { %v11960_v10 = vpop.f32.mrf.mxu0 }
0x516d   :  { %v10790_v56 = vadd.f32 %v11960_v10, %v11072_v15 }
0x516e   :  { %v10784_v61 = vpop.f32.mrf.mxu0 }
0x516f   :  { %v11076_v35 = vmul.f32 -1.442695, %v10790_v56  ;;  %v10785_v0 = vadd.f32 %v11072_v15, %v10784_v61 }
0x5171   :  { %12217 = vpow2.f32 %v11076_v35  ;;  %v11075_v21 = vmul.f32 -1.442695, %v10785_v0 }
0x5173   :  { %12219 = vpow2.f32 %v11075_v21 }
0x517e   :  { %v12218_v11 = vpop.eup %12217 }
0x517f   :  { %v10800_v3 = vadd.f32 1.0, %v12218_v11 }
0x5180   :  { %v12220_v13 = vpop.eup %12219 }
0x5181   :  { %12221 = vrcp.f32 %v10800_v3  ;;  %v10799_v14 = vadd.f32 1.0, %v12220_v13 }
0x5183   :  { %12223 = vrcp.f32 %v10799_v14 }
0x518e   :  { %v12222_v18 = vpop.eup %12221 }
0x518f   :  { %10809 = vrot.lane.b32.xlu0 %v12222_v18, %s13778_s20 }
0x5190   :  { %v12224_v20 = vpop.eup %12223 }
0x5191   :  { %10807 = vrot.lane.b32.xlu1 %v12224_v20, %s13778_s20 }
0x5201   :  { %v10810_v25 = vpop.permute.xlu0 %10809 }
0x5202   :  { %v10814_v19 = vsel %vm1491_vm3, %v13016_v55, %v10810_v25 }
0x5203   :  { %10816 = vst.msk [vmem:[%s13789_s15 + $0x8] sm:$0xff] %vm64_vm0, %v10814_v19  ;;  %v10808_v16 = vpop.permute.xlu1 %10807 }
0x5204   :  { %v10813_v26 = vsel %vm1491_vm3, %v13021_v51, %v10808_v16 }
0x5205   :  { %10815 = vst.msk [vmem:[%s13789_s15] sm:$0xff] %vm64_vm0, %v10813_v26 }

</bundles_post_ra>
